<compile_context>
chip_gen: v7x
topology: tpu7x:2x2x1
jax: 0.10.0
libtpu: 0.0.40
codegen_flags: <defaults>
</compile_context>

<pallas_src>
import math

import jax
import jax.numpy as jnp
from jax.experimental import pallas as pl
from jax.experimental.pallas import tpu as pltpu


def _round_up(x, m):
    return ((x + m - 1) // m) * m


# ----------------------------------------------------------------------------
# Hardware-aware sizing helpers
# ----------------------------------------------------------------------------
def _device_kind():
    try:
        return jax.devices()[0].device_kind.lower()
    except Exception:  # pragma: no cover - defensive
        return ""


def _has_bf16_vpu(kind):
    # v2-v5 have no bf16 VALU; v6e / v7x do.
    if "tpu" not in kind:
        return False
    return not any(old in kind for old in ("v2", "v3", "v4", "v5"))


def _vmem_limit_bytes():
    phys = None
    try:
        phys = int(pltpu.get_tpu_info().vmem_capacity_bytes)
    except Exception:  # pragma: no cover - defensive
        phys = None
    if not phys or phys <= 0:
        phys = 64 << 20  # conservative (v7x per-TensorCore)
    if phys >= (100 << 20):          # v5e / v6e: 128 MiB physical
        return 64 << 20
    # v7x-class (64 MiB physical per TC): keep the whole plan well under it.
    return min(48 << 20, (phys * 3) // 4)


def _choose_fold(C):
    """Smallest g with (g*C) % 128 == 0, if the selection matrices stay small."""
    if C <= 0 or C >= 128:
        return 1
    g = 128 // math.gcd(C, 128)
    if g <= 1 or g * C > 4096:       # bounds (W,g)/(g,W) scratch + MXU work
        return 1
    return g


def _choose_block_e(W, itemsize, ef, vmem_limit):
    # Per-buffer budget for the double-buffered coeff input; leave >= half the
    # scoped limit for compiler temporaries (dot results / abs-diff tile), the
    # selection scratch and the resident (8, W) output block.
    per_buf = vmem_limit // 4
    by_budget = per_buf // max(W * itemsize, 1)
    block_e = min(2048, by_budget, _round_up(max(ef, 1), 8))
    return max(8, (block_e // 8) * 8)


def _num_core_splits(kind, B, n_e_total):
    # v7x has 2 TensorCores per chip; when B < 2 the only 'parallel' axis would
    # leave one core idle, so split the E reduction across a second axis.
    if B >= 2 or n_e_total < 2:
        return 1
    return 2 if ("v7" in kind or "7x" in kind) else 1


# ----------------------------------------------------------------------------
# Kernel
# ----------------------------------------------------------------------------
def _make_zloss_kernel(C, W, g, block_e, compute_dtype):
    """Kernel computing out[b, s] += sum_k |A_kj - A_kt| over one E tile.

    Inputs per grid step (b, s, k):
      label_ref : SMEM (B,) int32           -- scalar-prefetched true labels
      coeff_ref : VMEM (1, block_e, W)      -- one tile of (folded) coefficients
      out_ref   : VMEM (1, 1, 8, W) f32     -- resident accumulator (P3)
      gath_ref  : VMEM (W, g)               -- 0/1 gather matrix   (per b)
      bcast_ref : VMEM (g, W)               -- 0/1 broadcast matrix (per b)
    """
    folded = g > 1
    prec = jax.lax.Precision.HIGHEST  # selection matrices are 0/1 -> exact

    def kernel(label_ref, coeff_ref, out_ref, gath_ref, bcast_ref):
        b = pl.program_id(0)
        k = pl.program_id(2)
        t = label_ref[b]

        @pl.when(k == 0)
        def _init():
            out_ref[...] = jnp.zeros_like(out_ref)
            # gather matrix: gath[p, v] = 1  iff  p == v*C + t
            p = jax.lax.broadcasted_iota(jnp.int32, (W, g), 0)
            v = jax.lax.broadcasted_iota(jnp.int32, (W, g), 1)
            gath_ref[...] = jnp.where(p == v * C + t, 1.0, 0.0).astype(compute_dtype)
            if folded:
                # broadcast-back matrix: bcast[v, q] = 1 iff q in [v*C, (v+1)*C)
                vq = jax.lax.broadcasted_iota(jnp.int32, (g, W), 0)
                q = jax.lax.broadcasted_iota(jnp.int32, (g, W), 1)
                base = vq * C
                bcast_ref[...] = jnp.where(
                    (q >= base) & (q < base + C), 1.0, 0.0).astype(compute_dtype)

        a = coeff_ref[0]                           # (block_e, W)
        if a.dtype != compute_dtype:
            a = a.astype(compute_dtype)

        # gather the per-group true-label coefficients on the MXU
        gathered = jax.lax.dot_general(
            a, gath_ref[...], (((1,), (0,)), ((), ())),
            precision=prec, preferred_element_type=compute_dtype)   # (block_e, g)
        if folded:
            # broadcast each gathered value back over its C-lane group (MXU)
            a_t = jax.lax.dot_general(
                gathered, bcast_ref[...], (((1,), (0,)), ((), ())),
                precision=prec, preferred_element_type=compute_dtype)  # (block_e, W)
        else:
            a_t = gathered                          # (block_e, 1): lane-broadcast below

        diff = jnp.abs(a - a_t)                     # (block_e, W), input dtype
        # sublane-preserving reshape -> pure VALU adds; widen only here (f32)
        partial = jnp.sum(diff.reshape(block_e // 8, 8, W), axis=0,
                          dtype=jnp.float32)        # (8, W)
        out_ref[...] += partial[None, None]

    return kernel


# ----------------------------------------------------------------------------
# Wrappers
# ----------------------------------------------------------------------------
def _finalize(centers, abs_sums, labels):
    """loss_b = max_{j != t_b} (c_j - c_t + abs_sums[b, j]); O(B*C) in XLA."""
    c = centers.astype(jnp.float32)
    B, C = c.shape
    c_t = jnp.take_along_axis(c, labels[:, None], axis=1)          # (B, 1)
    ub = (c - c_t) + abs_sums                                       # (B, C)
    mask = jax.lax.broadcasted_iota(jnp.int32, (B, C), 1) == labels[:, None]
    return jnp.max(jnp.where(mask, -jnp.inf, ub), axis=-1)          # (B,)


def zloss_xla(centers, coeffs, labels):
    """Pure-XLA implementation (reference / small-problem fallback)."""
    labels = labels.astype(jnp.int32)
    a = coeffs.astype(jnp.float32)
    a_t = jnp.take_along_axis(a, labels[:, None, None], axis=2)     # (B, E, 1)
    s = jnp.sum(jnp.abs(a - a_t), axis=1)                           # (B, C)
    return _finalize(centers, s, labels)


def zloss_pallas_batched(centers, coeffs, labels, *, interpret=False):
    """centers: (B, C); coeffs: (B, E, C); labels: (B,) int -> (B,) f32 loss."""
    centers = jnp.asarray(centers)
    coeffs = jnp.asarray(coeffs)
    labels = jnp.asarray(labels).astype(jnp.int32)
    B, C = centers.shape
    _, E, C2 = coeffs.shape
    assert C2 == C and coeffs.shape[0] == B and labels.shape == (B,)

    if E == 0:
        return _finalize(centers, jnp.zeros((B, C), jnp.float32), labels)

    kind = _device_kind()
    itemsize = jnp.dtype(coeffs.dtype).itemsize
    # keep bf16 subtract/abs on bf16-capable VPUs (v6e/v7x); f32 upcast on v5e
    compute_dtype = jnp.dtype(
        coeffs.dtype if (coeffs.dtype == jnp.bfloat16 and _has_bf16_vpu(kind))
        else jnp.float32)

    # --- small-C lane folding -------------------------------------------------
    g = _choose_fold(C)
    W = g * C
    ef = -(-E // g)                                 # folded rows needed

    # --- generation-aware VMEM plan / tiling ----------------------------------
    vmem_limit = _vmem_limit_bytes()
    block_e = _choose_block_e(W, itemsize, ef, vmem_limit)
    n_e_total = -(-ef // block_e)
    n_split = _num_core_splits(kind, B, n_e_total)  # v7x dual-core when B < 2
    n_e = -(-ef // (n_split * block_e))
    ef_pad = n_split * n_e * block_e
    e_pad = ef_pad * g

    if e_pad != E:
        # zero rows contribute |0 - 0| = 0 to the abs-sum -> padding is exact
        coeffs = jnp.pad(coeffs, ((0, 0), (0, e_pad - E), (0, 0)))
    coeffs_f = coeffs.reshape(B, ef_pad, W)         # free row-major fold

    kernel = _make_zloss_kernel(C, W, g, block_e, compute_dtype)

    grid_spec = pltpu.PrefetchScalarGridSpec(
        num_scalar_prefetch=1,
        grid=(B, n_split, n_e),
        in_specs=[pl.BlockSpec((1, block_e, W),
                               lambda b, s, k, lbl: (b, s * n_e + k, 0))],
        out_specs=pl.BlockSpec((1, 1, 8, W),
                               lambda b, s, k, lbl: (b, s, 0, 0)),
        scratch_shapes=[pltpu.VMEM((W, g), compute_dtype),
                        pltpu.VMEM((g, W), compute_dtype)],
    )

    mxu_flops = 2 * B * ef_pad * W * g * (2 if g > 1 else 1)
    cost = pl.CostEstimate(
        flops=int(3 * B * ef_pad * W + mxu_flops),
        transcendentals=0,
        bytes_accessed=int(coeffs_f.size * itemsize
                           + B * n_split * 8 * W * 4 + 4 * B))

    out = pl.pallas_call(
        kernel,
        out_shape=jax.ShapeDtypeStruct((B, n_split, 8, W), jnp.float32),
        grid_spec=grid_spec,
        compiler_params=pltpu.CompilerParams(
            dimension_semantics=("parallel", "parallel", "arbitrary"),
            vmem_limit_bytes=vmem_limit),
        cost_estimate=cost,
        interpret=interpret,
    )(labels, coeffs_f)

    sums = out.sum(axis=(1, 2))                     # (B, W): core-split + sublanes
    if g > 1:
        sums = sums.reshape(B, g, C).sum(axis=1)    # un-fold groups
    return _finalize(centers, sums, labels)


def zloss(centers, coeffs, labels, *, force_pallas=False):
    """Dispatcher: plain XLA for tiny problems (per-step overhead dominates)."""
    E = coeffs.shape[1]
    C = centers.shape[1]
    if not force_pallas and (E == 0 or E * max(C, 1) < (1 << 15)):
        return zloss_xla(centers, coeffs, labels)
    return zloss_pallas_batched(centers, coeffs, labels)


def zloss_pallas(zonotope, true_label):
    """Single-zonotope convenience: zonotope (1+E, C), true_label -> scalar."""
    zonotope = jnp.asarray(zonotope)
    center = zonotope[0:1, :]                       # (1, C)
    coeffs = zonotope[1:, :][None]                  # (1, E, C)
    label = jnp.reshape(true_label, (1,)).astype(jnp.int32)
    return zloss_pallas_batched(center, coeffs, label)[0]


# ----------------------------------------------------------------------------
# Demo / self-test
# ----------------------------------------------------------------------------
if __name__ == "__main__":
    keys = jax.random.split(jax.random.PRNGKey(0), 6)

    # 1) canonical 10-class verification problem (exercises the folded path)
    B, C, E = 4, 10, 37
    centers = jax.random.normal(keys[0], (B, C), dtype=jnp.float32)
    coeffs = jax.random.normal(keys[1], (B, E, C), dtype=jnp.float32)
    labels = jax.random.randint(keys[2], (B,), 0, C).astype(jnp.int32)

    out = jax.block_until_ready(zloss_pallas_batched(centers, coeffs, labels))
    ref = jax.block_until_ready(zloss_xla(centers, coeffs, labels))
    assert out.shape == (B,)
    assert jnp.allclose(out, ref, rtol=1e-5, atol=1e-5), (out, ref)

    # dispatcher (small-problem XLA fallback) agrees too
    auto = jax.block_until_ready(zloss(centers, coeffs, labels))
    assert jnp.allclose(auto, ref, rtol=1e-5, atol=1e-5), (auto, ref)

    # single-zonotope path ((1+E, C) layout, as the PyTorch module receives it)
    zono0 = jnp.concatenate([centers[0:1], coeffs[0]], axis=0)
    loss0 = jax.block_until_ready(zloss_pallas(zono0, labels[0]))
    assert jnp.allclose(loss0, ref[0], rtol=1e-5, atol=1e-5), (loss0, ref[0])

    # 2) wider-than-128 logits (exercises the unfolded / lane-broadcast path)
    B2, C2, E2 = 2, 130, 24
    centers2 = jax.random.normal(keys[3], (B2, C2), dtype=jnp.float32)
    coeffs2 = jax.random.normal(keys[4], (B2, E2, C2), dtype=jnp.float32)
    labels2 = jax.random.randint(keys[5], (B2,), 0, C2).astype(jnp.int32)

    out2 = jax.block_until_ready(zloss_pallas_batched(centers2, coeffs2, labels2))
    ref2 = jax.block_until_ready(zloss_xla(centers2, coeffs2, labels2))
    assert jnp.allclose(out2, ref2, rtol=1e-5, atol=1e-5), (out2, ref2)

    print("KERNEL_OK")
</pallas_src>

<mosaic_0001>
module attributes {stable_mosaic.version = 11 : i64} {
  func.func @kernel(%arg0: i32, %arg1: i32, %arg2: i32, %arg3: memref<4xi32, #tpu.memory_space<smem>>, %arg4: memref<1x8x640xf32, #tpu.memory_space<vmem>>, %arg5: memref<1x1x8x640xf32, #tpu.memory_space<vmem>>, %arg6: memref<640x64xf32, #tpu.memory_space<vmem>>, %arg7: memref<64x640xf32, #tpu.memory_space<vmem>>) attributes {dimension_semantics = [#tpu.dimension_semantics<parallel>, #tpu.dimension_semantics<parallel>, #tpu.dimension_semantics<arbitrary>], iteration_bounds = array<i64: 4, 1, 1>, scalar_prefetch = 1 : i64, scratch_operands = 2 : i64, tpu.core_type = #tpu.core_type<tc>, window_params = [{transform_indices = @transform_0, window_bounds = array<i64: 1, 8, 640>}, {transform_indices = @transform_1, window_bounds = array<i64: 1, 1, 8, 640>}]} {
    %0 = arith.index_cast %arg0 : i32 to index
    %1 = memref.load %arg3[%0] : memref<4xi32, #tpu.memory_space<smem>>
    %c0_i32 = arith.constant 0 : i32
    %2 = arith.cmpi eq, %arg2, %c0_i32 : i32
    %3 = arith.extui %2 : i1 to i32
    %c0_i32_0 = arith.constant 0 : i32
    %4 = arith.cmpi ne, %3, %c0_i32_0 : i32
    scf.if %4 {
      %cst_17 = arith.constant 0.000000e+00 : f32
      %19 = vector.broadcast %cst_17 : f32 to vector<1x1x8x640xf32>
      %c0_18 = arith.constant 0 : index
      %c0_19 = arith.constant 0 : index
      %c0_20 = arith.constant 0 : index
      %c0_21 = arith.constant 0 : index
      %20 = vector.load %arg5[%c0_18, %c0_19, %c0_20, %c0_21] : memref<1x1x8x640xf32, #tpu.memory_space<vmem>>, vector<1x1x8x640xf32>
      tpu.vector_store %arg5[%c0_18, %c0_19, %c0_20, %c0_21], %19 {strides = array<i32>} : memref<1x1x8x640xf32, #tpu.memory_space<vmem>>, vector<1x1x8x640xf32>,
      %21 = tpu.iota {dimensions = array<i32: 0>} : vector<640x64xi32>
      %22 = tpu.iota {dimensions = array<i32: 1>} : vector<640x64xi32>
      %c10_i32 = arith.constant 10 : i32
      %23 = vector.broadcast %c10_i32 : i32 to vector<640x64xi32>
      %24 = arith.muli %22, %23 : vector<640x64xi32>
      %25 = vector.broadcast %1 : i32 to vector<640x64xi32>
      %26 = arith.addi %24, %25 : vector<640x64xi32>
      %27 = arith.cmpi eq, %21, %26 : vector<640x64xi32>
      %cst_22 = arith.constant 1.000000e+00 : f32
      %cst_23 = arith.constant 0.000000e+00 : f32
      %28 = vector.broadcast %cst_22 : f32 to vector<640x64xf32>
      %29 = vector.broadcast %cst_23 : f32 to vector<640x64xf32>
      %30 = arith.select %27, %28, %29 : vector<640x64xi1>, vector<640x64xf32>
      %c0_24 = arith.constant 0 : index
      %c0_25 = arith.constant 0 : index
      %31 = vector.load %arg6[%c0_24, %c0_25] : memref<640x64xf32, #tpu.memory_space<vmem>>, vector<640x64xf32>
      tpu.vector_store %arg6[%c0_24, %c0_25], %30 {strides = array<i32>} : memref<640x64xf32, #tpu.memory_space<vmem>>, vector<640x64xf32>,
      %32 = tpu.iota {dimensions = array<i32: 0>} : vector<64x640xi32>
      %33 = tpu.iota {dimensions = array<i32: 1>} : vector<64x640xi32>
      %c10_i32_26 = arith.constant 10 : i32
      %34 = vector.broadcast %c10_i32_26 : i32 to vector<64x640xi32>
      %35 = arith.muli %32, %34 : vector<64x640xi32>
      %36 = arith.cmpi sge, %33, %35 : vector<64x640xi32>
      %c10_i32_27 = arith.constant 10 : i32
      %37 = vector.broadcast %c10_i32_27 : i32 to vector<64x640xi32>
      %38 = arith.addi %35, %37 : vector<64x640xi32>
      %39 = arith.cmpi slt, %33, %38 : vector<64x640xi32>
      %40 = arith.andi %36, %39 : vector<64x640xi1>
      %cst_28 = arith.constant 1.000000e+00 : f32
      %cst_29 = arith.constant 0.000000e+00 : f32
      %41 = vector.broadcast %cst_28 : f32 to vector<64x640xf32>
      %42 = vector.broadcast %cst_29 : f32 to vector<64x640xf32>
      %43 = arith.select %40, %41, %42 : vector<64x640xi1>, vector<64x640xf32>
      %c0_30 = arith.constant 0 : index
      %c0_31 = arith.constant 0 : index
      %44 = vector.load %arg7[%c0_30, %c0_31] : memref<64x640xf32, #tpu.memory_space<vmem>>, vector<64x640xf32>
      tpu.vector_store %arg7[%c0_30, %c0_31], %43 {strides = array<i32>} : memref<64x640xf32, #tpu.memory_space<vmem>>, vector<64x640xf32>,
    } else {
    }
    %c0 = arith.constant 0 : index
    %c0_1 = arith.constant 0 : index
    %c0_2 = arith.constant 0 : index
    %5 = vector.load %arg4[%c0, %c0_1, %c0_2] : memref<1x8x640xf32, #tpu.memory_space<vmem>>, vector<1x8x640xf32>
    %6 = vector.shape_cast %5 : vector<1x8x640xf32> to vector<8x640xf32>
    %c0_3 = arith.constant 0 : index
    %c0_4 = arith.constant 0 : index
    %7 = vector.load %arg6[%c0_3, %c0_4] : memref<640x64xf32, #tpu.memory_space<vmem>>, vector<640x64xf32>
    %cst = arith.constant dense<0.000000e+00> : vector<8x64xf32>
    %8 = tpu.matmul %6, %7, %cst {dimension_numbers = #tpu.dot_dimension_numbers<[1], [0], [0], [1], [0, 0, 1, 1], [], []>, precision = #tpu.contract_precision<fp32>} : vector<8x640xf32>, vector<640x64xf32>, vector<8x64xf32> -> vector<8x64xf32>
    %c0_5 = arith.constant 0 : index
    %c0_6 = arith.constant 0 : index
    %9 = vector.load %arg7[%c0_5, %c0_6] : memref<64x640xf32, #tpu.memory_space<vmem>>, vector<64x640xf32>
    %cst_7 = arith.constant dense<0.000000e+00> : vector<8x640xf32>
    %10 = tpu.matmul %8, %9, %cst_7 {dimension_numbers = #tpu.dot_dimension_numbers<[1], [0], [0], [1], [0, 0, 1, 1], [], []>, precision = #tpu.contract_precision<fp32>} : vector<8x64xf32>, vector<64x640xf32>, vector<8x640xf32> -> vector<8x640xf32>
    %11 = arith.subf %6, %10 : vector<8x640xf32>
    %12 = math.absf %11 : vector<8x640xf32>
    %13 = vector.shape_cast %12 : vector<8x640xf32> to vector<1x8x640xf32>
    %cst_8 = arith.constant dense<0.000000e+00> : vector<8x640xf32>
    %14 = vector.multi_reduction <add>, %13, %cst_8 [0] : vector<1x8x640xf32> to vector<8x640xf32>
    %c0_9 = arith.constant 0 : index
    %c0_10 = arith.constant 0 : index
    %c0_11 = arith.constant 0 : index
    %c0_12 = arith.constant 0 : index
    %15 = vector.load %arg5[%c0_9, %c0_10, %c0_11, %c0_12] : memref<1x1x8x640xf32, #tpu.memory_space<vmem>>, vector<1x1x8x640xf32>
    %16 = vector.shape_cast %14 : vector<8x640xf32> to vector<1x1x8x640xf32>
    %17 = arith.addf %15, %16 : vector<1x1x8x640xf32>
    %c0_13 = arith.constant 0 : index
    %c0_14 = arith.constant 0 : index
    %c0_15 = arith.constant 0 : index
    %c0_16 = arith.constant 0 : index
    %18 = vector.load %arg5[%c0_13, %c0_14, %c0_15, %c0_16] : memref<1x1x8x640xf32, #tpu.memory_space<vmem>>, vector<1x1x8x640xf32>
    tpu.vector_store %arg5[%c0_13, %c0_14, %c0_15, %c0_16], %17 {strides = array<i32>} : memref<1x1x8x640xf32, #tpu.memory_space<vmem>>, vector<1x1x8x640xf32>,
    return
  }
  func.func @transform_0(%arg0: i32, %arg1: i32, %arg2: i32, %arg3: memref<4xi32, #tpu.memory_space<smem>>) -> (i32, i32, i32) {
    %c1_i32 = arith.constant 1 : i32
    %0 = arith.muli %arg1, %c1_i32 : i32
    %1 = arith.addi %0, %arg2 : i32
    %c0_i32 = arith.constant 0 : i32
    %c0_i32_0 = arith.constant 0 : i32
    return %arg0, %1, %c0_i32 : i32, i32, i32
  }
  func.func @transform_1(%arg0: i32, %arg1: i32, %arg2: i32, %arg3: memref<4xi32, #tpu.memory_space<smem>>) -> (i32, i32, i32, i32) {
    %c0_i32 = arith.constant 0 : i32
    %c0_i32_0 = arith.constant 0 : i32
    %c0_i32_1 = arith.constant 0 : i32
    return %arg0, %arg1, %c0_i32, %c0_i32_0 : i32, i32, i32, i32
  }
}

</mosaic_0001>

<bundles_post_ra>
// kernel: tpu_custom_call.1
= control target key start
LH: loop header
LB: loop body
LE: loop exit
PB: predicated region body
PF: predicated region fallthrough
CT: control target
= control target key end

     0   :  { %s10258_s0 = inlined_call_operand.hbm [shape: s32[4], index: 0, kind: input, shape index: {}]   ;;  %s10259_s1 = inlined_call_operand.hbm [shape: f32[4,8,640], index: 1, kind: input, shape index: {}]   ;;  %s10260_s2 = inlined_call_operand.hbm [shape: f32[4,1,8,640], index: 2, kind: output, shape index: {}]  }
   0x1   :  { %s7121_s11 = scalar_lea.hbm %s10258_s0, 16 }
   0x2   :  { %p7122_p0 = scmp.ne.s32.totalorder %s10258_s0, %s7121_s11  ;;  %p7125_p1 = scmp.lt.u32.totalorder %s7121_s11, %s10258_s0 }
   0x4   :  { %p7127_p2 = pnand %p7125_p1, %p7122_p0 }
   0x6   :  { %7130 = shalt.err (!%p7127_p2)  }
   0x7   :  { %s7247_s16 = smov [#allocation5]  }
   0x8   :  { %8 = dma.hbm_to_smem %s10258_s0, 16, %s7247_s16, [#allocation4] }
   0x9   :  { %7213 = dma.done.wait [#allocation4], 16 }
   0xa   :  { %7214 = vsyncadd [#allocation4], 4294967280 }
   0xb   :  { %10 = sfence }
   0xc   :  { %11 = vsyncpa [#allocation7], 0 }
   0xd   :  { %13 = vsyncpa [#allocation7 + $0x1], 0 }
   0xe   :  { %14 = vsyncpa [#allocation8], 0 }
   0xf   :  { %16 = vsyncpa [#allocation8 + $0x1], 0  ;;  %s7281_s19 = smov 0   ;;  %s7283_s20 = smov 0  }
  0x10   :  { %s7285_s21 = smov 0   ;;  %s7287_s22 = smov 0  }
  0x11   :  { %s7289_s23 = smov 0   ;;  %s7291_s24 = smov 0  }
  0x12 LB: > { %s5184_s0 = sadd.s32 4294967295, %s7245_s24   ;;  %s5185_s25 = sadd.s32 4294967294, %s7245_s24   ;;  %s7245_s24 = sphi %s7291_s24, %s22_s24   ;;  %s7241_s23 = sphi %s7289_s23, %s10821_s23   ;;  %s7237_s22 = sphi %s7287_s22, %s10820_s22   ;;  %s7233_s21 = sphi %s7285_s21, %s10819_s21   ;;  %s7229_s20 = sphi %s7283_s20, %s10818_s20   ;;  %s7225_s19 = sphi %s7281_s19, %s10817_s19  }
  0x13   : > { %s41_s26 = sadd.s32 1, %s7241_s23  ;;  %s52_s27 = sadd.s32 1, %s7233_s21 }
  0x14   : > { %p43_p3 = scmp.ge.s32.totalorder %s41_s26, 4  ;;  %p59_p4 = scmp.ne.s32.totalorder %s7233_s21, %s7229_s20 }
  0x15   : > { %p60_p5 = scmp.eq.s32.totalorder %s7245_s24, 0  ;;  %p65_p6 = scmp.ne.s32.totalorder %s7229_s20, %s7225_s19 }
  0x16   : > { %s10823_s26 = smov (%p43_p3, %s41_s26), 0  ;;  %p66_p8 = scmp.eq.s32.totalorder %s5184_s0, 0 }
  0x17   : > { %p7322_p7 = por %p60_p5, %p59_p4  ;;  %s47_s29 = ssub.s32 %s7241_s23, %s10823_s26 }
  0x18   : > { %p91_p9 = scmp.eq.s32.totalorder %s5184_s0, 3  ;;  %p50_p10 = scmp.eq.s32.totalorder %s47_s29, 0 }
  0x19   : > { %p7328_p11 = por %p66_p8, %p65_p6  ;;  %p97_p13 = scmp.eq.s32.totalorder %s5185_s25, 3 }
  0x1a   : > { %p7332_p12 = por %p91_p9, %p59_p4  ;;  %p7061_p1 = scmp.lt.s32.totalorder %s7245_s24, 4 }
  0x1b   : > { %s7337_s4 = scalar_select %p50_p10, %s7233_s21, %s52_s27  }
  0x1c   : > { %s10468_s3 = scalar_select %p7332_p12, 1, 0 }
  0x1d   : > { %p7339_p0 = por %p97_p13, %p65_p6  ;;  %s117_s6 = sand.u32 1, %s7233_s21  }
  0x1e   : > { %s7045_s7 = smul.u32 40, %s117_s6  ;;  %p7348_p2 = pnand %p7061_p1, %p7322_p7 }
  0x1f   : > { %s10469_s5 = scalar_select %p7339_p0, 1, 0 }
  0x20   : > { %s7046_s8 = smul.u32 640, %s7241_s23  ;;  %s121_s13 = scalar_lea.vmem [#allocation6], %s7045_s7 }
  0x21   : > { %s132_s14 = sshll.u32 %s121_s13, 4  ;;  %s118_s15 = scalar_lea.sflag [#allocation7], %s117_s6  ;;  %s7358_s14 = int_to_ptr.vmem [resolvable:$true] %s132_s14 }
  0x22   : > { %s7356_s12 = scalar_lea.hbm %s10259_s1, %s7046_s8  ;;  %p7133_p5 = pneg %p7348_p2 }
  0x23   : > { %s7131_s16 = scalar_lea.hbm %s7356_s12, 640  ;;  %s7136_s0 = scalar_lea.hbm %s10259_s1, 2560 }
  0x24   : > { %p7132_p4 = scmp.ne.s32.totalorder %s7356_s12, %s7131_s16  ;;  %p7137_p8 = scmp.lt.u32.totalorder %s7356_s12, %s10259_s1 }
  0x25   : > { %p7138_p9 = scmp.lt.u32.totalorder %s7136_s0, %s7131_s16  ;;  %p7140_p13 = scmp.lt.u32.totalorder %s7131_s16, %s7356_s12 }
  0x26   : > { %p7134_p6 = pnand %p7133_p5, %p7132_p4 }
  0x27   : > { %p7139_p10 = por %p7138_p9, %p7137_p8 }
  0x28   : > { %p7135_p7 = pneg %p7134_p6 }
  0x29   : > { %p7141_p1 = por %p7140_p13, %p7139_p10 }
  0x2b   : > { %p7142_p3 = pnand %p7141_p1, %p7135_p7 }
  0x2d   : > { %7145 = shalt.err (!%p7142_p3)
}
  0x2e   : > { %s7146_s28 = scalar_lea.vmem %s7358_s14, 640  ;;  %s7248_s29 = smov [#allocation6]  }
  0x2f   : > { %p7147_p4 = scmp.ne.s32.totalorder %s7358_s14, %s7146_s28  ;;  %s7151_s6 = sshll.u32 %s7248_s29, 4  ;;  %s7152_s6 = int_to_ptr.vmem [resolvable:$false] %s7151_s6 }
  0x30   : > { %s7153_s7 = scalar_lea.vmem %s7152_s6, 1280  ;;  %p7154_p12 = scmp.lt.s32.totalorder %s7358_s14, %s7152_s6 }
  0x31   : > { %p7149_p6 = pnand %p7147_p4, %p7133_p5  ;;  %p7155_p8 = scmp.lt.s32.totalorder %s7153_s7, %s7146_s28 }
  0x33   : > { %p7150_p0 = pneg %p7149_p6  ;;  %p7156_p9 = por %p7155_p8, %p7154_p12 }
  0x35   : > { %p7157_p10 = pnand %p7156_p9, %p7150_p0 }
  0x37   : > { %7160 = shalt.err (!%p7157_p10)
}
  0x38   : > { %7056 = dma.hbm_to_vmem [thread:$0]  (!%p7348_p2), %s7356_s12, 640, %s7358_s14, %s118_s15  }
  0x39   : > { %p137_p3 = scmp.lt.s32.totalorder %s7245_s24, 5  ;;  %p10471_p7 = scmp.ge.s32.totalorder %s7245_s24, 1 }
  0x3b   : > { %p138_p5 = pnand %p10471_p7, %p137_p3 }
  0x3d   : > { %141 = sbr.rel (%p138_p5) target bundleno = 1121 (0x461), region = 24 }
  0x44   : > { %s7389_s8 = sand.u32 1, %s7229_s20  }
  0x45   : > { %s7047_s10 = smul.u32 40, %s7389_s8  ;;  %s144_s11 = scalar_lea.sflag [#allocation7], %s7389_s8 }
  0x47   : > { %s7395_s9 = scalar_lea.vmem [#allocation6], %s7047_s10 }
  0x48   : > { %7216 = dma.done.wait (%p7328_p11), %s144_s11, 640  }
  0x49   : > { %7218 = vsyncadd (%p7328_p11), %s144_s11, 4294966656  ;;  %v177_v0 = vlaneseq  ;;  %s167_s12 = sld [smem:[#allocation5 + %s7237_s22]]  ;;  %vm10373_vm0 = vcmask 523264   ;;  %v10262_v27 = vmov 0.0   ;;  %s165_s30 = scalar_lea.vmem [#allocation9], %s7047_s10 }
  0x4a   : > { %s7048_s13 = smul.u32 640, %s7237_s22  ;;  %s5096_s14 = sshll.u32 %s165_s30, 4  ;;  %s10212_s14 = int_to_ptr.vmem [resolvable:$true] %s5096_s14 }
  0x4b   : > { %v7402_v1 = vshrl.u32 %v177_v0, 7  ;;  %v7404_v2 = vand.u32 127, %v177_v0  ;;  %s5080_s18 = scalar_lea.sflag [#allocation8], %s7389_s8  ;;  %s7161_s0 = scalar_lea.vmem %s10212_s14, 640 }
  0x4c   : > { %s10210_s17 = scalar_lea.hbm %s10260_s2, %s7048_s13  ;;  %p7162_p11 = scmp.ne.s32.totalorder %s10212_s14, %s7161_s0 }
  0x4d   : > { %10472 = vst [vmem:[#allocation13_spill] sm:$0xff] %v7402_v1  ;;  %10473 = vst [vmem:[#allocation14_spill] sm:$0xff] %v7404_v2  ;;  %v194_v3 = vadd.s32 128, %v7402_v1  ;;  %v195_v4 = vadd.s32 136, %v7402_v1  ;;  %v260_v5 = vmul.u32 10, %v7404_v2  ;;  %v7410_v6 = vadd.s32 8, %v7402_v1 }
  0x4e   : > { %v196_v7 = vadd.s32 144, %v7402_v1  ;;  %v197_v8 = vadd.s32 152, %v7402_v1  ;;  %v7415_v9 = vadd.s32 16, %v7402_v1  ;;  %v7418_v10 = vadd.s32 24, %v7402_v1  ;;  %p10815_p12 = scmp.ne.s32.totalorder %s10468_s3, 0  ;;  %s7253_s22 = smov [#allocation9]  }
  0x4f   : > { %10474 = vst [vmem:[#allocation15_spill] sm:$0xff] %v7410_v6  ;;  %v198_v11 = vadd.s32 160, %v7402_v1  ;;  %v199_v12 = vadd.s32 168, %v7402_v1  ;;  %v7423_v13 = vadd.s32 32, %v7402_v1  ;;  %v7426_v14 = vadd.s32 40, %v7402_v1  ;;  %s7165_s25 = sshll.u32 %s7253_s22, 4  ;;  %s7166_s25 = int_to_ptr.vmem [resolvable:$false] %s7165_s25 }
  0x50   : > { %10475 = vst [vmem:[#allocation16_spill] sm:$0xff] %v7415_v9  ;;  %10476 = vst [vmem:[#allocation17_spill] sm:$0xff] %v7418_v10  ;;  %v261_v15 = vstv %s167_s12  ;;  %v200_v16 = vadd.s32 176, %v7402_v1  ;;  %v201_v17 = vadd.s32 184, %v7402_v1  ;;  %v7431_v18 = vadd.s32 48, %v7402_v1  ;;  %p7163_p0 = pnand %p7162_p11, %p10815_p12  ;;  %s7167_s27 = scalar_lea.vmem %s7166_s25, 1280 }
  0x51   : > { %10477 = vst [vmem:[#allocation18_spill] sm:$0xff] %v7423_v13  ;;  %10478 = vst [vmem:[#allocation19_spill] sm:$0xff] %v7426_v14  ;;  %v7433_v19 = vadd.s32 %v261_v15, %v260_v5  ;;  %v7436_v20 = vadd.s32 56, %v7402_v1  ;;  %v7439_v21 = vadd.s32 192, %v7402_v1  ;;  %v7442_v22 = vadd.s32 200, %v7402_v1  ;;  %p7168_p13 = scmp.lt.s32.totalorder %s10212_s14, %s7166_s25  ;;  %p7169_p1 = scmp.lt.s32.totalorder %s7167_s27, %s7161_s0 }
  0x52   : > { %10479 = vst [vmem:[#allocation20_spill] sm:$0xff] %v7431_v18  ;;  %v7445_v23 = vadd.s32 64, %v7402_v1  ;;  %v7448_v24 = vadd.s32 72, %v7402_v1  ;;  %v7451_v25 = vadd.s32 208, %v7402_v1  ;;  %v7454_v26 = vadd.s32 216, %v7402_v1  ;;  %p7164_p2 = pneg %p7163_p0 }
  0x53   : > { %10480 = vst [vmem:[#allocation21_spill] sm:$0xff] %v7433_v19  ;;  %10481 = vst [vmem:[#allocation22_spill] sm:$0xff] %v7436_v20  ;;  %vm279_vm1 = vcmp.eq.s32.totalorder %v194_v3, %v7433_v19  ;;  %vm280_vm2 = vcmp.eq.s32.totalorder %v195_v4, %v7433_v19  ;;  %vm263_vm3 = vcmp.eq.s32.totalorder %v7402_v1, %v7433_v19  ;;  %v7532_v60 = vadd.s32 80, %v7402_v1  ;;  %p7170_p4 = por %p7169_p1, %p7168_p13 }
  0x54   : > { %vm264_vm4 = vcmp.eq.s32.totalorder %v7410_v6, %v7433_v19  ;;  %v359_v28 = vsel %vm279_vm1, 1.0, %v10262_v27  ;;  %v360_v29 = vsel %vm280_vm2, 1.0, %v10262_v27  ;;  %v343_v30 = vsel %vm263_vm3, 1.0, %v10262_v27 }
  0x55   : > { %v344_v31 = vsel %vm264_vm4, 1.0, %v10262_v27  ;;  %440 = vst.msk [vmem:[#allocation2 + $0x80] sm:$0xff] %vm10373_vm0, %v359_v28  ;;  %441 = vst.msk [vmem:[#allocation2 + $0x88] sm:$0xff] %vm10373_vm0, %v360_v29  ;;  %vm281_vm5 = vcmp.eq.s32.totalorder %v196_v7, %v7433_v19  ;;  %vm282_vm6 = vcmp.eq.s32.totalorder %v197_v8, %v7433_v19  ;;  %vm265_vm7 = vcmp.eq.s32.totalorder %v7415_v9, %v7433_v19  ;;  %p7171_p6 = pnand %p7170_p4, %p7164_p2 }
  0x56   : > { %424 = vst.msk [vmem:[#allocation2] sm:$0xff] %vm10373_vm0, %v343_v30  ;;  %425 = vst.msk [vmem:[#allocation2 + $0x8] sm:$0xff] %vm10373_vm0, %v344_v31  ;;  %vm266_vm8 = vcmp.eq.s32.totalorder %v7418_v10, %v7433_v19  ;;  %v361_v32 = vsel %vm281_vm5, 1.0, %v10262_v27  ;;  %v362_v33 = vsel %vm282_vm6, 1.0, %v10262_v27  ;;  %v345_v34 = vsel %vm265_vm7, 1.0, %v10262_v27 }
  0x57   : > { %v346_v35 = vsel %vm266_vm8, 1.0, %v10262_v27  ;;  %442 = vst.msk [vmem:[#allocation2 + $0x90] sm:$0xff] %vm10373_vm0, %v361_v32  ;;  %443 = vst.msk [vmem:[#allocation2 + $0x98] sm:$0xff] %vm10373_vm0, %v362_v33  ;;  %vm283_vm9 = vcmp.eq.s32.totalorder %v198_v11, %v7433_v19  ;;  %vm284_vm10 = vcmp.eq.s32.totalorder %v199_v12, %v7433_v19  ;;  %vm267_vm11 = vcmp.eq.s32.totalorder %v7423_v13, %v7433_v19 }
  0x58   : > { %426 = vst.msk [vmem:[#allocation2 + $0x10] sm:$0xff] %vm10373_vm0, %v345_v34  ;;  %427 = vst.msk [vmem:[#allocation2 + $0x18] sm:$0xff] %vm10373_vm0, %v346_v35  ;;  %vm268_vm12 = vcmp.eq.s32.totalorder %v7426_v14, %v7433_v19  ;;  %v363_v36 = vsel %vm283_vm9, 1.0, %v10262_v27  ;;  %v364_v37 = vsel %vm284_vm10, 1.0, %v10262_v27  ;;  %v347_v38 = vsel %vm267_vm11, 1.0, %v10262_v27 }
  0x59   : > { %v348_v39 = vsel %vm268_vm12, 1.0, %v10262_v27  ;;  %444 = vst.msk [vmem:[#allocation2 + $0xa0] sm:$0xff] %vm10373_vm0, %v363_v36  ;;  %445 = vst.msk [vmem:[#allocation2 + $0xa8] sm:$0xff] %vm10373_vm0, %v364_v37  ;;  %vm285_vm13 = vcmp.eq.s32.totalorder %v200_v16, %v7433_v19  ;;  %vm286_vm14 = vcmp.eq.s32.totalorder %v201_v17, %v7433_v19  ;;  %vm269_vm15 = vcmp.eq.s32.totalorder %v7431_v18, %v7433_v19 }
  0x5a   : > { %428 = vst.msk [vmem:[#allocation2 + $0x20] sm:$0xff] %vm10373_vm0, %v347_v38  ;;  %429 = vst.msk [vmem:[#allocation2 + $0x28] sm:$0xff] %vm10373_vm0, %v348_v39  ;;  %vm270_vm1 = vcmp.eq.s32.totalorder %v7436_v20, %v7433_v19  ;;  %v365_v40 = vsel %vm285_vm13, 1.0, %v10262_v27  ;;  %v366_v41 = vsel %vm286_vm14, 1.0, %v10262_v27  ;;  %v349_v42 = vsel %vm269_vm15, 1.0, %v10262_v27 }
  0x5b   : > { %v350_v43 = vsel %vm270_vm1, 1.0, %v10262_v27  ;;  %446 = vst.msk [vmem:[#allocation2 + $0xb0] sm:$0xff] %vm10373_vm0, %v365_v40  ;;  %447 = vst.msk [vmem:[#allocation2 + $0xb8] sm:$0xff] %vm10373_vm0, %v366_v41  ;;  %vm287_vm2 = vcmp.eq.s32.totalorder %v7439_v21, %v7433_v19  ;;  %vm288_vm3 = vcmp.eq.s32.totalorder %v7442_v22, %v7433_v19  ;;  %vm271_vm4 = vcmp.eq.s32.totalorder %v7445_v23, %v7433_v19 }
  0x5c   : > { %430 = vst.msk [vmem:[#allocation2 + $0x30] sm:$0xff] %vm10373_vm0, %v349_v42  ;;  %431 = vst.msk [vmem:[#allocation2 + $0x38] sm:$0xff] %vm10373_vm0, %v350_v43  ;;  %vm272_vm5 = vcmp.eq.s32.totalorder %v7448_v24, %v7433_v19  ;;  %v745_v44 = vld [vmem:[#allocation2 + $0x80] sm:$0xff]  ;;  %v746_v45 = vld [vmem:[#allocation2 + $0x88] sm:$0xff]  ;;  %v367_v47 = vsel %vm287_vm2, 1.0, %v10262_v27  ;;  %v368_v48 = vsel %vm288_vm3, 1.0, %v10262_v27  ;;  %vm289_vm6 = vcmp.eq.s32.totalorder %v7451_v25, %v7433_v19 }
  0x5d   : > { %v729_v46 = vld [vmem:[#allocation2] sm:$0xff]  ;;  %v351_v49 = vsel %vm271_vm4, 1.0, %v10262_v27  ;;  %v858_v50 = vand.u32 4294901760, %v745_v44  ;;  %v861_v51 = vand.u32 4294901760, %v746_v45  ;;  %v730_v52 = vld [vmem:[#allocation2 + $0x8] sm:$0xff]  ;;  %448 = vst.msk [vmem:[#allocation2 + $0xc0] sm:$0xff] %vm10373_vm0, %v367_v47  ;;  %vm290_vm7 = vcmp.eq.s32.totalorder %v7454_v26, %v7433_v19 }
  0x5e   : > { %v810_v53 = vand.u32 4294901760, %v729_v46  ;;  %449 = vst.msk [vmem:[#allocation2 + $0xc8] sm:$0xff] %vm10373_vm0, %v368_v48  ;;  %v352_v54 = vsel %vm272_vm5, 1.0, %v10262_v27  ;;  %432 = vst.msk [vmem:[#allocation2 + $0x40] sm:$0xff] %vm10373_vm0, %v351_v49  ;;  %v813_v55 = vand.u32 4294901760, %v730_v52  ;;  %v747_v56 = vld [vmem:[#allocation2 + $0x90] sm:$0xff]  ;;  %vm273_vm8 = vcmp.eq.s32.totalorder %v7532_v60, %v7433_v19 }
  0x5f   : > { %v748_v57 = vld [vmem:[#allocation2 + $0x98] sm:$0xff]  ;;  %v731_v58 = vld [vmem:[#allocation2 + $0x10] sm:$0xff]  ;;  %433 = vst.msk [vmem:[#allocation2 + $0x48] sm:$0xff] %vm10373_vm0, %v352_v54  ;;  %v369_v59 = vsel %vm289_vm6, 1.0, %v10262_v27  ;;  %v7534_v61 = vpack.c.bf16 %v861_v51, %v858_v50  ;;  %v7536_v62 = vsub.f32 %v745_v44, %v858_v50  ;;  %v7538_v63 = vsub.f32 %v746_v45, %v861_v51 }
  0x60   : > { %v7540_v0 = vsub.f32 %v729_v46, %v810_v53  ;;  %v732_v3 = vld [vmem:[#allocation2 + $0x18] sm:$0xff]  ;;  %450 = vst.msk [vmem:[#allocation2 + $0xd0] sm:$0xff] %vm10373_vm0, %v369_v59  ;;  %v7543_v4 = vpack.c.bf16 %v813_v55, %v810_v53  ;;  %v7545_v5 = vsub.f32 %v730_v52, %v813_v55  ;;  %v864_v7 = vand.u32 4294901760, %v747_v56  ;;  %v749_v11 = vld [vmem:[#allocation2 + $0xa0] sm:$0xff]  ;;  %v750_v21 = vld [vmem:[#allocation2 + $0xa8] sm:$0xff] }
  0x61   : > { %v867_v8 = vand.u32 4294901760, %v748_v57  ;;  %6214 = vmatprep.subr.bf16.mxu1 %v7534_v61  ;;  %v6277_v12 = vpack.c.bf16 %v7538_v63, %v7536_v62  ;;  %v816_v16 = vand.u32 4294901760, %v731_v58  ;;  %v819_v17 = vand.u32 4294901760, %v732_v3  ;;  %v733_v22 = vld [vmem:[#allocation2 + $0x20] sm:$0xff]  ;;  %v734_v23 = vld [vmem:[#allocation2 + $0x28] sm:$0xff] }
  0x62   : > { %v10265_v15 = vand.u32 4294901760, %v7540_v0  ;;  %6216 = vmatpush3.bf16.msra.mxu1 %v7543_v4  ;;  %v10266_v24 = vand.u32 4294901760, %v7545_v5  ;;  %v6279_v25 = vpack.c.bf16 %v7545_v5, %v7540_v0  ;;  %v7557_v29 = vsub.f32 %v747_v56, %v864_v7  ;;  %v751_v30 = vld [vmem:[#allocation2 + $0xb0] sm:$0xff]  ;;  %v752_v31 = vld [vmem:[#allocation2 + $0xb8] sm:$0xff] }
  0x63   : > { %v7555_v28 = vpack.c.bf16 %v867_v8, %v864_v7  ;;  %6278 = vmatprep.subr.bf16.mxu0 %v6277_v12  ;;  %v7561_v32 = vsub.f32 %v748_v57, %v867_v8  ;;  %v7563_v33 = vpack.c.bf16 %v819_v17, %v816_v16  ;;  %v7565_v34 = vsub.f32 %v731_v58, %v816_v16  ;;  %v735_v44 = vld [vmem:[#allocation2 + $0x30] sm:$0xff]  ;;  %v736_v45 = vld [vmem:[#allocation2 + $0x38] sm:$0xff] }
  0x64   : > { %v7567_v35 = vsub.f32 %v732_v3, %v819_v17  ;;  %6280 = vmatpush3.bf16.msra.mxu0 %v6279_v25  ;;  %v870_v36 = vand.u32 4294901760, %v749_v11  ;;  %v873_v37 = vand.u32 4294901760, %v750_v21  ;;  %v822_v38 = vand.u32 4294901760, %v733_v22  ;;  %v753_v50 = vld [vmem:[#allocation2 + $0xc0] sm:$0xff] }
  0x65   : > { %6218 = vmatprep.subr.bf16.mxu1 %v7555_v28  ;;  %v825_v39 = vand.u32 4294901760, %v734_v23  ;;  %v6281_v40 = vpack.c.bf16 %v7561_v32, %v7557_v29  ;;  %v876_v42 = vand.u32 4294901760, %v751_v30  ;;  %v879_v43 = vand.u32 4294901760, %v752_v31  ;;  %v754_v51 = vld [vmem:[#allocation2 + $0xc8] sm:$0xff]  ;;  %v737_v52 = vld [vmem:[#allocation2 + $0x40] sm:$0xff] }
  0x66   : > { %v6283_v41 = vpack.c.bf16 %v7567_v35, %v7565_v34  ;;  %6220 = vmatpush3.bf16.msra.mxu1 %v7563_v33  ;;  %v7575_v46 = vpack.c.bf16 %v873_v37, %v870_v36  ;;  %v7577_v47 = vsub.f32 %v749_v11, %v870_v36  ;;  %v7579_v48 = vsub.f32 %v750_v21, %v873_v37  ;;  %v738_v57 = vld [vmem:[#allocation2 + $0x48] sm:$0xff] }
  0x67   : > { %v7581_v49 = vpack.c.bf16 %v825_v39, %v822_v38  ;;  %6282 = vmatprep.subr.bf16.mxu0 %v6281_v40  ;;  %v7583_v53 = vsub.f32 %v733_v22, %v822_v38  ;;  %v7585_v54 = vsub.f32 %v734_v23, %v825_v39  ;;  %v7587_v55 = vpack.c.bf16 %v879_v43, %v876_v42  ;;  %v7605_v25 = vld [vmem:[#allocation2 + $0xd0] sm:$0xff] }
  0x68   : > { %v7589_v56 = vsub.f32 %v751_v30, %v876_v42  ;;  %6284 = vmatpush3.bf16.msra.mxu0 %v6283_v41  ;;  %6222 = vmatprep.subr.bf16.mxu1 %v7575_v46  ;;  %v6285_v58 = vpack.c.bf16 %v7579_v48, %v7577_v47  ;;  %v7594_v59 = vsub.f32 %v752_v31, %v879_v43  ;;  %v828_v3 = vand.u32 4294901760, %v735_v44 }
  0x69   : > { %v831_v7 = vand.u32 4294901760, %v736_v45  ;;  %v6287_v8 = vpack.c.bf16 %v7585_v54, %v7583_v53  ;;  %v882_v11 = vand.u32 4294901760, %v753_v50  ;;  %v885_v12 = vand.u32 4294901760, %v754_v51 }
  0x6a   : > { %v834_v16 = vand.u32 4294901760, %v737_v52  ;;  %6224 = vmatpush3.bf16.msra.mxu1 %v7581_v49  ;;  %6286 = vmatprep.subr.bf16.mxu0 %v6285_v58  ;;  %v7601_v21 = vsub.f32 %v735_v44, %v828_v3  ;;  %v837_v23 = vand.u32 4294901760, %v738_v57  ;;  %v6289_v30 = vpack.c.bf16 %v7594_v59, %v7589_v56 }
  0x6b   : > { %v7599_v17 = vpack.c.bf16 %v831_v7, %v828_v3  ;;  %v7603_v22 = vsub.f32 %v736_v45, %v831_v7  ;;  %6226 = vmatprep.subr.bf16.mxu1 %v7587_v55  ;;  %v7610_v31 = vpack.c.bf16 %v885_v12, %v882_v11  ;;  %v7612_v36 = vsub.f32 %v753_v50, %v882_v11  ;;  %v725_v7 = vld [vmem:[%s7395_s9 + $0x8] sm:$0xff] }
  0x6c   : > { %v7614_v37 = vsub.f32 %v754_v51, %v885_v12  ;;  %6288 = vmatpush3.bf16.msra.mxu0 %v6287_v8  ;;  %v7618_v39 = vpack.c.bf16 %v837_v23, %v834_v16  ;;  %v7620_v40 = vsub.f32 %v737_v52, %v834_v16  ;;  %v7622_v41 = vsub.f32 %v738_v57, %v837_v23 }
  0x6d   : > { %10482 = vst [vmem:[#allocation23_spill] sm:$0xff] %v7599_v17  ;;  %10483 = vst [vmem:[#allocation24_spill] sm:$0xff] %v7610_v31  ;;  %v6291_v38 = vpack.c.bf16 %v7603_v22, %v7601_v21  ;;  %6290 = vmatprep.subr.bf16.mxu0 %v6289_v30  ;;  %v370_v43 = vsel %vm290_vm7, 1.0, %v10262_v27  ;;  %v888_v44 = vand.u32 4294901760, %v7605_v25  ;;  %v189_v45 = vadd.s32 88, %v7402_v1 }
  0x6e   : > { %10484 = vst [vmem:[#allocation25_spill] sm:$0xff] %v7618_v39  ;;  %v6293_v42 = vpack.c.bf16 %v7614_v37, %v7612_v36  ;;  %6228 = vmatpush3.bf16.msra.mxu1 %v7599_v17  ;;  %v6295_v50 = vpack.c.bf16 %v7622_v41, %v7620_v40  ;;  %451 = vst.msk [vmem:[#allocation2 + $0xd8] sm:$0xff] %vm10373_vm0, %v370_v43  ;;  %v206_v51 = vadd.s32 224, %v7402_v1  ;;  %v207_v26 = vadd.s32 232, %v7402_v1 }
  0x6f   : > { %6230 = vmatprep.subr.bf16.mxu1 %v7610_v31  ;;  %v7644_v52 = vsub.f32 %v7605_v25, %v888_v44  ;;  %vm274_vm9 = vcmp.eq.s32.totalorder %v189_v45, %v7433_v19  ;;  %v353_v57 = vsel %vm273_vm8, 1.0, %v10262_v27  ;;  %v190_v58 = vadd.s32 96, %v7402_v1 }
  0x70   : > { %6292 = vmatpush3.bf16.msra.mxu0 %v6291_v38  ;;  %v354_v60 = vsel %vm274_vm9, 1.0, %v10262_v27  ;;  %434 = vst.msk [vmem:[#allocation2 + $0x50] sm:$0xff] %vm10373_vm0, %v353_v57  ;;  %vm291_vm10 = vcmp.eq.s32.totalorder %v206_v51, %v7433_v19  ;;  %vm292_vm11 = vcmp.eq.s32.totalorder %v207_v26, %v7433_v19  ;;  %v191_v3 = vadd.s32 104, %v7402_v1  ;;  %v724_v26 = vld [vmem:[%s7395_s9] sm:$0xff] }
  0x71   : > { %6294 = vmatprep.subr.bf16.mxu0 %v6293_v42  ;;  %435 = vst.msk [vmem:[#allocation2 + $0x58] sm:$0xff] %vm10373_vm0, %v354_v60  ;;  %v371_v8 = vsel %vm291_vm10, 1.0, %v10262_v27  ;;  %v372_v11 = vsel %vm292_vm11, 1.0, %v10262_v27  ;;  %vm275_vm12 = vcmp.eq.s32.totalorder %v190_v58, %v7433_v19  ;;  %v208_v12 = vadd.s32 240, %v7402_v1 }
  0x72   : > { %6232 = vmatpush3.bf16.msra.mxu1 %v7618_v39  ;;  %452 = vst.msk [vmem:[#allocation2 + $0xe0] sm:$0xff] %vm10373_vm0, %v371_v8  ;;  %453 = vst.msk [vmem:[#allocation2 + $0xe8] sm:$0xff] %vm10373_vm0, %v372_v11  ;;  %vm276_vm13 = vcmp.eq.s32.totalorder %v191_v3, %v7433_v19  ;;  %v355_v16 = vsel %vm275_vm12, 1.0, %v10262_v27  ;;  %v209_v23 = vadd.s32 248, %v7402_v1  ;;  %v192_v30 = vadd.s32 112, %v7402_v1 }
  0x73   : > { %v356_v38 = vsel %vm276_vm13, 1.0, %v10262_v27  ;;  %436 = vst.msk [vmem:[#allocation2 + $0x60] sm:$0xff] %vm10373_vm0, %v355_v16  ;;  %vm293_vm14 = vcmp.eq.s32.totalorder %v208_v12, %v7433_v19  ;;  %v193_v42 = vadd.s32 120, %v7402_v1  ;;  %v7671_v43 = vand.u32 4294901760, %v725_v7 }
  0x74   : > { %6296 = vmatpush3.bf16.msra.mxu0 %v6295_v50  ;;  %437 = vst.msk [vmem:[#allocation2 + $0x68] sm:$0xff] %vm10373_vm0, %v356_v38  ;;  %vm294_vm15 = vcmp.eq.s32.totalorder %v209_v23, %v7433_v19  ;;  %v373_v45 = vsel %vm293_vm14, 1.0, %v10262_v27  ;;  %vm277_vm1 = vcmp.eq.s32.totalorder %v192_v30, %v7433_v19  ;;  %v10264_v51 = vand.u32 4294901760, %v7536_v62 }
  0x75   : > { %v756_v57 = vld [vmem:[#allocation2 + $0xd8] sm:$0xff]  ;;  %v374_v58 = vsel %vm294_vm15, 1.0, %v10262_v27  ;;  %454 = vst.msk [vmem:[#allocation2 + $0xf0] sm:$0xff] %vm10373_vm0, %v373_v45  ;;  %vm278_vm2 = vcmp.eq.s32.totalorder %v193_v42, %v7433_v19  ;;  %v357_v50 = vsel %vm277_vm1, 1.0, %v10262_v27  ;;  %v7684_v60 = vsub.f32 %v725_v7, %v7671_v43 }
  0x76   : > { %v891_v3 = vand.u32 4294901760, %v756_v57  ;;  %455 = vst.msk [vmem:[#allocation2 + $0xf8] sm:$0xff] %vm10373_vm0, %v374_v58  ;;  %v358_v8 = vsel %vm278_vm2, 1.0, %v10262_v27  ;;  %438 = vst.msk [vmem:[#allocation2 + $0x70] sm:$0xff] %vm10373_vm0, %v357_v50  ;;  %v1037_v11 = vsub.f32 %v7536_v62, %v10264_v51  ;;  %v7695_v7 = vand.u32 4294901760, %v724_v26 }
  0x77   : > { %v739_v16 = vld [vmem:[#allocation2 + $0x50] sm:$0xff]  ;;  %439 = vst.msk [vmem:[#allocation2 + $0x78] sm:$0xff] %vm10373_vm0, %v358_v8  ;;  %v10270_v23 = vand.u32 4294901760, %v7684_v60  ;;  %v7700_v30 = vsub.f32 %v7540_v0, %v10265_v15  ;;  %v7705_v38 = vsub.f32 %v7545_v5, %v10266_v24  ;;  %1283 = vmatprep.mubr.f32.mxu0 %v7684_v60  ;;  %v10487_v24 = vand.u32 4294901760, %v7538_v63 }
  0x78   : > { %10485 = vst [vmem:[#allocation26_spill] sm:$0xff] %v7695_v7  ;;  %v7710_v42 = vpack.c.bf16 %v891_v3, %v888_v44  ;;  %v7712_v45 = vsub.f32 %v756_v57, %v891_v3  ;;  %v740_v58 = vld [vmem:[#allocation2 + $0x58] sm:$0xff]  ;;  %v840_v50 = vand.u32 4294901760, %v739_v16  ;;  %v1038_v8 = vand.u32 4294901760, %v1037_v11 }
  0x79   : > { %v843_v27 = vand.u32 4294901760, %v740_v58  ;;  %v757_v51 = vld [vmem:[#allocation2 + $0xe0] sm:$0xff]  ;;  %v758_v15 = vld [vmem:[#allocation2 + $0xe8] sm:$0xff]  ;;  %v908_v12 = vsub.f32 %v7684_v60, %v10270_v23  ;;  %v1044_v20 = vsub.f32 %v7538_v63, %v10487_v24  ;;  %v7721_v25 = vsub.f32 %v724_v26, %v7695_v7 }
  0x7a   : > { %10486 = vst [vmem:[#allocation27_spill] sm:$0xff] %v7710_v42  ;;  %6234 = vmatprep.subr.bf16.mxu1 %v7710_v42  ;;  %v7724_v44 = vsub.f32 %v739_v16, %v840_v50  ;;  %v6297_v57 = vpack.c.bf16 %v7712_v45, %v7644_v52  ;;  %v894_v3 = vand.u32 4294901760, %v757_v51  ;;  %v897_v11 = vand.u32 4294901760, %v758_v15  ;;  %v741_v18 = vld [vmem:[#allocation2 + $0x60] sm:$0xff] }
  0x7b   : > { %v7728_v14 = vpack.c.bf16 %v843_v27, %v840_v50  ;;  %v7730_v23 = vsub.f32 %v740_v58, %v843_v27  ;;  %v742_v13 = vld [vmem:[#allocation2 + $0x68] sm:$0xff]  ;;  %v846_v10 = vand.u32 4294901760, %v741_v18  ;;  %v909_v24 = vand.u32 4294901760, %v908_v12 }
  0x7c   : > { %6298 = vmatprep.subr.bf16.mxu0 %v6297_v57  ;;  %v7732_v26 = vpack.c.bf16 %v897_v11, %v894_v3  ;;  %v7734_v9 = vsub.f32 %v757_v51, %v894_v3  ;;  %v7736_v16 = vsub.f32 %v758_v15, %v897_v11  ;;  %v849_v2 = vand.u32 4294901760, %v742_v13  ;;  %v759_v6 = vld [vmem:[#allocation2 + $0xf0] sm:$0xff] }
  0x7d   : > { %10488 = vst [vmem:[#allocation28_spill] sm:$0xff] %v7728_v14  ;;  %6236 = vmatpush3.bf16.msra.mxu1 %v7728_v14  ;;  %v6299_v50 = vpack.c.bf16 %v7730_v23, %v7724_v44  ;;  %v7741_v42 = vsub.f32 %v741_v18, %v846_v10  ;;  %v760_v27 = vld [vmem:[#allocation2 + $0xf8] sm:$0xff]  ;;  %v900_v58 = vand.u32 4294901760, %v759_v6  ;;  %v743_v39 = vld [vmem:[#allocation2 + $0x70] sm:$0xff]  ;;  %910 = vmatprep.mubr.f32.mxu1 %v909_v24  ;;  %v1045_v12 = vand.u32 4294901760, %v1044_v20 }
  0x7e   : > { %10489 = vst [vmem:[#allocation29_spill] sm:$0xff] %v7732_v26  ;;  %6238 = vmatprep.subr.bf16.mxu1 %v7732_v26  ;;  %v7744_v51 = vpack.c.bf16 %v849_v2, %v846_v10  ;;  %v7746_v15 = vsub.f32 %v742_v13, %v849_v2  ;;  %v6301_v57 = vpack.c.bf16 %v7736_v16, %v7734_v9  ;;  %v903_v3 = vand.u32 4294901760, %v760_v27  ;;  %v744_v11 = vld [vmem:[#allocation2 + $0x78] sm:$0xff] }
  0x7f   : > { %6300 = vmatpush3.bf16.msra.mxu0 %v6299_v50  ;;  %v7750_v14 = vsub.f32 %v759_v6, %v900_v58  ;;  %v852_v18 = vand.u32 4294901760, %v743_v39  ;;  %v855_v31 = vand.u32 4294901760, %v744_v11  ;;  %v6245_v17 = vpack.c.bf16 %v1045_v12, %v1038_v8 }
  0x80   : > { %10490 = vst [vmem:[#allocation30_spill] sm:$0xff] %v7744_v51  ;;  %6302 = vmatprep.subr.bf16.mxu0 %v6301_v57  ;;  %v6303_v20 = vpack.c.bf16 %v7746_v15, %v7741_v42  ;;  %v7754_v24 = vpack.c.bf16 %v903_v3, %v900_v58  ;;  %v7756_v10 = vsub.f32 %v760_v27, %v903_v3  ;;  %v10289_v2 = vand.u32 4294901760, %v7721_v25 }
  0x81   : > { %6240 = vmatpush3.bf16.msra.mxu1 %v7744_v51  ;;  %v7760_v13 = vpack.c.bf16 %v855_v31, %v852_v18  ;;  %v7762_v50 = vsub.f32 %v743_v39, %v852_v18  ;;  %v7764_v6 = vsub.f32 %v744_v11, %v855_v31  ;;  %v926_v8 = vand.u32 4294901760, %v7700_v30 }
  0x82   : > { %10491 = vst [vmem:[#allocation31_spill] sm:$0xff] %v7754_v24  ;;  %6242 = vmatprep.subr.bf16.mxu1 %v7754_v24  ;;  %v6305_v58 = vpack.c.bf16 %v7756_v10, %v7750_v14  ;;  %v914_v27 = vsub.f32 %v7721_v25, %v10289_v2  ;;  %v933_v12 = vand.u32 4294901760, %v7705_v38  ;;  %v10493_v57 = vand.u32 4294901760, %v7536_v62 }
  0x83   : > { %10492 = vst [vmem:[#allocation32_spill] sm:$0xff] %v7760_v13  ;;  %v10494_v39 = vand.u32 4294901760, %v7538_v63  ;;  %6304 = vmatpush3.bf16.msra.mxu0 %v6303_v20  ;;  %v6307_v31 = vpack.c.bf16 %v7764_v6, %v7762_v50  ;;  %v10495_v30 = vand.u32 4294901760, %v7540_v0  ;;  %v10496_v11 = vand.u32 4294901760, %v7545_v5 }
  0x84   : > { %v1050_v24 = vand.u32 4294901760, %v7557_v29  ;;  %v1057_v2 = vand.u32 4294901760, %v7561_v32  ;;  %6306 = vmatprep.subr.bf16.mxu0 %v6305_v58  ;;  %v915_v38 = vand.u32 4294901760, %v914_v27  ;;  %v6247_v51 = vpack.c.bf16 %v933_v12, %v926_v8 }
  0x85   : > { %v6341_v3 = vpack.c.bf16 %v10494_v39, %v10493_v57  ;;  %v6343_v18 = vpack.c.bf16 %v10496_v11, %v10495_v30  ;;  %v938_v62 = vand.u32 4294901760, %v7565_v34  ;;  %v945_v63 = vand.u32 4294901760, %v7567_v35  ;;  %6244 = vmatpush3.bf16.msra.mxu1 %v7760_v13 }
  0x86   : > { %v1051_v20 = vsub.f32 %v7557_v29, %v1050_v24  ;;  %v1058_v0 = vsub.f32 %v7561_v32, %v1057_v2  ;;  %v6345_v57 = vpack.c.bf16 %v1057_v2, %v1050_v24  ;;  %v1064_v5 = vand.u32 4294901760, %v7577_v47  ;;  %6246 = vmatprep.subr.bf16.mxu1 %v6245_v17 }
  0x87   : > { %v939_v39 = vsub.f32 %v7565_v34, %v938_v62  ;;  %v946_v58 = vsub.f32 %v7567_v35, %v945_v63  ;;  %v6347_v27 = vpack.c.bf16 %v945_v63, %v938_v62  ;;  %v1071_v8 = vand.u32 4294901760, %v7579_v48  ;;  %6308 = vmatpush3.bf16.msra.mxu0 %v6307_v31 }
  0x88   : > { %v1052_v12 = vand.u32 4294901760, %v1051_v20  ;;  %v1059_v30 = vand.u32 4294901760, %v1058_v0  ;;  %v1065_v11 = vsub.f32 %v7577_v47, %v1064_v5  ;;  %v952_v29 = vand.u32 4294901760, %v7583_v53  ;;  %916 = vmatmul.mubr.f32.vlgmr.msra.gmra.mrb[0].mxu1 %v915_v38  ;;  %6342 = vmatprep.subr.bf16.mxu0 %v6341_v3 }
  0x89   : > { %v940_v32 = vand.u32 4294901760, %v939_v39  ;;  %v947_v24 = vand.u32 4294901760, %v946_v58  ;;  %v1072_v17 = vsub.f32 %v7579_v48, %v1071_v8  ;;  %v959_v34 = vand.u32 4294901760, %v7585_v54  ;;  %6248 = vmatpush3.bf16.msra.mxu1 %v6247_v51  ;;  %1146 = vmatprep.mubr.f32.mxu1 %v7671_v43 }
  0x8a   : > { %v6249_v35 = vpack.c.bf16 %v1059_v30, %v1052_v12  ;;  %v1066_v2 = vand.u32 4294901760, %v1065_v11  ;;  %v953_v62 = vsub.f32 %v7583_v53, %v952_v29  ;;  %v6349_v31 = vpack.c.bf16 %v1071_v8, %v1064_v5  ;;  %1286 = vmatmul.mubr.f32.vlgmr.msra.gmra.mrb[0].mxu0 %v7721_v25 }
  0x8b   : > { %v6251_v47 = vpack.c.bf16 %v947_v24, %v940_v32  ;;  %v1073_v63 = vand.u32 4294901760, %v1072_v17  ;;  %v960_v3 = vsub.f32 %v7585_v54, %v959_v34  ;;  %v6351_v38 = vpack.c.bf16 %v959_v34, %v952_v29  ;;  %6344 = vmatpush3.bf16.msra.mxu0 %v6343_v18  ;;  %1560 = vmatprep.mubr.f32.mxu0 %v7671_v43 }
  0x8c   : > { %6250 = vmatprep.subr.bf16.mxu1 %v6249_v35  ;;  %v954_v48 = vand.u32 4294901760, %v953_v62  ;;  %v1078_v20 = vand.u32 4294901760, %v7589_v56  ;;  %v1085_v51 = vand.u32 4294901760, %v7594_v59  ;;  %v966_v0 = vand.u32 4294901760, %v7601_v21  ;;  %6346 = vmatprep.subr.bf16.mxu0 %v6345_v57 }
  0x8d   : > { %v6253_v53 = vpack.c.bf16 %v1073_v63, %v1066_v2  ;;  %v961_v5 = vand.u32 4294901760, %v960_v3  ;;  %v973_v39 = vand.u32 4294901760, %v7603_v22  ;;  %v1092_v58 = vand.u32 4294901760, %v7612_v36  ;;  %6252 = vmatpush3.bf16.msra.mxu1 %v6251_v47 }
  0x8e   : > { %v1079_v54 = vsub.f32 %v7589_v56, %v1078_v20  ;;  %v1086_v18 = vsub.f32 %v7594_v59, %v1085_v51  ;;  %v967_v8 = vsub.f32 %v7601_v21, %v966_v0  ;;  %v6353_v12 = vpack.c.bf16 %v1085_v51, %v1078_v20 }
  0x8f   : > { %6254 = vmatprep.subr.bf16.mxu1 %v6253_v53  ;;  %v6255_v30 = vpack.c.bf16 %v961_v5, %v954_v48  ;;  %v974_v57 = vsub.f32 %v7603_v22, %v973_v39  ;;  %v6355_v11 = vpack.c.bf16 %v973_v39, %v966_v0  ;;  %v1093_v29 = vsub.f32 %v7612_v36, %v1092_v58 }
  0x90   : > { %6348 = vmatpush3.bf16.msra.mxu0 %v6347_v27  ;;  %v1080_v32 = vand.u32 4294901760, %v1079_v54  ;;  %v1087_v24 = vand.u32 4294901760, %v1086_v18  ;;  %v968_v17 = vand.u32 4294901760, %v967_v8  ;;  %v1099_v34 = vand.u32 4294901760, %v7614_v37 }
  0x91   : > { %6350 = vmatprep.subr.bf16.mxu0 %v6349_v31  ;;  %v975_v56 = vand.u32 4294901760, %v974_v57  ;;  %v1094_v35 = vand.u32 4294901760, %v1093_v29  ;;  %v980_v59 = vand.u32 4294901760, %v7620_v40  ;;  %v987_v21 = vand.u32 4294901760, %v7622_v41  ;;  %6256 = vmatpush3.bf16.msra.mxu1 %v6255_v30 }
  0x92   : > { %v6257_v2 = vpack.c.bf16 %v1087_v24, %v1080_v32  ;;  %v1100_v22 = vsub.f32 %v7614_v37, %v1099_v34  ;;  %v6357_v62 = vpack.c.bf16 %v1099_v34, %v1092_v58  ;;  %v1106_v36 = vand.u32 4294901760, %v7644_v52 }
  0x93   : > { %v6259_v27 = vpack.c.bf16 %v975_v56, %v968_v17  ;;  %v981_v47 = vsub.f32 %v7620_v40, %v980_v59  ;;  %v988_v63 = vsub.f32 %v7622_v41, %v987_v21  ;;  %v6359_v3 = vpack.c.bf16 %v987_v21, %v980_v59 }
  0x94   : > { %6352 = vmatpush3.bf16.msra.mxu0 %v6351_v38  ;;  %6258 = vmatprep.subr.bf16.mxu1 %v6257_v2  ;;  %v1101_v31 = vand.u32 4294901760, %v1100_v22  ;;  %v1107_v48 = vsub.f32 %v7644_v52, %v1106_v36  ;;  %v1113_v20 = vand.u32 4294901760, %v7712_v45  ;;  %v994_v51 = vand.u32 4294901760, %v7724_v44 }
  0x95   : > { %6354 = vmatprep.subr.bf16.mxu0 %v6353_v12  ;;  %v982_v37 = vand.u32 4294901760, %v981_v47  ;;  %v989_v0 = vand.u32 4294901760, %v988_v63  ;;  %v1001_v53 = vand.u32 4294901760, %v7730_v23  ;;  %v1120_v5 = vand.u32 4294901760, %v7734_v9  ;;  %6260 = vmatpush3.bf16.msra.mxu1 %v6259_v27 }
  0x96   : > { %v6261_v40 = vpack.c.bf16 %v1101_v31, %v1094_v35  ;;  %v1108_v41 = vand.u32 4294901760, %v1107_v48  ;;  %v1114_v38 = vsub.f32 %v7712_v45, %v1113_v20  ;;  %v995_v39 = vsub.f32 %v7724_v44, %v994_v51 }
  0x97   : > { %v6263_v58 = vpack.c.bf16 %v989_v0, %v982_v37  ;;  %v1002_v52 = vsub.f32 %v7730_v23, %v1001_v53  ;;  %v6361_v54 = vpack.c.bf16 %v1113_v20, %v1106_v36  ;;  %v6363_v18 = vpack.c.bf16 %v1001_v53, %v994_v51 }
  0x98   : > { %6356 = vmatpush3.bf16.msra.mxu0 %v6355_v11  ;;  %6262 = vmatprep.subr.bf16.mxu1 %v6261_v40  ;;  %v1115_v8 = vand.u32 4294901760, %v1114_v38  ;;  %v996_v12 = vand.u32 4294901760, %v995_v39  ;;  %v1121_v30 = vsub.f32 %v7734_v9, %v1120_v5  ;;  %v1127_v57 = vand.u32 4294901760, %v7736_v16 }
  0x99   : > { %6358 = vmatprep.subr.bf16.mxu0 %v6357_v62  ;;  %v1003_v29 = vand.u32 4294901760, %v1002_v52  ;;  %v1008_v32 = vand.u32 4294901760, %v7741_v42  ;;  %v1015_v45 = vand.u32 4294901760, %v7746_v15  ;;  %v1134_v44 = vand.u32 4294901760, %v7750_v14  ;;  %6264 = vmatpush3.bf16.msra.mxu1 %v6263_v58 }
  0x9a   : > { %v6265_v23 = vpack.c.bf16 %v1115_v8, %v1108_v41  ;;  %v1122_v24 = vand.u32 4294901760, %v1121_v30  ;;  %v1128_v11 = vsub.f32 %v7736_v16, %v1127_v57  ;;  %v6365_v17 = vpack.c.bf16 %v1127_v57, %v1120_v5 }
  0x9b   : > { %v6267_v34 = vpack.c.bf16 %v1003_v29, %v996_v12  ;;  %v1009_v56 = vsub.f32 %v7741_v42, %v1008_v32  ;;  %v1016_v9 = vsub.f32 %v7746_v15, %v1015_v45  ;;  %v6367_v35 = vpack.c.bf16 %v1015_v45, %v1008_v32 }
  0x9c   : > { %6360 = vmatpush3.bf16.msra.mxu0 %v6359_v3  ;;  %6266 = vmatprep.subr.bf16.mxu1 %v6265_v23  ;;  %v1129_v59 = vand.u32 4294901760, %v1128_v11  ;;  %v1135_v21 = vsub.f32 %v7750_v14, %v1134_v44  ;;  %v1141_v2 = vand.u32 4294901760, %v7756_v10  ;;  %v1022_v22 = vand.u32 4294901760, %v7762_v50 }
  0x9d   : > { %6362 = vmatprep.subr.bf16.mxu0 %v6361_v54  ;;  %v1010_v62 = vand.u32 4294901760, %v1009_v56  ;;  %v1017_v36 = vand.u32 4294901760, %v1016_v9  ;;  %v1029_v16 = vand.u32 4294901760, %v7764_v6  ;;  %v226_v27 = vadd.s32 384, %v7402_v1  ;;  %6268 = vmatpush3.bf16.msra.mxu1 %v6267_v34 }
  0x9e   : > { %v6269_v42 = vpack.c.bf16 %v1129_v59, %v1122_v24  ;;  %v1136_v15 = vand.u32 4294901760, %v1135_v21  ;;  %v1142_v47 = vsub.f32 %v7756_v10, %v1141_v2  ;;  %v1023_v63 = vsub.f32 %v7762_v50, %v1022_v22 }
  0x9f   : > { %v6271_v3 = vpack.c.bf16 %v1017_v36, %v1010_v62  ;;  %v1030_v14 = vsub.f32 %v7764_v6, %v1029_v16  ;;  %v6369_v31 = vpack.c.bf16 %v1141_v2, %v1134_v44  ;;  %v6371_v48 = vpack.c.bf16 %v1029_v16, %v1022_v22 }
  0xa0   : > { %6364 = vmatpush3.bf16.msra.mxu0 %v6363_v18  ;;  %6270 = vmatprep.subr.bf16.mxu1 %v6269_v42  ;;  %v1143_v20 = vand.u32 4294901760, %v1142_v47  ;;  %v1024_v51 = vand.u32 4294901760, %v1023_v63  ;;  %v227_v37 = vadd.s32 392, %v7402_v1  ;;  %vm311_vm3 = vcmp.eq.s32.totalorder %v226_v27, %v7433_v19 }
  0xa1   : > { %6366 = vmatprep.subr.bf16.mxu0 %v6365_v17  ;;  %v1031_v0 = vand.u32 4294901760, %v1030_v14  ;;  %v10497_v53 = vmov 0.0   ;;  %v210_v10 = vadd.s32 256, %v7402_v1  ;;  %v211_v50 = vadd.s32 264, %v7402_v1  ;;  %6272 = vmatpush3.bf16.msra.mxu1 %v6271_v3 }
  0xa2   : > { %v391_v5 = vsel %vm311_vm3, 1.0, %v10497_v53  ;;  %v6273_v6 = vpack.c.bf16 %v1143_v20, %v1136_v15  ;;  %vm312_vm4 = vcmp.eq.s32.totalorder %v227_v37, %v7433_v19  ;;  %v228_v40 = vadd.s32 400, %v7402_v1 }
  0xa3   : > { %472 = vst.msk [vmem:[#allocation2 + $0x180] sm:$0xff] %vm10373_vm0, %v391_v5  ;;  %v229_v41 = vadd.s32 408, %v7402_v1  ;;  %v6275_v38 = vpack.c.bf16 %v1031_v0, %v1024_v51  ;;  %v392_v39 = vsel %vm312_vm4, 1.0, %v10497_v53  ;;  %vm295_vm5 = vcmp.eq.s32.totalorder %v210_v10, %v7433_v19 }
  0xa4   : > { %vm296_vm6 = vcmp.eq.s32.totalorder %v211_v50, %v7433_v19  ;;  %6368 = vmatpush3.bf16.msra.mxu0 %v6367_v35  ;;  %6274 = vmatprep.subr.bf16.mxu1 %v6273_v6  ;;  %473 = vst.msk [vmem:[#allocation2 + $0x188] sm:$0xff] %vm10373_vm0, %v392_v39  ;;  %v375_v58 = vsel %vm295_vm5, 1.0, %v10497_v53  ;;  %vm313_vm7 = vcmp.eq.s32.totalorder %v228_v40, %v7433_v19  ;;  %v212_v8 = vadd.s32 272, %v7402_v1 }
  0xa5   : > { %v376_v52 = vsel %vm296_vm6, 1.0, %v10497_v53  ;;  %vm314_vm8 = vcmp.eq.s32.totalorder %v229_v41, %v7433_v19  ;;  %6370 = vmatprep.subr.bf16.mxu0 %v6369_v31  ;;  %456 = vst.msk [vmem:[#allocation2 + $0x100] sm:$0xff] %vm10373_vm0, %v375_v58  ;;  %v393_v54 = vsel %vm313_vm7, 1.0, %v10497_v53  ;;  %v213_v12 = vadd.s32 280, %v7402_v1  ;;  %6276 = vmatpush3.bf16.msra.mxu1 %v6275_v38 }
  0xa6   : > { %457 = vst.msk [vmem:[#allocation2 + $0x108] sm:$0xff] %vm10373_vm0, %v376_v52  ;;  %v394_v18 = vsel %vm314_vm8, 1.0, %v10497_v53  ;;  %474 = vst.msk [vmem:[#allocation2 + $0x190] sm:$0xff] %vm10373_vm0, %v393_v54  ;;  %v230_v30 = vadd.s32 416, %v7402_v1  ;;  %v231_v57 = vadd.s32 424, %v7402_v1  ;;  %v214_v29 = vadd.s32 288, %v7402_v1  ;;  %6310 = vmatprep.subr.bf16.mxu1 %v7534_v61 }
  0xa7   : > { %475 = vst.msk [vmem:[#allocation2 + $0x198] sm:$0xff] %vm10373_vm0, %v394_v18  ;;  %v215_v32 = vadd.s32 296, %v7402_v1  ;;  %vm297_vm9 = vcmp.eq.s32.totalorder %v212_v8, %v7433_v19  ;;  %vm298_vm10 = vcmp.eq.s32.totalorder %v213_v12, %v7433_v19  ;;  %v232_v45 = vadd.s32 432, %v7402_v1 }
  0xa8   : > { %v233_v44 = vadd.s32 440, %v7402_v1  ;;  %6372 = vmatpush3.bf16.msra.mxu0 %v6371_v48  ;;  %v377_v23 = vsel %vm297_vm9, 1.0, %v10497_v53  ;;  %v378_v24 = vsel %vm298_vm10, 1.0, %v10497_v53  ;;  %vm315_vm11 = vcmp.eq.s32.totalorder %v230_v30, %v7433_v19  ;;  %1148 = vmatmul.mubr.f32.vlgmr.msra.gmra.mrb[2].mxu1 %v7695_v7 }
  0xa9   : > { %vm316_vm12 = vcmp.eq.s32.totalorder %v231_v57, %v7433_v19  ;;  %458 = vst.msk [vmem:[#allocation2 + $0x110] sm:$0xff] %vm10373_vm0, %v377_v23  ;;  %459 = vst.msk [vmem:[#allocation2 + $0x118] sm:$0xff] %vm10373_vm0, %v378_v24  ;;  %v395_v17 = vsel %vm315_vm11, 1.0, %v10497_v53  ;;  %vm299_vm13 = vcmp.eq.s32.totalorder %v214_v29, %v7433_v19  ;;  %vm300_vm14 = vcmp.eq.s32.totalorder %v215_v32, %v7433_v19 }
  0xaa   : > { %v7884_v11 = vld [vmem:[#allocation2 + $0x180] sm:$0xff]  ;;  %v396_v34 = vsel %vm316_vm12, 1.0, %v10497_v53  ;;  %6312 = vmatpush3.bf16.msra.mxu1 %v7543_v4  ;;  %476 = vst.msk [vmem:[#allocation2 + $0x1a0] sm:$0xff] %vm10373_vm0, %v395_v17  ;;  %v379_v9 = vsel %vm299_vm13, 1.0, %v10497_v53  ;;  %v380_v35 = vsel %vm300_vm14, 1.0, %v10497_v53  ;;  %vm317_vm15 = vcmp.eq.s32.totalorder %v232_v45, %v7433_v19 }
  0xab   : > { %v1720_v56 = vand.u32 4294901760, %v7884_v11  ;;  %477 = vst.msk [vmem:[#allocation2 + $0x1a8] sm:$0xff] %vm10373_vm0, %v396_v34  ;;  %v10498_v59 = vand.u32 4294901760, %v7684_v60  ;;  %1562 = vmatmul.mubr.f32.vlgmr.msra.gmra.mrb[2].mxu0 %v7695_v7  ;;  %v7902_v21 = vld [vmem:[#allocation2 + $0x188] sm:$0xff]  ;;  %6314 = vmatprep.subr.bf16.mxu1 %v7555_v28  ;;  %460 = vst.msk [vmem:[#allocation2 + $0x120] sm:$0xff] %vm10373_vm0, %v379_v9  ;;  %vm318_vm1 = vcmp.eq.s32.totalorder %v233_v44, %v7433_v19  ;;  %v397_v2 = vsel %vm317_vm15, 1.0, %v10497_v53 }
  0xac   : > { %461 = vst.msk [vmem:[#allocation2 + $0x128] sm:$0xff] %vm10373_vm0, %v380_v35  ;;  %v216_v22 = vadd.s32 304, %v7402_v1  ;;  %v217_v62 = vadd.s32 312, %v7402_v1  ;;  %v1723_v60 = vand.u32 4294901760, %v7902_v21  ;;  %v761_v36 = vld [vmem:[#allocation2 + $0x100] sm:$0xff]  ;;  %v398_v27 = vsel %vm318_vm1, 1.0, %v10497_v53 }
  0xad   : > { %1390 = vmatprep.mubr.f32.mxu1 %v10498_v59  ;;  %v762_v16 = vld [vmem:[#allocation2 + $0x108] sm:$0xff]  ;;  %478 = vst.msk [vmem:[#allocation2 + $0x1b0] sm:$0xff] %vm10373_vm0, %v397_v2  ;;  %v234_v42 = vadd.s32 448, %v7402_v1  ;;  %v1672_v15 = vand.u32 4294901760, %v761_v36  ;;  %v7915_v63 = vld [vmem:[#allocation2 + $0x190] sm:$0xff]  ;;  %479 = vst.msk [vmem:[#allocation2 + $0x1b8] sm:$0xff] %vm10373_vm0, %v398_v27  ;;  %v7987_v44 = vsub.f32 %v7884_v11, %v1720_v56 }
  0xae   : > { %v1675_v47 = vand.u32 4294901760, %v762_v16  ;;  %v7917_v3 = vld [vmem:[#allocation2 + $0x198] sm:$0xff]  ;;  %vm301_vm2 = vcmp.eq.s32.totalorder %v216_v22, %v7433_v19  ;;  %vm302_vm3 = vcmp.eq.s32.totalorder %v217_v62, %v7433_v19  ;;  %v7924_v14 = vpack.c.bf16 %v1723_v60, %v1720_v56  ;;  %6316 = vmatpush3.bf16.msra.mxu1 %v7563_v33  ;;  %v10505_v11 = vld [vmem:[#allocation23_spill] sm:$0xff] }
  0xaf   : > { %v1726_v31 = vand.u32 4294901760, %v7915_v63  ;;  %v1729_v48 = vand.u32 4294901760, %v7917_v3  ;;  %6318 = vmatprep.subr.bf16.mxu1 %v7575_v46  ;;  %v381_v51 = vsel %vm301_vm2, 1.0, %v10497_v53  ;;  %v382_v10 = vsel %vm302_vm3, 1.0, %v10497_v53  ;;  %v10507_v22 = vld [vmem:[#allocation24_spill] sm:$0xff] }
  0xb0   : > { %10499 = vst [vmem:[#allocation33_spill] sm:$0xff] %v7924_v14  ;;  %v7929_v20 = vpack.c.bf16 %v1675_v47, %v1672_v15  ;;  %6406 = vmatprep.subr.bf16.mxu0 %v7924_v14  ;;  %v7940_v0 = vld [vmem:[#allocation2 + $0x110] sm:$0xff]  ;;  %v7942_v5 = vld [vmem:[#allocation2 + $0x118] sm:$0xff]  ;;  %462 = vst.msk [vmem:[#allocation2 + $0x130] sm:$0xff] %vm10373_vm0, %v381_v51  ;;  %v235_v38 = vadd.s32 456, %v7402_v1  ;;  %vm319_vm4 = vcmp.eq.s32.totalorder %v234_v42, %v7433_v19  ;;  %v218_v57 = vadd.s32 320, %v7402_v1 }
  0xb1   : > { %v7938_v37 = vpack.c.bf16 %v1729_v48, %v1726_v31  ;;  %v1678_v50 = vand.u32 4294901760, %v7940_v0  ;;  %v1681_v6 = vand.u32 4294901760, %v7942_v5  ;;  %v7949_v40 = vld [vmem:[#allocation2 + $0x1a0] sm:$0xff]  ;;  %463 = vst.msk [vmem:[#allocation2 + $0x138] sm:$0xff] %vm10373_vm0, %v382_v10  ;;  %v399_v18 = vsel %vm319_vm4, 1.0, %v10497_v53 }
  0xb2   : > { %10500 = vst [vmem:[#allocation34_spill] sm:$0xff] %v7929_v20  ;;  %6408 = vmatpush3.bf16.msra.mxu0 %v7929_v20  ;;  %v7951_v41 = vld [vmem:[#allocation2 + $0x1a8] sm:$0xff]  ;;  %6320 = vmatpush3.bf16.msra.mxu1 %v7581_v49  ;;  %v1732_v39 = vand.u32 4294901760, %v7949_v40  ;;  %v7960_v52 = vld [vmem:[#allocation2 + $0x120] sm:$0xff]  ;;  %480 = vst.msk [vmem:[#allocation2 + $0x1c0] sm:$0xff] %vm10373_vm0, %v399_v18  ;;  %vm320_vm5 = vcmp.eq.s32.totalorder %v235_v38, %v7433_v19  ;;  %v7994_v17 = vsub.f32 %v7902_v21, %v1723_v60 }
  0xb3   : > { %10501 = vst [vmem:[#allocation35_spill] sm:$0xff] %v7938_v37  ;;  %6410 = vmatprep.subr.bf16.mxu0 %v7938_v37  ;;  %v1735_v58 = vand.u32 4294901760, %v7951_v41  ;;  %v7962_v54 = vld [vmem:[#allocation2 + $0x128] sm:$0xff]  ;;  %v7967_v8 = vpack.c.bf16 %v1681_v6, %v1678_v50  ;;  %v10299_v12 = vand.u32 4294901760, %v7960_v52  ;;  %6322 = vmatprep.subr.bf16.mxu1 %v7587_v55  ;;  %v400_v56 = vsel %vm320_vm5, 1.0, %v10497_v53  ;;  %v10508_v10 = vld [vmem:[#allocation25_spill] sm:$0xff] }
  0xb4   : > { %v7971_v30 = vld [vmem:[#allocation2 + $0x1b0] sm:$0xff]  ;;  %v10298_v32 = vand.u32 4294901760, %v7962_v54  ;;  %v7982_v45 = vld [vmem:[#allocation2 + $0x1b8] sm:$0xff]  ;;  %v219_v9 = vadd.s32 328, %v7402_v1  ;;  %v8006_v35 = vsub.f32 %v761_v36, %v1672_v15  ;;  %v8008_v59 = vsub.f32 %v762_v16, %v1675_v47  ;;  %481 = vst.msk [vmem:[#allocation2 + $0x1c8] sm:$0xff] %vm10373_vm0, %v400_v56 }
  0xb5   : > { %10502 = vst [vmem:[#allocation36_spill] sm:$0xff] %v7967_v8  ;;  %v7979_v29 = vpack.c.bf16 %v1735_v58, %v1732_v39  ;;  %v10295_v23 = vand.u32 4294901760, %v7971_v30  ;;  %v10294_v24 = vand.u32 4294901760, %v7982_v45  ;;  %vm303_vm6 = vcmp.eq.s32.totalorder %v218_v57, %v7433_v19 }
  0xb6   : > { %6412 = vmatpush3.bf16.msra.mxu0 %v7967_v8  ;;  %v8001_v34 = vpack.c.bf16 %v10298_v32, %v10299_v12  ;;  %6324 = vmatpush3.bf16.msra.mxu1 %v10505_v11  ;;  %vm304_vm7 = vcmp.eq.s32.totalorder %v219_v9, %v7433_v19  ;;  %v383_v36 = vsel %vm303_vm6, 1.0, %v10497_v53  ;;  %v236_v16 = vadd.s32 464, %v7402_v1  ;;  %v10510_v9 = vld [vmem:[#allocation27_spill] sm:$0xff] }
  0xb7   : > { %10503 = vst [vmem:[#allocation37_spill] sm:$0xff] %v7979_v29  ;;  %6414 = vmatprep.subr.bf16.mxu0 %v7979_v29  ;;  %v8014_v21 = vpack.c.bf16 %v10294_v24, %v10295_v23  ;;  %v8016_v2 = vld [vmem:[#allocation2 + $0x130] sm:$0xff]  ;;  %6326 = vmatprep.subr.bf16.mxu1 %v10507_v22  ;;  %v384_v42 = vsel %vm304_vm7, 1.0, %v10497_v53  ;;  %464 = vst.msk [vmem:[#allocation2 + $0x140] sm:$0xff] %vm10373_vm0, %v383_v36  ;;  %v237_v15 = vadd.s32 472, %v7402_v1  ;;  %v220_v47 = vadd.s32 336, %v7402_v1 }
  0xb8   : > { %10504 = vst [vmem:[#allocation38_spill] sm:$0xff] %v8001_v34  ;;  %v8021_v62 = vld [vmem:[#allocation2 + $0x138] sm:$0xff]  ;;  %v10293_v60 = vand.u32 4294901760, %v8016_v2  ;;  %v8036_v51 = vsub.f32 %v7915_v63, %v1726_v31  ;;  %465 = vst.msk [vmem:[#allocation2 + $0x148] sm:$0xff] %vm10373_vm0, %v384_v42  ;;  %vm321_vm8 = vcmp.eq.s32.totalorder %v236_v16, %v7433_v19  ;;  %v221_v18 = vadd.s32 344, %v7402_v1 }
  0xb9   : > { %10506 = vst [vmem:[#allocation23_spill] sm:$0xff] %v8014_v21  ;;  %v10292_v27 = vand.u32 4294901760, %v8021_v62  ;;  %v8040_v38 = vld [vmem:[#allocation2 + $0x1c0] sm:$0xff]  ;;  %v238_v57 = vadd.s32 480, %v7402_v1  ;;  %v8049_v56 = vsub.f32 %v7917_v3, %v1729_v48  ;;  %v8052_v63 = vsub.f32 %v7940_v0, %v1678_v50 }
  0xba   : > { %6416 = vmatpush3.bf16.msra.mxu0 %v8001_v34  ;;  %6328 = vmatpush3.bf16.msra.mxu1 %v10508_v10  ;;  %vm322_vm9 = vcmp.eq.s32.totalorder %v237_v15, %v7433_v19  ;;  %v401_v36 = vsel %vm321_vm8, 1.0, %v10497_v53  ;;  %vm305_vm10 = vcmp.eq.s32.totalorder %v220_v47, %v7433_v19  ;;  %vm306_vm11 = vcmp.eq.s32.totalorder %v221_v18, %v7433_v19  ;;  %v10511_v15 = vld [vmem:[#allocation28_spill] sm:$0xff] }
  0xbb   : > { %6418 = vmatprep.subr.bf16.mxu0 %v8014_v21  ;;  %v8058_v31 = vpack.c.bf16 %v10292_v27, %v10293_v60  ;;  %6330 = vmatprep.subr.bf16.mxu1 %v10510_v9  ;;  %v402_v16 = vsel %vm322_vm9, 1.0, %v10497_v53  ;;  %v10297_v3 = vand.u32 4294901760, %v8040_v38  ;;  %482 = vst.msk [vmem:[#allocation2 + $0x1d0] sm:$0xff] %vm10373_vm0, %v401_v36  ;;  %v385_v48 = vsel %vm305_vm10, 1.0, %v10497_v53  ;;  %v8073_v42 = vld [vmem:[#allocation2 + $0x1c8] sm:$0xff] }
  0xbc   : > { %483 = vst.msk [vmem:[#allocation2 + $0x1d8] sm:$0xff] %vm10373_vm0, %v402_v16  ;;  %v386_v0 = vsel %vm306_vm11, 1.0, %v10497_v53  ;;  %v239_v50 = vadd.s32 488, %v7402_v1  ;;  %466 = vst.msk [vmem:[#allocation2 + $0x150] sm:$0xff] %vm10373_vm0, %v385_v48  ;;  %vm323_vm12 = vcmp.eq.s32.totalorder %v238_v57, %v7433_v19  ;;  %v222_v47 = vadd.s32 352, %v7402_v1 }
  0xbd   : > { %10509 = vst [vmem:[#allocation24_spill] sm:$0xff] %v8058_v31  ;;  %467 = vst.msk [vmem:[#allocation2 + $0x158] sm:$0xff] %vm10373_vm0, %v386_v0  ;;  %v223_v18 = vadd.s32 360, %v7402_v1  ;;  %v240_v36 = vadd.s32 496, %v7402_v1  ;;  %v10296_v16 = vand.u32 4294901760, %v8073_v42  ;;  %v403_v48 = vsel %vm323_vm12, 1.0, %v10497_v53 }
  0xbe   : > { %6420 = vmatpush3.bf16.msra.mxu0 %v8058_v31  ;;  %6332 = vmatpush3.bf16.msra.mxu1 %v10511_v15  ;;  %vm324_vm13 = vcmp.eq.s32.totalorder %v239_v50, %v7433_v19  ;;  %v241_v0 = vadd.s32 504, %v7402_v1  ;;  %v8087_v27 = vld [vmem:[#allocation2 + $0x140] sm:$0xff]  ;;  %484 = vst.msk [vmem:[#allocation2 + $0x1e0] sm:$0xff] %vm10373_vm0, %v403_v48  ;;  %vm307_vm14 = vcmp.eq.s32.totalorder %v222_v47, %v7433_v19  ;;  %v10519_v37 = vand.u32 4294901760, %v7962_v54 }
  0xbf   : > { %6334 = vmatprep.subr.bf16.mxu1 %v7732_v26  ;;  %v404_v57 = vsel %vm324_vm13, 1.0, %v10497_v53  ;;  %vm308_vm15 = vcmp.eq.s32.totalorder %v223_v18, %v7433_v19  ;;  %vm325_vm1 = vcmp.eq.s32.totalorder %v240_v36, %v7433_v19  ;;  %v8097_v50 = vsub.f32 %v7942_v5, %v1681_v6  ;;  %v8105_v24 = vld [vmem:[#allocation2 + $0x148] sm:$0xff]  ;;  %v727_v18 = vld [vmem:[%s7395_s9 + $0x18] sm:$0xff]  ;;  %v726_v36 = vld [vmem:[%s7395_s9 + $0x10] sm:$0xff] }
  0xc0   : > { %v8103_v60 = vpack.c.bf16 %v10296_v16, %v10297_v3  ;;  %v10311_v48 = vand.u32 4294901760, %v8087_v27  ;;  %485 = vst.msk [vmem:[#allocation2 + $0x1e8] sm:$0xff] %vm10373_vm0, %v404_v57  ;;  %v387_v47 = vsel %vm307_vm14, 1.0, %v10497_v53  ;;  %v10310_v23 = vand.u32 4294901760, %v8105_v24  ;;  %v10513_v5 = vld [vmem:[#allocation30_spill] sm:$0xff]  ;;  %v10514_v3 = vld [vmem:[#allocation31_spill] sm:$0xff] }
  0xc1   : > { %v388_v6 = vsel %vm308_vm15, 1.0, %v10497_v53  ;;  %468 = vst.msk [vmem:[#allocation2 + $0x160] sm:$0xff] %vm10373_vm0, %v387_v47  ;;  %vm326_vm2 = vcmp.eq.s32.totalorder %v241_v0, %v7433_v19  ;;  %v405_v16 = vsel %vm325_vm1, 1.0, %v10497_v53  ;;  %v8121_v57 = vsub.f32 %v7949_v40, %v1732_v39 }
  0xc2   : > { %10512 = vst [vmem:[#allocation25_spill] sm:$0xff] %v8103_v60  ;;  %6336 = vmatpush3.bf16.msra.mxu1 %v10513_v5  ;;  %6422 = vmatprep.subr.bf16.mxu0 %v8103_v60  ;;  %469 = vst.msk [vmem:[#allocation2 + $0x168] sm:$0xff] %vm10373_vm0, %v388_v6  ;;  %v406_v32 = vsel %vm326_vm2, 1.0, %v10497_v53  ;;  %v224_v47 = vadd.s32 368, %v7402_v1  ;;  %v225_v0 = vadd.s32 376, %v7402_v1  ;;  %v8133_v12 = vsub.f32 %v7951_v41, %v1735_v58  ;;  %v787_v39 = vld [vmem:[#allocation2 + $0x1d0] sm:$0xff] }
  0xc3   : > { %6338 = vmatprep.subr.bf16.mxu1 %v10514_v3  ;;  %486 = vst.msk [vmem:[#allocation2 + $0x1f0] sm:$0xff] %vm10373_vm0, %v405_v16  ;;  %v8139_v40 = vpack.c.bf16 %v10310_v23, %v10311_v48  ;;  %v788_v6 = vld [vmem:[#allocation2 + $0x1d8] sm:$0xff]  ;;  %487 = vst.msk [vmem:[#allocation2 + $0x1f8] sm:$0xff] %vm10373_vm0, %v406_v32  ;;  %v8142_v16 = vand.u32 4294901760, %v727_v18  ;;  %v8144_v60 = vand.u32 4294901760, %v726_v36  ;;  %v1750_v31 = vand.u32 4294901760, %v787_v39 }
  0xc4   : > { %v1753_v21 = vand.u32 4294901760, %v788_v6  ;;  %v771_v34 = vld [vmem:[#allocation2 + $0x150] sm:$0xff]  ;;  %v772_v29 = vld [vmem:[#allocation2 + $0x158] sm:$0xff]  ;;  %vm309_vm3 = vcmp.eq.s32.totalorder %v224_v47, %v7433_v19  ;;  %vm310_vm4 = vcmp.eq.s32.totalorder %v225_v0, %v7433_v19  ;;  %v10518_v48 = vand.u32 4294901760, %v7960_v52 }
  0xc5   : > { %10515 = vst [vmem:[#allocation27_spill] sm:$0xff] %v8139_v40  ;;  %10516 = vst [vmem:[#allocation28_spill] sm:$0xff] %v8142_v16  ;;  %6424 = vmatpush3.bf16.msra.mxu0 %v8139_v40  ;;  %v1702_v41 = vand.u32 4294901760, %v771_v34  ;;  %v1705_v58 = vand.u32 4294901760, %v772_v29  ;;  %v389_v32 = vsel %vm309_vm3, 1.0, %v10497_v53  ;;  %v390_v23 = vsel %vm310_vm4, 1.0, %v10497_v53 }
  0xc6   : > { %10517 = vst [vmem:[#allocation39_spill] sm:$0xff] %v8144_v60  ;;  %6340 = vmatpush3.bf16.msra.mxu1 %v7760_v13  ;;  %v8155_v8 = vsub.f32 %v7960_v52, %v10518_v48  ;;  %v8160_v47 = vsub.f32 %v7962_v54, %v10519_v37  ;;  %v8162_v0 = vpack.c.bf16 %v1753_v21, %v1750_v31  ;;  %v789_v40 = vld [vmem:[#allocation2 + $0x1e0] sm:$0xff]  ;;  %470 = vst.msk [vmem:[#allocation2 + $0x170] sm:$0xff] %vm10373_vm0, %v389_v32 }
  0xc7   : > { %471 = vst.msk [vmem:[#allocation2 + $0x178] sm:$0xff] %vm10373_vm0, %v390_v23  ;;  %6374 = vmatprep.subr.bf16.mxu1 %v7534_v61  ;;  %v8168_v20 = vsub.f32 %v727_v18, %v8142_v16  ;;  %v10521_v52 = vand.u32 4294901760, %v7971_v30  ;;  %v10522_v37 = vand.u32 4294901760, %v7982_v45  ;;  %v8180_v14 = vpack.c.bf16 %v1705_v58, %v1702_v41  ;;  %v790_v32 = vld [vmem:[#allocation2 + $0x1e8] sm:$0xff] }
  0xc8   : > { %10520 = vst [vmem:[#allocation40_spill] sm:$0xff] %v8162_v0  ;;  %v1756_v53 = vand.u32 4294901760, %v789_v40  ;;  %v10524_v23 = vand.u32 4294901760, %v8016_v2  ;;  %6426 = vmatprep.subr.bf16.mxu0 %v8162_v0  ;;  %v1759_v18 = vand.u32 4294901760, %v790_v32  ;;  %v773_v19 = vld [vmem:[#allocation2 + $0x160] sm:$0xff]  ;;  %v10528_v0 = vand.u32 4294901760, %v8073_v42 }
  0xc9   : > { %v8173_v48 = vsub.f32 %v7971_v30, %v10521_v52  ;;  %v8178_v54 = vsub.f32 %v7982_v45, %v10522_v37  ;;  %10523 = vst [vmem:[#allocation41_spill] sm:$0xff] %v8180_v14  ;;  %v10525_v30 = vand.u32 4294901760, %v7721_v25  ;;  %v8192_v45 = vsub.f32 %v726_v36, %v8144_v60  ;;  %6428 = vmatpush3.bf16.msra.mxu0 %v8180_v14 }
  0xca   : > { %v8185_v61 = vsub.f32 %v8016_v2, %v10524_v23  ;;  %v10526_v37 = vand.u32 4294901760, %v8021_v62  ;;  %v10527_v2 = vand.u32 4294901760, %v8040_v38  ;;  %v8207_v25 = vsub.f32 %v8073_v42, %v10528_v0  ;;  %v791_v52 = vld [vmem:[#allocation2 + $0x1f0] sm:$0xff] }
  0xcb   : > { %1394 = vmatmul.mubr.f32.vlgmr.msra.gmra.mrb[4].mxu1 %v10525_v30  ;;  %v774_v30 = vld [vmem:[#allocation2 + $0x168] sm:$0xff]  ;;  %v1708_v36 = vand.u32 4294901760, %v773_v19  ;;  %v8216_v60 = vpack.c.bf16 %v1759_v18, %v1756_v53  ;;  %v1762_v16 = vand.u32 4294901760, %v791_v52  ;;  %v10530_v42 = vand.u32 4294901760, %v8105_v24 }
  0xcc   : > { %v8197_v1 = vsub.f32 %v8021_v62, %v10526_v37  ;;  %v8202_v23 = vsub.f32 %v8040_v38, %v10527_v2  ;;  %6376 = vmatpush3.bf16.msra.mxu1 %v7543_v4  ;;  %v10529_v62 = vand.u32 4294901760, %v8087_v27  ;;  %v1711_v38 = vand.u32 4294901760, %v774_v30  ;;  %v792_v2 = vld [vmem:[#allocation2 + $0x1f8] sm:$0xff]  ;;  %1664 = vmatprep.mubr.f32.mxu1 %v7671_v43 }
  0xcd   : > { %6378 = vmatprep.subr.bf16.mxu1 %v7555_v28  ;;  %v8223_v0 = vsub.f32 %v8105_v24, %v10530_v42  ;;  %v1765_v4 = vand.u32 4294901760, %v792_v2  ;;  %v10531_v14 = vand.u32 4294901760, %v8168_v20  ;;  %v8229_v7 = vsub.f32 %v787_v39, %v1750_v31  ;;  %6430 = vmatprep.subr.bf16.mxu0 %v8216_v60  ;;  %v775_v42 = vld [vmem:[#allocation2 + $0x170] sm:$0xff] }
  0xce   : > { %v8214_v37 = vsub.f32 %v8087_v27, %v10529_v62  ;;  %v10338_v62 = vand.u32 4294901760, %v8192_v45  ;;  %v8231_v13 = vsub.f32 %v788_v6, %v1753_v21  ;;  %v8233_v3 = vsub.f32 %v771_v34, %v1702_v41  ;;  %v776_v5 = vld [vmem:[#allocation2 + $0x178] sm:$0xff] }
  0xcf   : > { %v1770_v27 = vsub.f32 %v8168_v20, %v10531_v14  ;;  %v8236_v28 = vpack.c.bf16 %v1711_v38, %v1708_v36  ;;  %v8238_v43 = vsub.f32 %v772_v29, %v1705_v58  ;;  %v8240_v24 = vpack.c.bf16 %v1765_v4, %v1762_v16 }
  0xd0   : > { %v1776_v14 = vsub.f32 %v8192_v45, %v10338_v62  ;;  %6380 = vmatpush3.bf16.msra.mxu1 %v7563_v33  ;;  %v8246_v21 = vsub.f32 %v789_v40, %v1756_v53  ;;  %v1714_v34 = vand.u32 4294901760, %v775_v42  ;;  %v1717_v31 = vand.u32 4294901760, %v776_v5 }
  0xd1   : > { %v1771_v26 = vand.u32 4294901760, %v1770_v27  ;;  %6432 = vmatpush3.bf16.msra.mxu0 %v8236_v28  ;;  %v6469_v29 = vpack.c.bf16 %v7994_v17, %v7987_v44  ;;  %6382 = vmatprep.subr.bf16.mxu1 %v7575_v46  ;;  %v8252_v39 = vsub.f32 %v790_v32, %v1759_v18  ;;  %v6471_v6 = vpack.c.bf16 %v8008_v59, %v8006_v35 }
  0xd2   : > { %6434 = vmatprep.subr.bf16.mxu0 %v8240_v24  ;;  %v6473_v33 = vpack.c.bf16 %v8049_v56, %v8036_v51  ;;  %v8259_v53 = vsub.f32 %v773_v19, %v1708_v36  ;;  %v8261_v40 = vsub.f32 %v774_v30, %v1711_v38  ;;  %v8263_v41 = vsub.f32 %v791_v52, %v1762_v16 }
  0xd3   : > { %1772 = vmatprep.mubr.f32.mxu0 %v1771_v26  ;;  %v8265_v58 = vpack.c.bf16 %v1717_v31, %v1714_v34  ;;  %v8267_v46 = vsub.f32 %v792_v2, %v1765_v4  ;;  %v1777_v32 = vand.u32 4294901760, %v1776_v14  ;;  %v6475_v26 = vpack.c.bf16 %v8097_v50, %v8052_v63 }
  0xd4   : > { %6384 = vmatpush3.bf16.msra.mxu1 %v7581_v49  ;;  %v6477_v18 = vpack.c.bf16 %v8133_v12, %v8121_v57  ;;  %v6479_v19 = vpack.c.bf16 %v8160_v47, %v8155_v8  ;;  %v6481_v16 = vpack.c.bf16 %v8178_v54, %v8173_v48  ;;  %v1898_v52 = vand.u32 4294901760, %v7987_v44 }
  0xd5   : > { %10532 = vst [vmem:[#allocation42_spill] sm:$0xff] %v8265_v58  ;;  %6436 = vmatpush3.bf16.msra.mxu0 %v8265_v58  ;;  %6386 = vmatprep.subr.bf16.mxu1 %v7587_v55  ;;  %v1905_v30 = vand.u32 4294901760, %v7994_v17  ;;  %v1786_v49 = vand.u32 4294901760, %v8006_v35  ;;  %v1793_v36 = vand.u32 4294901760, %v8008_v59  ;;  %v1912_v38 = vand.u32 4294901760, %v8036_v51 }
  0xd6   : > { %6470 = vmatprep.subr.bf16.mxu0 %v6469_v29  ;;  %v1919_v2 = vand.u32 4294901760, %v8049_v56  ;;  %v8286_v4 = vsub.f32 %v775_v42, %v1714_v34  ;;  %v6483_v55 = vpack.c.bf16 %v8197_v1, %v8185_v61  ;;  %v1800_v14 = vand.u32 4294901760, %v8052_v63 }
  0xd7   : > { %v8293_v62 = vsub.f32 %v776_v5, %v1717_v31  ;;  %v1899_v29 = vsub.f32 %v7987_v44, %v1898_v52  ;;  %v1906_v58 = vsub.f32 %v7994_v17, %v1905_v30  ;;  %v1807_v42 = vand.u32 4294901760, %v8097_v50 }
  0xd8   : > { %1778 = vmatmul.mubr.f32.vlgmr.msra.gmra.mrb[4].mxu0 %v1777_v32  ;;  %6388 = vmatpush3.bf16.msra.mxu1 %v10505_v11  ;;  %v6487_v34 = vpack.c.bf16 %v8223_v0, %v8214_v37  ;;  %v1787_v5 = vsub.f32 %v8006_v35, %v1786_v49  ;;  %v1794_v11 = vsub.f32 %v8008_v59, %v1793_v36 }
  0xd9   : > { %6472 = vmatpush3.bf16.msra.mxu0 %v6471_v6  ;;  %6390 = vmatprep.subr.bf16.mxu1 %v10507_v22  ;;  %v1913_v44 = vsub.f32 %v8036_v51, %v1912_v38  ;;  %v1920_v17 = vsub.f32 %v8049_v56, %v1919_v2  ;;  %v1801_v6 = vsub.f32 %v8052_v63, %v1800_v14  ;;  %v1900_v51 = vand.u32 4294901760, %v1899_v29 }
  0xda   : > { %6474 = vmatprep.subr.bf16.mxu0 %v6473_v33  ;;  %2145 = vmatprep.mubr.f32.mxu0 %v8168_v20  ;;  %v1808_v32 = vsub.f32 %v8097_v50, %v1807_v42  ;;  %v1907_v56 = vand.u32 4294901760, %v1906_v58  ;;  %v8323_v31 = vpack.c.bf16 %v1905_v30, %v1898_v52  ;;  %v1926_v63 = vand.u32 4294901760, %v8121_v57 }
  0xdb   : > { %v1788_v50 = vand.u32 4294901760, %v1787_v5  ;;  %v1795_v35 = vand.u32 4294901760, %v1794_v11  ;;  %v1914_v22 = vand.u32 4294901760, %v1913_v44  ;;  %v1921_v27 = vand.u32 4294901760, %v1920_v17 }
  0xdc   : > { %6392 = vmatpush3.bf16.msra.mxu1 %v10508_v10  ;;  %v1933_v10 = vand.u32 4294901760, %v8133_v12  ;;  %v8327_v59 = vpack.c.bf16 %v1793_v36, %v1786_v49  ;;  %v1802_v58 = vand.u32 4294901760, %v1801_v6  ;;  %v6437_v29 = vpack.c.bf16 %v1907_v56, %v1900_v51 }
  0xdd   : > { %6476 = vmatpush3.bf16.msra.mxu0 %v6475_v26  ;;  %6394 = vmatprep.subr.bf16.mxu1 %v10510_v9  ;;  %v1809_v26 = vand.u32 4294901760, %v1808_v32  ;;  %v1814_v9 = vand.u32 4294901760, %v8155_v8  ;;  %v1821_v52 = vand.u32 4294901760, %v8160_v47  ;;  %v1940_v30 = vand.u32 4294901760, %v8173_v48 }
  0xde   : > { %6478 = vmatprep.subr.bf16.mxu0 %v6477_v18  ;;  %v1947_v33 = vand.u32 4294901760, %v8178_v54  ;;  %v10533_v18 = vld [vmem:[#allocation29_spill] sm:$0xff]  ;;  %v8335_v5 = vpack.c.bf16 %v1919_v2, %v1912_v38  ;;  %v1927_v49 = vsub.f32 %v8121_v57, %v1926_v63  ;;  %v1934_v36 = vsub.f32 %v8133_v12, %v1933_v10  ;;  %v10534_v2 = vld [vmem:[#allocation30_spill] sm:$0xff] }
  0xdf   : > { %v6439_v11 = vpack.c.bf16 %v1795_v35, %v1788_v50  ;;  %v6441_v44 = vpack.c.bf16 %v1921_v27, %v1914_v22  ;;  %v10356_v17 = vand.u32 4294901760, %v8185_v61  ;;  %v8342_v6 = vpack.c.bf16 %v1809_v26, %v1802_v58  ;;  %v10535_v27 = vld [vmem:[#allocation31_spill] sm:$0xff] }
  0xe0   : > { %6396 = vmatpush3.bf16.msra.mxu1 %v10511_v15  ;;  %v8339_v15 = vpack.c.bf16 %v1807_v42, %v1800_v14  ;;  %v8345_v32 = vsub.f32 %v8155_v8, %v1814_v9  ;;  %v10348_v38 = vand.u32 4294901760, %v8202_v23  ;;  %v8351_v12 = vsub.f32 %v8160_v47, %v1821_v52 }
  0xe1   : > { %6480 = vmatpush3.bf16.msra.mxu0 %v6479_v19  ;;  %6398 = vmatprep.subr.bf16.mxu1 %v10533_v18  ;;  %v10351_v19 = vand.u32 4294901760, %v8197_v1  ;;  %v8353_v57 = vpack.c.bf16 %v1933_v10, %v1926_v63  ;;  %v8363_v8 = vsub.f32 %v8178_v54, %v1947_v33  ;;  %v1928_v47 = vand.u32 4294901760, %v1927_v49  ;;  %v10537_v18 = vld [vmem:[#allocation32_spill] sm:$0xff] }
  0xe2   : > { %6482 = vmatprep.subr.bf16.mxu0 %v6481_v16  ;;  %v8358_v16 = vsub.f32 %v8173_v48, %v1940_v30  ;;  %v1935_v14 = vand.u32 4294901760, %v1934_v36  ;;  %v10344_v42 = vand.u32 4294901760, %v8207_v25  ;;  %v10342_v22 = vand.u32 4294901760, %v8214_v37 }
  0xe3   : > { %v10536_v35 = vpack.c.bf16 %v8207_v25, %v8202_v23  ;;  %v8377_v51 = vsub.f32 %v8185_v61, %v10356_v17  ;;  %v10341_v56 = vand.u32 4294901760, %v8223_v0  ;;  %v10345_v63 = vand.u32 4294901760, %v8231_v13 }
  0xe4   : > { %6400 = vmatpush3.bf16.msra.mxu1 %v10534_v2  ;;  %v1816_v10 = vand.u32 4294901760, %v8345_v32  ;;  %v8383_v50 = vpack.c.bf16 %v1821_v52, %v1814_v9  ;;  %v1836_v58 = vsub.f32 %v8197_v1, %v10351_v19  ;;  %v1955_v26 = vsub.f32 %v8202_v23, %v10348_v38 }
  0xe5   : > { %6484 = vmatpush3.bf16.msra.mxu0 %v6483_v55  ;;  %6402 = vmatprep.subr.bf16.mxu1 %v10535_v27  ;;  %v10343_v55 = vand.u32 4294901760, %v8229_v7  ;;  %v1823_v49 = vand.u32 4294901760, %v8351_v12  ;;  %v1942_v36 = vand.u32 4294901760, %v8358_v16  ;;  %v1962_v32 = vsub.f32 %v8207_v25, %v10344_v42 }
  0xe6   : > { %6486 = vmatprep.subr.bf16.mxu0 %v10536_v35  ;;  %v1843_v9 = vsub.f32 %v8214_v37, %v10342_v22  ;;  %v1949_v52 = vand.u32 4294901760, %v8363_v8  ;;  %v1850_v2 = vsub.f32 %v8223_v0, %v10341_v56  ;;  %v10347_v16 = vand.u32 4294901760, %v8233_v3 }
  0xe7   : > { %v1969_v12 = vsub.f32 %v8229_v7, %v10343_v55  ;;  %v10538_v27 = vpack.c.bf16 %v8231_v13, %v8229_v7  ;;  %v6445_v35 = vpack.c.bf16 %v1935_v14, %v1928_v47  ;;  %v10346_v8 = vand.u32 4294901760, %v8238_v43 }
  0xe8   : > { %6404 = vmatpush3.bf16.msra.mxu1 %v10537_v18  ;;  %v10539_v18 = vld [vmem:[#allocation26_spill] sm:$0xff]  ;;  %v1837_v56 = vand.u32 4294901760, %v1836_v58  ;;  %v1956_v22 = vand.u32 4294901760, %v1955_v26  ;;  %v1857_v55 = vsub.f32 %v8233_v3, %v10347_v16  ;;  %v10349_v42 = vand.u32 4294901760, %v8246_v21 }
  0xe9   : > { %6488 = vmatpush3.bf16.msra.mxu0 %v6487_v34  ;;  %6438 = vmatprep.subr.bf16.mxu1 %v6437_v29  ;;  %v1830_v34 = vand.u32 4294901760, %v8377_v51  ;;  %v1976_v29 = vsub.f32 %v8231_v13, %v10345_v63  ;;  %v1963_v47 = vand.u32 4294901760, %v1962_v32  ;;  %v1844_v14 = vand.u32 4294901760, %v1843_v9  ;;  %v10540_v63 = vld [vmem:[#allocation28_spill] sm:$0xff] }
  0xea   : > { %6490 = vmatprep.subr.bf16.mxu0 %v10538_v27  ;;  %v1864_v51 = vsub.f32 %v8238_v43, %v10346_v8  ;;  %v10350_v27 = vand.u32 4294901760, %v8252_v39  ;;  %v10541_v58 = vpack.c.bf16 %v8238_v43, %v8233_v3  ;;  %v1851_v26 = vand.u32 4294901760, %v1850_v2 }
  0xeb   : > { %1666 = vmatmul.mubr.f32.vlgmr.msra.gmra.mrb[6].mxu1 %v10539_v18  ;;  %v1970_v18 = vand.u32 4294901760, %v1969_v12  ;;  %v10352_v32 = vand.u32 4294901760, %v8259_v53  ;;  %v10542_v9 = vpack.c.bf16 %v8252_v39, %v8246_v21  ;;  %v1977_v8 = vand.u32 4294901760, %v1976_v29 }
  0xec   : > { %6440 = vmatpush3.bf16.msra.mxu1 %v6439_v11  ;;  %2008 = vmatprep.mubr.f32.mxu1 %v10540_v63  ;;  %v1983_v11 = vsub.f32 %v8246_v21, %v10349_v42  ;;  %v1858_v16 = vand.u32 4294901760, %v1857_v55  ;;  %v1990_v38 = vsub.f32 %v8252_v39, %v10350_v27  ;;  %v1865_v2 = vand.u32 4294901760, %v1864_v51 }
  0xed   : > { %6492 = vmatpush3.bf16.msra.mxu0 %v10541_v58  ;;  %6442 = vmatprep.subr.bf16.mxu1 %v6441_v44  ;;  %v10355_v44 = vand.u32 4294901760, %v8261_v40  ;;  %v1871_v12 = vsub.f32 %v8259_v53, %v10352_v32  ;;  %v10353_v58 = vand.u32 4294901760, %v8263_v41  ;;  %v10354_v42 = vand.u32 4294901760, %v8267_v46 }
  0xee   : > { %6494 = vmatprep.subr.bf16.mxu0 %v10542_v9  ;;  %v6447_v9 = vpack.c.bf16 %v1823_v49, %v1816_v10  ;;  %v1984_v29 = vand.u32 4294901760, %v1983_v11  ;;  %v1991_v55 = vand.u32 4294901760, %v1990_v38  ;;  %v10543_v51 = vpack.c.bf16 %v8261_v40, %v8259_v53 }
  0xef   : > { %v1878_v27 = vsub.f32 %v8261_v40, %v10355_v44  ;;  %v6449_v19 = vpack.c.bf16 %v1949_v52, %v1942_v36  ;;  %v8458_v32 = vsub.f32 %v8263_v41, %v10353_v58  ;;  %v1884_v38 = vand.u32 4294901760, %v8286_v4 }
  0xf0   : > { %6444 = vmatpush3.bf16.msra.mxu1 %v8342_v6  ;;  %v8463_v6 = vsub.f32 %v8267_v46, %v10354_v42  ;;  %v10544_v10 = vpack.c.bf16 %v8267_v46, %v8263_v41  ;;  %v6451_v49 = vpack.c.bf16 %v1837_v56, %v1830_v34  ;;  %v8473_v36 = vpack.c.bf16 %v1947_v33, %v1940_v30  ;;  %v10545_v34 = vld [vmem:[#allocation13_spill] sm:$0xff] }
  0xf1   : > { %6496 = vmatpush3.bf16.msra.mxu0 %v10543_v51  ;;  %6446 = vmatprep.subr.bf16.mxu1 %v6445_v35  ;;  %v1872_v52 = vand.u32 4294901760, %v1871_v12  ;;  %v1879_v35 = vand.u32 4294901760, %v1878_v27  ;;  %v6453_v11 = vpack.c.bf16 %v1963_v47, %v1956_v22  ;;  %v6455_v51 = vpack.c.bf16 %v1851_v26, %v1844_v14  ;;  %v10547_v47 = vld [vmem:[#allocation21_spill] sm:$0xff] }
  0xf2   : > { %6498 = vmatprep.subr.bf16.mxu0 %v10544_v10  ;;  %v6457_v58 = vpack.c.bf16 %v1977_v8, %v1970_v18  ;;  %v8475_v42 = vpack.c.bf16 %v1865_v2, %v1858_v16  ;;  %v8477_v44 = vpack.c.bf16 %v1991_v55, %v1984_v29  ;;  %v1998_v17 = vand.u32 4294901760, %v8458_v32 }
  0xf3   : > { %v1891_v56 = vand.u32 4294901760, %v8293_v62  ;;  %v242_v48 = vadd.s32 512, %v10545_v34  ;;  %v10546_v54 = vpack.c.bf16 %v8293_v62, %v8286_v4  ;;  %v2005_v33 = vand.u32 4294901760, %v8463_v6 }
  0xf4   : > { %6448 = vmatpush3.bf16.msra.mxu1 %v6447_v9  ;;  %v8489_v30 = vsub.f32 %v8286_v4, %v1884_v38  ;;  %v243_v22 = vadd.s32 520, %v10545_v34  ;;  %v244_v16 = vadd.s32 528, %v10545_v34  ;;  %v8494_v8 = vpack.c.bf16 %v1879_v35, %v1872_v52  ;;  %v10573_v4 = vld [vmem:[#allocation23_spill] sm:$0xff] }
  0xf5   : > { %6500 = vmatpush3.bf16.msra.mxu0 %v10546_v54  ;;  %6450 = vmatprep.subr.bf16.mxu1 %v6449_v19  ;;  %vm327_vm5 = vcmp.eq.s32.totalorder %v242_v48, %v10547_v47  ;;  %v245_v14 = vadd.s32 536, %v10545_v34  ;;  %v246_v19 = vadd.s32 544, %v10545_v34  ;;  %v10548_v27 = vmov 0.0  }
  0xf6   : > { %6534 = vmatprep.subr.bf16.mxu0 %v8323_v31  ;;  %vm328_vm6 = vcmp.eq.s32.totalorder %v243_v22, %v10547_v47  ;;  %v407_v26 = vsel %vm327_vm5, 1.0, %v10548_v27  ;;  %vm329_vm7 = vcmp.eq.s32.totalorder %v244_v16, %v10547_v47  ;;  %v247_v18 = vadd.s32 552, %v10545_v34 }
  0xf7   : > { %v8507_v31 = vsub.f32 %v8293_v62, %v1891_v56  ;;  %v408_v2 = vsel %vm328_vm6, 1.0, %v10548_v27  ;;  %488 = vst.msk [vmem:[#allocation2 + $0x200] sm:$0xff] %vm10373_vm0, %v407_v26  ;;  %vm330_vm8 = vcmp.eq.s32.totalorder %v245_v14, %v10547_v47  ;;  %v409_v12 = vsel %vm329_vm7, 1.0, %v10548_v27 }
  0xf8   : > { %2148 = vmatmul.mubr.f32.vlgmr.msra.gmra.mrb[6].mxu0 %v8192_v45  ;;  %6452 = vmatpush3.bf16.msra.mxu1 %v6451_v49  ;;  %489 = vst.msk [vmem:[#allocation2 + $0x208] sm:$0xff] %vm10373_vm0, %v408_v2  ;;  %v410_v9 = vsel %vm330_vm8, 1.0, %v10548_v27  ;;  %490 = vst.msk [vmem:[#allocation2 + $0x210] sm:$0xff] %vm10373_vm0, %v409_v12  ;;  %vm331_vm9 = vcmp.eq.s32.totalorder %v246_v19, %v10547_v47  ;;  %vm332_vm10 = vcmp.eq.s32.totalorder %v247_v18, %v10547_v47  ;;  %v10365_v62 = vmov 0.0|0.0  }
  0xf9   : > { %6536 = vmatpush3.bf16.msra.mxu0 %v8327_v59  ;;  %6454 = vmatprep.subr.bf16.mxu1 %v6453_v11  ;;  %v248_v29 = vadd.s32 560, %v10545_v34  ;;  %491 = vst.msk [vmem:[#allocation2 + $0x218] sm:$0xff] %vm10373_vm0, %v410_v9  ;;  %v411_v59 = vsel %vm331_vm9, 1.0, %v10548_v27  ;;  %v412_v55 = vsel %vm332_vm10, 1.0, %v10548_v27  ;;  %v249_v10 = vadd.s32 568, %v10545_v34 }
  0xfa   : > { %6538 = vmatprep.subr.bf16.mxu0 %v8335_v5  ;;  %2422 = vmatprep.mubr.f32.mxu0 %v10540_v63  ;;  %v250_v49 = vadd.s32 576, %v10545_v34  ;;  %492 = vst.msk [vmem:[#allocation2 + $0x220] sm:$0xff] %vm10373_vm0, %v411_v59  ;;  %493 = vst.msk [vmem:[#allocation2 + $0x228] sm:$0xff] %vm10373_vm0, %v412_v55  ;;  %v251_v5 = vadd.s32 584, %v10545_v34  ;;  %v252_v52 = vadd.s32 592, %v10545_v34  ;;  %v253_v35 = vadd.s32 600, %v10545_v34 }
  0xfb   : > { %vm333_vm11 = vcmp.eq.s32.totalorder %v248_v29, %v10547_v47  ;;  %vm334_vm12 = vcmp.eq.s32.totalorder %v249_v10, %v10547_v47  ;;  %v254_v48 = vadd.s32 608, %v10545_v34  ;;  %v257_v14 = vadd.s32 632, %v10545_v34  ;;  %v10562_v10 = vld [vmem:[#allocation39_spill] sm:$0xff] }
  0xfc   : > { %6456 = vmatpush3.bf16.msra.mxu1 %v6455_v51  ;;  %v413_v11 = vsel %vm333_vm11, 1.0, %v10548_v27  ;;  %vm335_vm13 = vcmp.eq.s32.totalorder %v250_v49, %v10547_v47  ;;  %v414_v54 = vsel %vm334_vm12, 1.0, %v10548_v27  ;;  %vm336_vm14 = vcmp.eq.s32.totalorder %v251_v5, %v10547_v47  ;;  %v10567_v5 = vld [vmem:[#allocation35_spill] sm:$0xff] }
  0xfd   : > { %6540 = vmatpush3.bf16.msra.mxu0 %v8339_v15  ;;  %6458 = vmatprep.subr.bf16.mxu1 %v6457_v58  ;;  %494 = vst.msk [vmem:[#allocation2 + $0x230] sm:$0xff] %vm10373_vm0, %v413_v11  ;;  %v415_v22 = vsel %vm335_vm13, 1.0, %v10548_v27  ;;  %vm337_vm15 = vcmp.eq.s32.totalorder %v252_v52, %v10547_v47  ;;  %495 = vst.msk [vmem:[#allocation2 + $0x238] sm:$0xff] %vm10373_vm0, %v414_v54  ;;  %v416_v51 = vsel %vm336_vm14, 1.0, %v10548_v27  ;;  %v255_v58 = vadd.s32 616, %v10545_v34  ;;  %v10571_v54 = vld [vmem:[#allocation37_spill] sm:$0xff] }
  0xfe   : > { %6542 = vmatprep.subr.bf16.mxu0 %v8353_v57  ;;  %496 = vst.msk [vmem:[#allocation2 + $0x240] sm:$0xff] %vm10373_vm0, %v415_v22  ;;  %vm338_vm1 = vcmp.eq.s32.totalorder %v253_v35, %v10547_v47  ;;  %v417_v15 = vsel %vm337_vm15, 1.0, %v10548_v27  ;;  %497 = vst.msk [vmem:[#allocation2 + $0x248] sm:$0xff] %vm10373_vm0, %v416_v51  ;;  %vm339_vm2 = vcmp.eq.s32.totalorder %v254_v48, %v10547_v47  ;;  %v256_v57 = vadd.s32 624, %v10545_v34  ;;  %v793_v35 = vld [vmem:[#allocation2 + $0x200] sm:$0xff]  ;;  %v10570_v48 = vld [vmem:[#allocation36_spill] sm:$0xff] }
  0xff   : > { %v418_v16 = vsel %vm338_vm1, 1.0, %v10548_v27  ;;  %498 = vst.msk [vmem:[#allocation2 + $0x250] sm:$0xff] %vm10373_vm0, %v417_v15  ;;  %v1886_v19 = vand.u32 4294901760, %v8489_v30  ;;  %v1893_v26 = vand.u32 4294901760, %v8507_v31  ;;  %vm340_vm3 = vcmp.eq.s32.totalorder %v255_v58, %v10547_v47  ;;  %v794_v11 = vld [vmem:[#allocation2 + $0x208] sm:$0xff]  ;;  %v795_v22 = vld [vmem:[#allocation2 + $0x210] sm:$0xff] }
 0x100   : > { %6460 = vmatpush3.bf16.msra.mxu1 %v8475_v42  ;;  %499 = vst.msk [vmem:[#allocation2 + $0x258] sm:$0xff] %vm10373_vm0, %v418_v16  ;;  %v419_v18 = vsel %vm339_vm2, 1.0, %v10548_v27  ;;  %v10549_v2 = vand.u32 4294901760, %v8185_v61  ;;  %v10550_v12 = vand.u32 4294901760, %v8197_v1  ;;  %v6465_v42 = vpack.c.bf16 %v2005_v33, %v1998_v17  ;;  %v10572_v15 = vld [vmem:[#allocation38_spill] sm:$0xff] }
 0x101   : > { %6544 = vmatpush3.bf16.msra.mxu0 %v8383_v50  ;;  %6462 = vmatprep.subr.bf16.mxu1 %v8477_v44  ;;  %v420_v30 = vsel %vm340_vm3, 1.0, %v10548_v27  ;;  %500 = vst.msk [vmem:[#allocation2 + $0x260] sm:$0xff] %vm10373_vm0, %v419_v18  ;;  %vm341_vm4 = vcmp.eq.s32.totalorder %v256_v57, %v10547_v47  ;;  %v10551_v61 = vand.u32 4294901760, %v8202_v23  ;;  %v10552_v1 = vand.u32 4294901760, %v8207_v25  ;;  %v797_v51 = vld [vmem:[#allocation2 + $0x220] sm:$0xff] }
 0x102   : > { %v6547_v9 = vpack.c.bf16 %v10550_v12, %v10549_v2  ;;  %6546 = vmatprep.subr.bf16.mxu0 %v8473_v36  ;;  %501 = vst.msk [vmem:[#allocation2 + $0x268] sm:$0xff] %vm10373_vm0, %v420_v30  ;;  %vm342_vm5 = vcmp.eq.s32.totalorder %v257_v14, %v10547_v47  ;;  %v421_v32 = vsel %vm341_vm4, 1.0, %v10548_v27  ;;  %v6467_v17 = vpack.c.bf16 %v1893_v26, %v1886_v19  ;;  %v10574_v30 = vld [vmem:[#allocation24_spill] sm:$0xff] }
 0x103   : > { %v6549_v50 = vpack.c.bf16 %v10552_v1, %v10551_v61  ;;  %502 = vst.msk [vmem:[#allocation2 + $0x270] sm:$0xff] %vm10373_vm0, %v421_v32  ;;  %v422_v44 = vsel %vm342_vm5, 1.0, %v10548_v27  ;;  %v10553_v6 = vand.u32 4294901760, %v8214_v37  ;;  %v10554_v23 = vand.u32 4294901760, %v8223_v0  ;;  %v10559_v37 = vld [vmem:[#allocation33_spill] sm:$0xff] }
 0x104   : > { %6464 = vmatpush3.bf16.msra.mxu1 %v8494_v8  ;;  %503 = vst.msk [vmem:[#allocation2 + $0x278] sm:$0xff] %vm10373_vm0, %v422_v44  ;;  %v10555_v36 = vand.u32 4294901760, %v8229_v7  ;;  %v10556_v33 = vand.u32 4294901760, %v8231_v13  ;;  %v10557_v8 = vand.u32 4294901760, %v8233_v3  ;;  %v10558_v31 = vand.u32 4294901760, %v8238_v43  ;;  %v10563_v7 = vld [vmem:[#allocation34_spill] sm:$0xff] }
 0x105   : > { %6548 = vmatpush3.bf16.msra.mxu0 %v6547_v9  ;;  %v6551_v25 = vpack.c.bf16 %v10554_v23, %v10553_v6  ;;  %6466 = vmatprep.subr.bf16.mxu1 %v6465_v42  ;;  %v10560_v0 = vand.u32 4294901760, %v8246_v21  ;;  %v10561_v59 = vand.u32 4294901760, %v8252_v39  ;;  %v10564_v13 = vand.u32 4294901760, %v8168_v20  ;;  %v799_v14 = vld [vmem:[#allocation2 + $0x230] sm:$0xff]  ;;  %v800_v19 = vld [vmem:[#allocation2 + $0x238] sm:$0xff]  ;;  %v10575_v32 = vld [vmem:[#allocation25_spill] sm:$0xff] }
 0x106   : > { %6550 = vmatprep.subr.bf16.mxu0 %v6549_v50  ;;  %v6553_v47 = vpack.c.bf16 %v10556_v33, %v10555_v36  ;;  %v6555_v29 = vpack.c.bf16 %v10558_v31, %v10557_v8  ;;  %v10565_v3 = vand.u32 4294901760, %v8259_v53  ;;  %v10566_v43 = vand.u32 4294901760, %v8261_v40  ;;  %v801_v6 = vld [vmem:[#allocation2 + $0x240] sm:$0xff]  ;;  %v802_v23 = vld [vmem:[#allocation2 + $0x248] sm:$0xff]  ;;  %v10576_v33 = vld [vmem:[#allocation27_spill] sm:$0xff] }
 0x107   : > { %v6557_v55 = vpack.c.bf16 %v10561_v59, %v10560_v0  ;;  %v10568_v21 = vand.u32 4294901760, %v8263_v41  ;;  %v10569_v39 = vand.u32 4294901760, %v8267_v46  ;;  %v6563_v20 = vpack.c.bf16 %v1891_v56, %v1884_v38  ;;  %v796_v41 = vld [vmem:[#allocation2 + $0x218] sm:$0xff]  ;;  %v798_v46 = vld [vmem:[#allocation2 + $0x228] sm:$0xff] }
 0x108   : > { %6468 = vmatpush3.bf16.msra.mxu1 %v6467_v17  ;;  %v6559_v49 = vpack.c.bf16 %v10566_v43, %v10565_v3  ;;  %v2534_v53 = vand.u32 4294901760, %v793_v35  ;;  %v2537_v40 = vand.u32 4294901760, %v794_v11  ;;  %v2540_v16 = vand.u32 4294901760, %v795_v22  ;;  %v10577_v59 = vld [vmem:[#allocation40_spill] sm:$0xff] }
 0x109   : > { %6552 = vmatpush3.bf16.msra.mxu0 %v6551_v25  ;;  %6502 = vmatprep.subr.bf16.mxu1 %v10559_v37  ;;  %v6561_v52 = vpack.c.bf16 %v10569_v39, %v10568_v21  ;;  %v2543_v57 = vand.u32 4294901760, %v796_v41  ;;  %v2546_v38 = vand.u32 4294901760, %v797_v51  ;;  %v2549_v56 = vand.u32 4294901760, %v798_v46 }
 0x10a   : > { %6554 = vmatprep.subr.bf16.mxu0 %v6553_v47  ;;  %v8624_v58 = vpack.c.bf16 %v2537_v40, %v2534_v53  ;;  %v8628_v26 = vsub.f32 %v793_v35, %v2534_v53  ;;  %v8630_v18 = vsub.f32 %v794_v11, %v2537_v40  ;;  %v8632_v2 = vsub.f32 %v795_v22, %v2540_v16  ;;  %v803_v35 = vld [vmem:[#allocation2 + $0x250] sm:$0xff]  ;;  %v804_v11 = vld [vmem:[#allocation2 + $0x258] sm:$0xff] }
 0x10b   : > { %2010 = vmatmul.mubr.f32.vlgmr.msra.gmra.mrb[8].mxu1 %v10562_v10  ;;  %v8635_v12 = vsub.f32 %v796_v41, %v2543_v57  ;;  %v8637_v9 = vsub.f32 %v797_v51, %v2546_v38  ;;  %v8639_v42 = vsub.f32 %v798_v46, %v2549_v56  ;;  %v8643_v61 = vpack.c.bf16 %v2543_v57, %v2540_v16  ;;  %v805_v16 = vld [vmem:[#allocation2 + $0x260] sm:$0xff]  ;;  %v806_v57 = vld [vmem:[#allocation2 + $0x268] sm:$0xff] }
 0x10c   : > { %6504 = vmatpush3.bf16.msra.mxu1 %v10563_v7  ;;  %2252 = vmatprep.mubr.f32.mxu1 %v10564_v13  ;;  %v2552_v1 = vand.u32 4294901760, %v799_v14  ;;  %v2555_v50 = vand.u32 4294901760, %v800_v19  ;;  %vm10374_vm6 = vmmov 0   ;;  %v2627_v25 = vand.u32 4294901760, %v8628_v26 }
 0x10d   : > { %6556 = vmatpush3.bf16.msra.mxu0 %v6555_v29  ;;  %6506 = vmatprep.subr.bf16.mxu1 %v10567_v5  ;;  %v2634_v36 = vand.u32 4294901760, %v8630_v18  ;;  %v10364_v47 = vand.u32 4294901760, %v8632_v2  ;;  %v10363_v8 = vand.u32 4294901760, %v8635_v12  ;;  %v10360_v31 = vand.u32 4294901760, %v8637_v9 }
 0x10e   : > { %6558 = vmatprep.subr.bf16.mxu0 %v6557_v55  ;;  %v8649_v17 = vsub.f32 %v799_v14, %v2552_v1  ;;  %v8651_v44 = vsub.f32 %v800_v19, %v2555_v50  ;;  %v10359_v29 = vand.u32 4294901760, %v8639_v42  ;;  %v8661_v0 = vpack.c.bf16 %v2549_v56, %v2546_v38 }
 0x10f   : > { %v8666_v55 = vpack.c.bf16 %v2634_v36, %v2627_v25  ;;  %v2558_v13 = vand.u32 4294901760, %v801_v6  ;;  %v2561_v3 = vand.u32 4294901760, %v802_v23  ;;  %v8673_v43 = vpack.c.bf16 %v10363_v8, %v10364_v47 }
 0x110   : > { %6508 = vmatpush3.bf16.msra.mxu1 %v10570_v48  ;;  %v10358_v53 = vand.u32 4294901760, %v8649_v17  ;;  %v10357_v40 = vand.u32 4294901760, %v8651_v44  ;;  %v8690_v22 = vpack.c.bf16 %v2555_v50, %v2552_v1  ;;  %v2564_v51 = vand.u32 4294901760, %v803_v35 }
 0x111   : > { %6560 = vmatpush3.bf16.msra.mxu0 %v6559_v49  ;;  %6510 = vmatprep.subr.bf16.mxu1 %v10571_v54  ;;  %v8679_v49 = vpack.c.bf16 %v10359_v29, %v10360_v31  ;;  %v8681_v21 = vsub.f32 %v801_v6, %v2558_v13  ;;  %v8683_v39 = vsub.f32 %v802_v23, %v2561_v3  ;;  %v2567_v46 = vand.u32 4294901760, %v804_v11  ;;  %v808_v29 = vld [vmem:[#allocation2 + $0x278] sm:$0xff] }
 0x112   : > { %6562 = vmatprep.subr.bf16.mxu0 %v6561_v52  ;;  %v10578_v52 = vld [vmem:[#allocation41_spill] sm:$0xff]  ;;  %v8698_v41 = vpack.c.bf16 %v10357_v40, %v10358_v53  ;;  %v8706_v19 = vpack.c.bf16 %v2561_v3, %v2558_v13  ;;  %v8708_v1 = vsub.f32 %v803_v35, %v2564_v51  ;;  %v2570_v6 = vand.u32 4294901760, %v805_v16  ;;  %v807_v53 = vld [vmem:[#allocation2 + $0x270] sm:$0xff] }
 0x113   : > { %v10362_v56 = vand.u32 4294901760, %v8681_v21  ;;  %v10361_v14 = vand.u32 4294901760, %v8683_v39  ;;  %v8710_v50 = vsub.f32 %v804_v11, %v2567_v46  ;;  %v2573_v23 = vand.u32 4294901760, %v806_v57  ;;  %v10579_v11 = vld [vmem:[#allocation42_spill] sm:$0xff] }
 0x114   : > { %6512 = vmatpush3.bf16.msra.mxu1 %v10572_v15  ;;  %v8723_v3 = vsub.f32 %v805_v16, %v2570_v6  ;;  %v8729_v31 = vpack.c.bf16 %v2567_v46, %v2564_v51  ;;  %v2579_v8 = vand.u32 4294901760, %v808_v29  ;;  %v10580_v16 = vand.u32 4294901760, %v8192_v45 }
 0x115   : > { %6564 = vmatpush3.bf16.msra.mxu0 %v6563_v20  ;;  %6514 = vmatprep.subr.bf16.mxu1 %v10573_v4  ;;  %v728_v20 = vld [vmem:[%s7395_s9 + $0x20] sm:$0xff]  ;;  %v8718_v40 = vpack.c.bf16 %v10361_v14, %v10362_v56  ;;  %v8725_v35 = vsub.f32 %v806_v57, %v2573_v23  ;;  %v10371_v14 = vand.u32 4294901760, %v8708_v1  ;;  %v10367_v56 = vand.u32 4294901760, %v8710_v50 }
 0x116   : > { %6597 = vmatprep.subr.bf16.mxu0 %v10365_v62  ;;  %v8700_v38 = vand.u32 4294901760, %v728_v20  ;;  %v2628_v47 = vsub.f32 %v8628_v26, %v2627_v25  ;;  %v8747_v46 = vsub.f32 %v808_v29, %v2579_v8  ;;  %v8754_v25 = vpack.c.bf16 %v2573_v23, %v2570_v6 }
 0x117   : > { %v10368_v45 = vand.u32 4294901760, %v8725_v35  ;;  %v10581_v29 = vmov 0.0|0.0  }
 0x118   : > { %2424 = vmatmul.mubr.f32.vlgmr.msra.gmra.mrb[8].mxu0 %v10562_v10  ;;  %6516 = vmatpush3.bf16.msra.mxu1 %v10574_v30  ;;  %v8721_v13 = vsub.f32 %v728_v20, %v8700_v38  ;;  %v2576_v20 = vand.u32 4294901760, %v807_v53 }
 0x119   : > { %6599 = vmatpush3.bf16.msra.mxu0 %v8624_v58  ;;  %6518 = vmatprep.subr.bf16.mxu1 %v10575_v32 }
 0x11a   : > { %6600 = vmatprep.subr.bf16.mxu0 %v10365_v62  ;;  %5921 = vmatprep.mubr.msk.f32.mxu0 %vm10374_vm6, %v10548_v27  ;;  %v10370_v57 = vand.u32 4294901760, %v8721_v13  ;;  %v8745_v51 = vsub.f32 %v807_v53, %v2576_v20  ;;  %v2629_v53 = vand.u32 4294901760, %v2628_v47 }
 0x11c   : > { %6520 = vmatpush3.bf16.msra.mxu1 %v10576_v33  ;;  %v2725_v6 = vand.u32 4294901760, %v8745_v51 }
 0x11d   : > { %6602 = vmatpush3.bf16.msra.mxu0 %v8643_v61  ;;  %6522 = vmatprep.subr.bf16.mxu1 %v10577_v59 }
 0x11e   : > { %6603 = vmatprep.subr.bf16.mxu0 %v10365_v62 }
 0x120   : > { %6524 = vmatpush3.bf16.msra.mxu1 %v10578_v52 }
 0x121   : > { %6605 = vmatpush3.bf16.msra.mxu0 %v8661_v0  ;;  %6526 = vmatprep.subr.bf16.mxu1 %v8216_v60 }
 0x122   : > { %6606 = vmatprep.subr.bf16.mxu0 %v10365_v62 }
 0x124   : > { %6528 = vmatpush3.bf16.msra.mxu1 %v8236_v28 }
 0x125   : > { %6608 = vmatpush3.bf16.msra.mxu0 %v8690_v22  ;;  %6530 = vmatprep.subr.bf16.mxu1 %v8240_v24 }
 0x126   : > { %6609 = vmatprep.subr.bf16.mxu0 %v10365_v62 }
 0x128   : > { %6532 = vmatpush3.bf16.msra.mxu1 %v10579_v11 }
 0x129   : > { %6611 = vmatpush3.bf16.msra.mxu0 %v8706_v19  ;;  %6566 = vmatprep.subr.bf16.mxu1 %v10559_v37  ;;  %v8743_v37 = vpack.c.bf16 %v10367_v56, %v10371_v14  ;;  %v10582_v56 = vand.u32 4294901760, %v8632_v2 }
 0x12a   : > { %6612 = vmatprep.subr.bf16.mxu0 %v10365_v62  ;;  %v10369_v62 = vand.u32 4294901760, %v8723_v3 }
 0x12b   : > { %2256 = vmatmul.mubr.f32.vlgmr.msra.gmra.mrb[10].mxu1 %v10580_v16  ;;  %v2635_v16 = vsub.f32 %v8630_v18, %v2634_v36  ;;  %v10372_v36 = vand.u32 4294901760, %v8747_v46 }
 0x12c   : > { %6568 = vmatpush3.bf16.msra.mxu1 %v10563_v7  ;;  %2526 = vmatprep.mubr.f32.mxu1 %v10540_v63  ;;  %v8765_v7 = vpack.c.bf16 %v10368_v45, %v10369_v62  ;;  %v2617_v63 = vsub.f32 %v8721_v13, %v10370_v57  ;;  %v2642_v45 = vsub.f32 %v8632_v2, %v10582_v56  ;;  %v10583_v62 = vand.u32 4294901760, %v8635_v12 }
 0x12d   : > { %6614 = vmatpush3.bf16.msra.mxu0 %v8729_v31  ;;  %6570 = vmatprep.subr.bf16.mxu1 %v10567_v5  ;;  %v8774_v5 = vpack.c.bf16 %v2579_v8, %v2576_v20  ;;  %v2636_v23 = vand.u32 4294901760, %v2635_v16  ;;  %v10584_v8 = vand.u32 4294901760, %v8637_v9 }
 0x12e   : > { %6615 = vmatprep.subr.bf16.mxu0 %v10581_v29  ;;  %v2649_v57 = vsub.f32 %v8635_v12, %v10583_v62  ;;  %v2618_v47 = vand.u32 4294901760, %v2617_v63  ;;  %v2643_v16 = vand.u32 4294901760, %v2642_v45 }
 0x12f   : > { %v2656_v20 = vsub.f32 %v8637_v9, %v10584_v8  ;;  %v6622_v56 = vpack.c.bf16 %v2636_v23, %v2629_v53 }
 0x130   : > { %6572 = vmatpush3.bf16.msra.mxu1 %v10570_v48  ;;  %v8786_v48 = vpack.c.bf16 %v10372_v36, %v2725_v6  ;;  %v2650_v62 = vand.u32 4294901760, %v2649_v57  ;;  %v10586_v36 = vand.u32 4294901760, %v8649_v17  ;;  %v10587_v57 = vand.u32 4294901760, %v8651_v44 }
 0x131   : > { %6617 = vmatpush3.bf16.msra.mxu0 %v8754_v25  ;;  %6574 = vmatprep.subr.bf16.mxu1 %v10571_v54  ;;  %v10585_v54 = vand.u32 4294901760, %v8639_v42  ;;  %v2657_v63 = vand.u32 4294901760, %v2656_v20 }
 0x132   : > { %6618 = vmatprep.subr.bf16.mxu0 %v10581_v29  ;;  %v2670_v45 = vsub.f32 %v8649_v17, %v10586_v36  ;;  %v2677_v53 = vsub.f32 %v8651_v44, %v10587_v57  ;;  %v10593_v57 = vand.u32 4294901760, %v8725_v35 }
 0x133   : > { %v2663_v14 = vsub.f32 %v8639_v42, %v10585_v54  ;;  %v10591_v54 = vand.u32 4294901760, %v8710_v50 }
 0x134   : > { %6576 = vmatpush3.bf16.msra.mxu1 %v10572_v15  ;;  %v6625_v15 = vpack.c.bf16 %v2650_v62, %v2643_v16  ;;  %v2671_v36 = vand.u32 4294901760, %v2670_v45  ;;  %v2678_v23 = vand.u32 4294901760, %v2677_v53  ;;  %v2719_v53 = vsub.f32 %v8725_v35, %v10593_v57 }
 0x135   : > { %6620 = vmatpush3.bf16.msra.mxu0 %v8774_v5  ;;  %6578 = vmatprep.subr.bf16.mxu1 %v10573_v4  ;;  %v2664_v8 = vand.u32 4294901760, %v2663_v14  ;;  %v10588_v4 = vand.u32 4294901760, %v8681_v21  ;;  %v10606_v57 = vmov 0 }
 0x136   : > { %6621 = vmatprep.subr.bf16.mxu0 %v10581_v29 }
 0x137   : > { %v6628_v14 = vpack.c.bf16 %v2664_v8, %v2657_v63  ;;  %v2705_v63 = vsub.f32 %v8710_v50, %v10591_v54  ;;  %v10592_v8 = vand.u32 4294901760, %v8723_v3 }
 0x138   : > { %5922 = vmatmul.mubr.f32.vlgmr.msra.gmra.mrb[10].mxu0 %v2618_v47  ;;  %6580 = vmatpush3.bf16.msra.mxu1 %v10574_v30  ;;  %v2684_v30 = vsub.f32 %v8681_v21, %v10588_v4  ;;  %v10589_v47 = vand.u32 4294901760, %v8683_v39 }
 0x139   : > { %6623 = vmatpush3.bf16.msra.mxu0 %v6622_v56  ;;  %6582 = vmatprep.subr.bf16.mxu1 %v10575_v32  ;;  %v10590_v32 = vand.u32 4294901760, %v8708_v1  ;;  %v6631_v56 = vpack.c.bf16 %v2678_v23, %v2671_v36  ;;  %v2712_v45 = vsub.f32 %v8723_v3, %v10592_v8 }
 0x13a   : > { %6624 = vmatprep.subr.bf16.mxu0 %v10581_v29  ;;  %5956 = vmatprep.mubr.msk.f32.mxu0 %vm10374_vm6, %v10548_v27  ;;  %v2691_v20 = vsub.f32 %v8683_v39, %v10589_v47  ;;  %v2685_v16 = vand.u32 4294901760, %v2684_v30  ;;  %v2720_v30 = vand.u32 4294901760, %v2719_v53  ;;  %v6646_v47 = vpack.c.bf16 %v8630_v18, %v8628_v26 }
 0x13b   : > { %v2713_v4 = vand.u32 4294901760, %v2712_v45 }
 0x13c   : > { %6584 = vmatpush3.bf16.msra.mxu1 %v10576_v33  ;;  %v2698_v33 = vsub.f32 %v8708_v1, %v10590_v32  ;;  %v2692_v62 = vand.u32 4294901760, %v2691_v20  ;;  %v6652_v20 = vpack.c.bf16 %v8639_v42, %v8637_v9  ;;  %v6661_v9 = vpack.c.bf16 %v8710_v50, %v8708_v1 }
 0x13d   : > { %6626 = vmatpush3.bf16.msra.mxu0 %v6625_v15  ;;  %6586 = vmatprep.subr.bf16.mxu1 %v10577_v59  ;;  %v2706_v15 = vand.u32 4294901760, %v2705_v63  ;;  %v6664_v42 = vpack.c.bf16 %v8725_v35, %v8723_v3 }
 0x13e   : > { %6627 = vmatprep.subr.bf16.mxu0 %v10581_v29  ;;  %v2699_v59 = vand.u32 4294901760, %v2698_v33 }
 0x140   : > { %6588 = vmatpush3.bf16.msra.mxu1 %v10578_v52  ;;  %v6634_v52 = vpack.c.bf16 %v2692_v62, %v2685_v16  ;;  %v6658_v16 = vpack.c.bf16 %v8683_v39, %v8681_v21 }
 0x141   : > { %6629 = vmatpush3.bf16.msra.mxu0 %v6628_v14  ;;  %6590 = vmatprep.subr.bf16.mxu1 %v8216_v60  ;;  %v2726_v60 = vsub.f32 %v8745_v51, %v2725_v6  ;;  %v10594_v14 = vand.u32 4294901760, %v8747_v46 }
 0x142   : > { %6630 = vmatprep.subr.bf16.mxu0 %v10581_v29 }
 0x143   : > { %v2733_v36 = vsub.f32 %v8747_v46, %v10594_v14  ;;  %v2727_v23 = vand.u32 4294901760, %v2726_v60  ;;  %v10396_v60 = vmov 1.0|1.0   ;;  %v10613_v14 = vmov 0 }
 0x144   : > { %6592 = vmatpush3.bf16.msra.mxu1 %v8236_v28  ;;  %v6637_v28 = vpack.c.bf16 %v2706_v15, %v2699_v59  ;;  %v8902_v59 = vmul.u32 10, %v10545_v34  ;;  %v10599_v15 = vld [vmem:[#allocation14_spill] sm:$0xff] }
 0x145   : > { %6632 = vmatpush3.bf16.msra.mxu0 %v6631_v56  ;;  %6594 = vmatprep.subr.bf16.mxu1 %v8240_v24  ;;  %v6640_v24 = vpack.c.bf16 %v2720_v30, %v2713_v4  ;;  %v6655_v56 = vpack.c.bf16 %v8651_v44, %v8649_v17  ;;  %v6667_v17 = vpack.c.bf16 %v8747_v46, %v8745_v51  ;;  %v10595_v46 = vand.u32 4294901760, %v8721_v13 }
 0x146   : > { %6633 = vmatprep.subr.bf16.mxu0 %v10581_v29  ;;  %10596 = vst [vmem:[#allocation29_spill] sm:$0xff] %v8902_v59  ;;  %v8910_v8 = vadd.s32 128, %v10599_v15  ;;  %v8915_v45 = vadd.s32 10, %v8902_v59  ;;  %vm516_vm12 = vcmp.ge.s32.totalorder %v10599_v15, %v8902_v59 }
 0x148   : > { %6596 = vmatpush3.bf16.msra.mxu1 %v10579_v11  ;;  %v2734_v11 = vand.u32 4294901760, %v2733_v36  ;;  %10600 = vst [vmem:[#allocation31_spill] sm:$0xff] %v8915_v45  ;;  %vm517_vm7 = vcmp.ge.s32.totalorder %v8910_v8, %v8902_v59  ;;  %vm565_vm8 = vcmp.lt.s32.totalorder %v8910_v8, %v8915_v45  ;;  %vm564_vm13 = vcmp.lt.s32.totalorder %v10599_v15, %v8915_v45  ;;  %v10616_v36 = vld [vmem:[#allocation16_spill] sm:$0xff] }
 0x149   : > { %6635 = vmatpush3.bf16.msra.mxu0 %v6634_v52  ;;  %vm8931_vm11 = vmand %vm517_vm7, %vm565_vm8 }
 0x14a   : > { %6636 = vmatprep.subr.bf16.mxu0 %v10581_v29  ;;  %v6643_v6 = vpack.c.bf16 %v2734_v11, %v2727_v23  ;;  %vm8959_vm3 = vmand %vm516_vm12, %vm564_vm13  ;;  %v10618_v23 = vld [vmem:[#allocation17_spill] sm:$0xff] }
 0x14b   : > { %2528 = vmatmul.mubr.f32.vlgmr.msra.gmra.mrb[12].mxu1 %v10562_v10  ;;  %v6649_v10 = vpack.c.bf16 %v8635_v12, %v8632_v2  ;;  %v8992_v11 = vmul.u32 10, %v10618_v23 }
 0x14c   : > { %3298 = vmatprep.mubr.f32.mxu1 %v10548_v27 }
 0x14d   : > { %6638 = vmatpush3.bf16.msra.mxu0 %v6637_v28  ;;  %10619 = vst [vmem:[#allocation21_spill] sm:$0xff] %v8992_v11 }
 0x14e   : > { %6639 = vmatprep.subr.bf16.mxu0 %v10581_v29 }
 0x151   : > { %6641 = vmatpush3.bf16.msra.mxu0 %v6640_v24  ;;  %v8988_v24 = vmul.u32 10, %v10616_v36 }
 0x152   : > { %6642 = vmatprep.subr.bf16.mxu0 %v10581_v29 }
 0x153   : > { %10617 = vst [vmem:[#allocation13_spill] sm:$0xff] %v8988_v24 }
 0x155   : > { %6644 = vmatpush3.bf16.msra.mxu0 %v6643_v6  ;;  %v9013_v6 = vadd.s32 10, %v8992_v11 }
 0x156   : > { %6645 = vmatprep.subr.bf16.mxu0 %v10581_v29 }
 0x157   : > { %10623 = vst [vmem:[#allocation34_spill] sm:$0xff] %v9013_v6 }
 0x158   : > { %5957 = vmatmul.mubr.f32.vlgmr.msra.gmra.mrb[10].mxu0 %v8700_v38 }
 0x159   : > { %6647 = vmatpush3.bf16.msra.mxu0 %v6646_v47  ;;  %5991 = vmatprep.mubr.msk.f32.mxu0 %vm10374_vm6, %v10548_v27  ;;  %v10624_v47 = vld [vmem:[#allocation19_spill] sm:$0xff] }
 0x15a   : > { %6648 = vmatprep.subr.bf16.mxu0 %v10581_v29 }
 0x15b   : > { %v5345_v26 = vpop.f32.mrb[0].mxu1 }
 0x15c   : > { %v5346_v18 = vpop.f32.mrb[1].mxu1 }
 0x15d   : > { %6650 = vmatpush3.bf16.msra.mxu0 %v6649_v10  ;;  %v5415_v32 = vpop.f32.mrb[0].mxu0  ;;  %v5347_v33 = vadd.f32 %v5346_v18, %v5345_v26  ;;  %v9016_v10 = vmul.u32 10, %v10624_v47  ;;  %v10628_v18 = vmov 0 }
 0x15e   : > { %6651 = vmatprep.subr.bf16.mxu0 %v10581_v29  ;;  %v5416_v2 = vpop.f32.mrb[1].mxu0 }
 0x15f   : > { %v5417_v12 = vadd.f32 %v5416_v2, %v5415_v32  ;;  %10625 = vst [vmem:[#allocation35_spill] sm:$0xff] %v9016_v10  ;;  %v9043_v2 = vadd.s32 10, %v9016_v10 }
 0x161   : > { %6653 = vmatpush3.bf16.msra.mxu0 %v6652_v20  ;;  %v10626_v20 = vmov 0  ;;  %10631 = vst [vmem:[#allocation37_spill] sm:$0xff] %v9043_v2 }
 0x162   : > { %6654 = vmatprep.subr.bf16.mxu0 %v10581_v29 }
 0x165   : > { %6656 = vmatpush3.bf16.msra.mxu0 %v6655_v56 }
 0x166   : > { %6657 = vmatprep.subr.bf16.mxu0 %v10581_v29 }
 0x169   : > { %6659 = vmatpush3.bf16.msra.mxu0 %v6658_v16 }
 0x16a   : > { %6660 = vmatprep.subr.bf16.mxu0 %v10581_v29 }
 0x16d   : > { %6662 = vmatpush3.bf16.msra.mxu0 %v6661_v9  ;;  %v10632_v9 = vmov 0 }
 0x16e   : > { %6663 = vmatprep.subr.bf16.mxu0 %v10581_v29 }
 0x171   : > { %6665 = vmatpush3.bf16.msra.mxu0 %v6664_v42 }
 0x172   : > { %6666 = vmatprep.subr.bf16.mxu0 %v10581_v29 }
 0x175   : > { %6668 = vmatpush3.bf16.msra.mxu0 %v6667_v17  ;;  %v10635_v17 = vmov 0 }
 0x176   : > { %6669 = vmatprep.subr.bf16.mxu0 %v10581_v29 }
 0x178   : > { %5992 = vmatmul.mubr.f32.vlgmr.msra.gmra.mrb[10].mxu0 %v8721_v13  ;;  %v10597_v13 = vld [vmem:[#allocation15_spill] sm:$0xff] }
 0x179   : > { %6671 = vmatpush3.bf16.msra.mxu0 %v8624_v58  ;;  %6026 = vmatprep.mubr.msk.f32.mxu0 %vm10374_vm6, %v10548_v27  ;;  %v8906_v52 = vmul.u32 10, %v10597_v13 }
 0x17a   : > { %6672 = vmatprep.subr.bf16.mxu0 %v10581_v29 }
 0x17b   : > { %v5380_v44 = vpop.f32.mrb[2].mxu1  ;;  %10598 = vst [vmem:[#allocation30_spill] sm:$0xff] %v8906_v52  ;;  %v8919_v34 = vadd.s32 10, %v8906_v52  ;;  %vm522_vm9 = vcmp.ge.s32.totalorder %v8910_v8, %v8906_v52  ;;  %vm521_vm15 = vcmp.ge.s32.totalorder %v10599_v15, %v8906_v52 }
 0x17c   : > { %v5381_v21 = vpop.f32.mrb[3].mxu1 }
 0x17d   : > { %6674 = vmatpush3.bf16.msra.mxu0 %v8643_v61  ;;  %v5382_v39 = vadd.f32 %v5381_v21, %v5380_v44  ;;  %10601 = vst [vmem:[#allocation32_spill] sm:$0xff] %v8919_v34  ;;  %vm570_vm10 = vcmp.lt.s32.totalorder %v8910_v8, %v8919_v34  ;;  %vm569_vm1 = vcmp.lt.s32.totalorder %v10599_v15, %v8919_v34 }
 0x17e   : > { %6675 = vmatprep.subr.bf16.mxu0 %v10581_v29  ;;  %v5485_v1 = vpop.f32.mrb[2].mxu0  ;;  %vm8940_vm14 = vmand %vm522_vm9, %vm570_vm10 }
 0x17f   : > { %v5486_v50 = vpop.f32.mrb[3].mxu0  ;;  %v1150_v3 = vadd.f32 %v5382_v39, %v5347_v33  ;;  %vm8952_vm2 = vmpackc.low %vm8940_vm14, %vm8931_vm11 }
 0x180   : > { %v5487_v35 = vadd.f32 %v5486_v50, %v5485_v1  ;;  %v10607_v57 = vsel %vm8952_vm2, 4294967295, %v10606_v57  ;;  %6742 = vmatprep.subr.msk.bf16.mxu1 %vm8952_vm2, %v10396_v60  ;;  %vm8964_vm4 = vmand %vm521_vm15, %vm569_vm1  ;;  %v10638_v1 = vmov 0  ;;  %v10641_v50 = vmov 0 }
 0x181   : > { %6677 = vmatpush3.bf16.msra.mxu0 %v8661_v0  ;;  %v1288_v51 = vadd.f32 %v5417_v12, %v1150_v3  ;;  %10608 = vst [vmem:[#allocation26_spill] sm:$0xff] %v10607_v57  ;;  %vm8973_vm5 = vmpackc.low %vm8964_vm4, %vm8959_vm3 }
 0x182   : > { %6678 = vmatprep.subr.bf16.mxu0 %v10581_v29  ;;  %v10614_v14 = vsel %vm8973_vm5, 4294967295, %v10613_v14  ;;  %6744 = vmatpush1.bf16.msk.msra.mxu1 %vm8973_vm5, %v10396_v60 }
 0x183   : > { %10615 = vst [vmem:[#allocation28_spill] sm:$0xff] %v10614_v14 }
 0x185   : > { %6680 = vmatpush3.bf16.msra.mxu0 %v8690_v22 }
 0x186   : > { %6681 = vmatprep.subr.bf16.mxu0 %v10581_v29 }
 0x189   : > { %6683 = vmatpush3.bf16.msra.mxu0 %v8706_v19 }
 0x18a   : > { %6684 = vmatprep.subr.bf16.mxu0 %v10581_v29 }
 0x18d   : > { %6686 = vmatpush3.bf16.msra.mxu0 %v8729_v31 }
 0x18e   : > { %6687 = vmatprep.subr.bf16.mxu0 %v10581_v29 }
 0x191   : > { %6689 = vmatpush3.bf16.msra.mxu0 %v8754_v25 }
 0x192   : > { %6690 = vmatprep.subr.bf16.mxu0 %v10581_v29 }
 0x195   : > { %6692 = vmatpush3.bf16.msra.mxu0 %v8774_v5 }
 0x196   : > { %6693 = vmatprep.subr.bf16.mxu0 %v10581_v29 }
 0x198   : > { %6027 = vmatmul.mubr.f32.vlgmr.msra.gmra.mrb[10].mxu0 %v10595_v46 }
 0x199   : > { %6695 = vmatpush3.bf16.msra.mxu0 %v8666_v55  ;;  %6061 = vmatprep.mubr.msk.f32.mxu0 %vm10374_vm6, %v10548_v27 }
 0x19a   : > { %6696 = vmatprep.subr.bf16.mxu0 %v10581_v29 }
 0x19d   : > { %6698 = vmatpush3.bf16.msra.mxu0 %v8673_v43 }
 0x19e   : > { %6699 = vmatprep.subr.bf16.mxu0 %v10581_v29  ;;  %v5450_v62 = vpop.f32.mrb[4].mxu1 }
 0x19f   : > { %v5451_v54 = vpop.f32.mrb[5].mxu1 }
 0x1a0   : > { %v5452_v63 = vadd.f32 %v5451_v54, %v5450_v62 }
 0x1a1   : > { %6701 = vmatpush3.bf16.msra.mxu0 %v8679_v49 }
 0x1a2   : > { %6702 = vmatprep.subr.bf16.mxu0 %v10581_v29  ;;  %v1396_v55 = vadd.f32 %v5452_v63, %v1288_v51 }
 0x1a4   : > { %v8912_v43 = vadd.f32 %v5487_v35, %v1396_v55 }
 0x1a5   : > { %6704 = vmatpush3.bf16.msra.mxu0 %v8698_v41 }
 0x1a6   : > { %6705 = vmatprep.subr.bf16.mxu0 %v10581_v29 }
 0x1a9   : > { %6707 = vmatpush3.bf16.msra.mxu0 %v8718_v40 }
 0x1aa   : > { %6708 = vmatprep.subr.bf16.mxu0 %v10581_v29 }
 0x1ab   : > { %v5555_v40 = vpop.f32.mrb[4].mxu0 }
 0x1ac   : > { %v5556_v53 = vpop.f32.mrb[5].mxu0 }
 0x1ad   : > { %v5557_v4 = vadd.f32 %v5556_v53, %v5555_v40  ;;  %6710 = vmatpush3.bf16.msra.mxu0 %v8743_v37  ;;  %v8985_v37 = vadd.s32 512, %v10599_v15 }
 0x1ae   : > { %6711 = vmatprep.subr.bf16.mxu0 %v10581_v29 }
 0x1af   : > { %vm520_vm7 = vcmp.ge.s32.totalorder %v8985_v37, %v8902_v59  ;;  %vm568_vm8 = vcmp.lt.s32.totalorder %v8985_v37, %v8915_v45  ;;  %vm525_vm9 = vcmp.ge.s32.totalorder %v8985_v37, %v8906_v52  ;;  %vm573_vm10 = vcmp.lt.s32.totalorder %v8985_v37, %v8919_v34 }
 0x1b0   : > { %vm9019_vm12 = vmand %vm520_vm7, %vm568_vm8  ;;  %vm530_vm15 = vcmp.ge.s32.totalorder %v8985_v37, %v8988_v24  ;;  %vm535_vm1 = vcmp.ge.s32.totalorder %v8985_v37, %v8992_v11  ;;  %vm583_vm8 = vcmp.lt.s32.totalorder %v8985_v37, %v9013_v6 }
 0x1b1   : > { %6713 = vmatpush3.bf16.msra.mxu0 %v8765_v7  ;;  %v9007_v7 = vadd.s32 10, %v8988_v24  ;;  %v10627_v20 = vsel %vm9019_vm12, 4294967295, %v10626_v20  ;;  %vm9024_vm13 = vmand %vm525_vm9, %vm573_vm10  ;;  %v648_v56 = vsel %vm9019_vm12, 1.0, %v10548_v27  ;;  %vm531_vm12 = vcmp.ge.s32.totalorder %v10599_v15, %v8992_v11 }
 0x1b2   : > { %6714 = vmatprep.subr.bf16.mxu0 %v10581_v29  ;;  %v10629_v18 = vsel %vm9024_vm13, 4294967295, %v10628_v18  ;;  %v653_v12 = vsel %vm9024_vm13, 1.0, %v10548_v27  ;;  %v9055_v42 = vsub.f32 %v648_v56, %v648_v56  ;;  %vm9057_vm10 = vmand %vm535_vm1, %vm583_vm8 }
 0x1b3   : > { %10620 = vst [vmem:[#allocation33_spill] sm:$0xff] %v9007_v7  ;;  %vm578_vm7 = vcmp.lt.s32.totalorder %v8985_v37, %v9007_v7  ;;  %v10636_v17 = vsel %vm9057_vm10, 4294967295, %v10635_v17  ;;  %v9065_v44 = vsub.f32 %v653_v12, %v653_v12  ;;  %v663_v39 = vsel %vm9057_vm10, 1.0, %v10548_v27 }
 0x1b4   : > { %vm9051_vm9 = vmand %vm530_vm15, %vm578_vm7  ;;  %10637 = vst [vmem:[#allocation23_spill] sm:$0xff] %v10636_v17  ;;  %vm545_vm15 = vcmp.ge.s32.totalorder %v8985_v37, %v9016_v10  ;;  %vm593_vm7 = vcmp.lt.s32.totalorder %v8985_v37, %v9043_v2  ;;  %v9092_v51 = vsub.f32 %v663_v39, %v663_v39  ;;  %vm526_vm10 = vcmp.ge.s32.totalorder %v10599_v15, %v8988_v24 }
 0x1b5   : > { %6716 = vmatpush3.bf16.msra.mxu0 %v8786_v48  ;;  %v10633_v9 = vsel %vm9051_vm9, 4294967295, %v10632_v9  ;;  %v658_v21 = vsel %vm9051_vm9, 1.0, %v10548_v27  ;;  %vm9083_vm8 = vmand %vm545_vm15, %vm593_vm7  ;;  %v10392_v3 = vand.u32 4294901760, %v9065_v44  ;;  %vm574_vm9 = vcmp.lt.s32.totalorder %v10599_v15, %v9007_v7 }
 0x1b6   : > { %6717 = vmatprep.subr.bf16.mxu0 %v10581_v29  ;;  %10634 = vst [vmem:[#allocation38_spill] sm:$0xff] %v10633_v9  ;;  %v10642_v50 = vsel %vm9083_vm8, 4294967295, %v10641_v50  ;;  %v9089_v35 = vsub.f32 %v658_v21, %v658_v21  ;;  %v673_v62 = vsel %vm9083_vm8, 1.0, %v10548_v27  ;;  %v10390_v40 = vand.u32 4294901760, %v9092_v51 }
 0x1b7   : > { %10643 = vst [vmem:[#allocation25_spill] sm:$0xff] %v10642_v50 }
 0x1b8   : > { %6062 = vmatmul.mubr.f32.vlgmr.msra.gmra.mrb[10].mxu0 %v8700_v38  ;;  %v10391_v55 = vand.u32 4294901760, %v9089_v35 }
 0x1b9   : > { %6719 = vmatpush3.bf16.msra.mxu0 %v8624_v58  ;;  %6096 = vmatprep.mubr.msk.f32.mxu0 %vm10374_vm6, %v10548_v27  ;;  %v10621_v58 = vld [vmem:[#allocation18_spill] sm:$0xff] }
 0x1ba   : > { %6720 = vmatprep.subr.bf16.mxu0 %v10581_v29  ;;  %v9010_v48 = vmul.u32 10, %v10621_v58  ;;  %v4613_v23 = vsub.f32 %v9089_v35, %v10391_v55 }
 0x1bc   : > { %10622 = vst [vmem:[#allocation39_spill] sm:$0xff] %v9010_v48  ;;  %vm540_vm0 = vcmp.ge.s32.totalorder %v8985_v37, %v9010_v48 }
 0x1bd   : > { %6722 = vmatpush3.bf16.msra.mxu0 %v8643_v61  ;;  %v9035_v61 = vadd.s32 10, %v9010_v48 }
 0x1be   : > { %6723 = vmatprep.subr.bf16.mxu0 %v10581_v29  ;;  %v5520_v26 = vpop.f32.mrb[6].mxu1 }
 0x1bf   : > { %v5521_v32 = vpop.f32.mrb[7].mxu1  ;;  %10630 = vst [vmem:[#allocation36_spill] sm:$0xff] %v9035_v61  ;;  %vm588_vm6 = vcmp.lt.s32.totalorder %v8985_v37, %v9035_v61 }
 0x1c0   : > { %v5522_v33 = vadd.f32 %v5521_v32, %v5520_v26  ;;  %vm9079_vm1 = vmand %vm540_vm0, %vm588_vm6  ;;  %v4614_v32 = vand.u32 4294901760, %v4613_v23  ;;  %vm10644_vm0 = vmmov 0  }
 0x1c1   : > { %6725 = vmatpush3.bf16.msra.mxu0 %v8661_v0  ;;  %v10639_v1 = vsel %vm9079_vm1, 4294967295, %v10638_v1  ;;  %v668_v46 = vsel %vm9079_vm1, 1.0, %v10548_v27 }
 0x1c2   : > { %6726 = vmatprep.subr.bf16.mxu0 %v10581_v29  ;;  %v1668_v16 = vadd.f32 %v5522_v33, %v8912_v43  ;;  %10640 = vst [vmem:[#allocation24_spill] sm:$0xff] %v10639_v1  ;;  %v9110_v53 = vsub.f32 %v668_v46, %v668_v46 }
 0x1c4   : > { %v1780_v0 = vadd.f32 %v5557_v4, %v1668_v16  ;;  %v9112_v4 = vsub.f32 %v673_v62, %v673_v62  ;;  %v10389_v47 = vand.u32 4294901760, %v9110_v53 }
 0x1c5   : > { %6728 = vmatpush3.bf16.msra.mxu0 %v8690_v22  ;;  %v10393_v22 = vand.u32 4294901760, %v9055_v42 }
 0x1c6   : > { %6729 = vmatprep.subr.bf16.mxu0 %v10581_v29  ;;  %v10388_v26 = vand.u32 4294901760, %v9112_v4 }
 0x1c7   : > { %v4599_v13 = vsub.f32 %v9055_v42, %v10393_v22 }
 0x1c8   : > { %v4634_v12 = vsub.f32 %v9112_v4, %v10388_v26 }
 0x1c9   : > { %6731 = vmatpush3.bf16.msra.mxu0 %v8706_v19  ;;  %v4606_v19 = vsub.f32 %v9065_v44, %v10392_v3  ;;  %v4600_v36 = vand.u32 4294901760, %v4599_v13  ;;  %v10678_v3 = vmov 0 }
 0x1ca   : > { %6732 = vmatprep.subr.bf16.mxu0 %v10581_v29  ;;  %v4635_v39 = vand.u32 4294901760, %v4634_v12  ;;  %v10647_v12 = vld [vmem:[#allocation22_spill] sm:$0xff] }
 0x1cb   : > { %v5625_v54 = vpop.f32.mrb[6].mxu0  ;;  %v4607_v58 = vand.u32 4294901760, %v4606_v19 }
 0x1cc   : > { %v5626_v63 = vpop.f32.mrb[7].mxu0 }
 0x1cd   : > { %v5627_v43 = vadd.f32 %v5626_v63, %v5625_v54  ;;  %6734 = vmatpush3.bf16.msra.mxu0 %v8729_v31  ;;  %v4620_v31 = vsub.f32 %v9092_v51, %v10390_v40  ;;  %v6946_v33 = vpack.c.bf16 %v4607_v58, %v4600_v36 }
 0x1ce   : > { %6735 = vmatprep.subr.bf16.mxu0 %v10581_v29 }
 0x1cf   : > { %v4621_v56 = vand.u32 4294901760, %v4620_v31 }
 0x1d1   : > { %6737 = vmatpush3.bf16.msra.mxu0 %v8754_v25  ;;  %v4627_v25 = vsub.f32 %v9110_v53, %v10389_v47  ;;  %v6949_v16 = vpack.c.bf16 %v4621_v56, %v4614_v32  ;;  %v10645_v56 = vld [vmem:[#allocation20_spill] sm:$0xff] }
 0x1d2   : > { %6738 = vmatprep.subr.bf16.mxu0 %v10581_v29 }
 0x1d3   : > { %v4628_v21 = vand.u32 4294901760, %v4627_v25  ;;  %v9140_v25 = vmul.u32 10, %v10645_v56 }
 0x1d5   : > { %6740 = vmatpush3.bf16.msra.mxu0 %v8774_v5  ;;  %v6952_v5 = vpack.c.bf16 %v4635_v39, %v4628_v21  ;;  %10646 = vst [vmem:[#allocation27_spill] sm:$0xff] %v9140_v25  ;;  %vm550_vm6 = vcmp.ge.s32.totalorder %v8985_v37, %v9140_v25 }
 0x1d6   : > { %6945 = vmatprep.subr.bf16.mxu0 %v10581_v29 }
 0x1d8   : > { %6097 = vmatmul.mubr.f32.vlgmr.msra.gmra.mrb[10].mxu0 %v8700_v38 }
 0x1d9   : > { %6947 = vmatpush3.bf16.msra.mxu0 %v6946_v33  ;;  %6134 = vmatprep.mubr.msk.f32.mxu0 %vm10644_vm0, %v10548_v27 }
 0x1da   : > { %6948 = vmatprep.subr.bf16.mxu0 %v10581_v29 }
 0x1dd   : > { %6950 = vmatpush3.bf16.msra.mxu0 %v6949_v16  ;;  %v9143_v16 = vmul.u32 10, %v10647_v12  ;;  %v650_v12 = vsel %vm8940_vm14, 1.0, %v10548_v27  ;;  %vm537_vm14 = vcmp.ge.s32.totalorder %v8910_v8, %v9010_v48 }
 0x1de   : > { %v5590_v46 = vpop.f32.mrb[8].mxu1  ;;  %6951 = vmatprep.subr.bf16.mxu0 %v10581_v29 }
 0x1df   : > { %v5591_v62 = vpop.f32.mrb[9].mxu1  ;;  %10648 = vst [vmem:[#allocation40_spill] sm:$0xff] %v9143_v16  ;;  %vm555_vm15 = vcmp.ge.s32.totalorder %v8985_v37, %v9143_v16 }
 0x1e0   : > { %v5592_v54 = vadd.f32 %v5591_v62, %v5590_v46 }
 0x1e1   : > { %6953 = vmatpush3.bf16.msra.mxu0 %v6952_v5 }
 0x1e2   : > { %v2012_v63 = vadd.f32 %v5592_v54, %v1780_v0  ;;  %6954 = vmatprep.subr.bf16.mxu0 %v10581_v29  ;;  %v9146_v0 = vadd.s32 10, %v9140_v25 }
 0x1e4   : > { %v2150_v38 = vadd.f32 %v5627_v43, %v2012_v63  ;;  %10649 = vst [vmem:[#allocation41_spill] sm:$0xff] %v9146_v0  ;;  %v9149_v43 = vadd.s32 10, %v9143_v16  ;;  %vm598_vm7 = vcmp.lt.s32.totalorder %v8985_v37, %v9146_v0 }
 0x1e5   : > { %vm9159_vm2 = vmand %vm550_vm6, %vm598_vm7  ;;  %vm532_vm6 = vcmp.ge.s32.totalorder %v8910_v8, %v8992_v11  ;;  %vm580_vm7 = vcmp.lt.s32.totalorder %v8910_v8, %v9013_v6 }
 0x1e6   : > { %10650 = vst [vmem:[#allocation42_spill] sm:$0xff] %v9149_v43  ;;  %vm603_vm5 = vcmp.lt.s32.totalorder %v8985_v37, %v9149_v43  ;;  %v678_v63 = vsel %vm9159_vm2, 1.0, %v10548_v27  ;;  %vm9206_vm13 = vmand %vm532_vm6, %vm580_vm7 }
 0x1e7   : > { %vm9165_vm8 = vmand %vm555_vm15, %vm603_vm5  ;;  %vm527_vm5 = vcmp.ge.s32.totalorder %v8910_v8, %v8988_v24  ;;  %vm575_vm15 = vcmp.lt.s32.totalorder %v8910_v8, %v9007_v7 }
 0x1e8   : > { %vm9198_vm1 = vmand %vm527_vm5, %vm575_vm15  ;;  %vm585_vm15 = vcmp.lt.s32.totalorder %v8910_v8, %v9035_v61 }
 0x1e9   : > { %vm9221_vm5 = vmpackc.low %vm9206_vm13, %vm9198_vm1  ;;  %v655_v30 = vsel %vm9198_vm1, 1.0, %v10548_v27 }
 0x1ea   : > { %6746 = vmatprep.subr.msk.bf16.mxu1 %vm9221_vm5, %v10396_v60  ;;  %vm9228_vm6 = vmand %vm526_vm10, %vm574_vm9  ;;  %vm590_vm9 = vcmp.lt.s32.totalorder %v8910_v8, %v9043_v2  ;;  %vm536_vm10 = vcmp.ge.s32.totalorder %v10599_v15, %v9010_v48 }
 0x1eb   : > { %v5695_v13 = vpop.f32.mrb[8].mxu0 }
 0x1ec   : > { %v5696_v19 = vpop.f32.mrb[9].mxu0 }
 0x1ed   : > { %v5697_v36 = vadd.f32 %v5696_v19, %v5695_v13  ;;  %v9175_v13 = vsub.f32 %v678_v63, %v678_v63 }
 0x1ef   : > { %v10395_v19 = vand.u32 4294901760, %v9175_v13  ;;  %v10691_v46 = vand.u32 4294901760, %v9175_v13 }
 0x1fe   : > { %v5660_v23 = vpop.f32.mrb[10].mxu1 }
 0x1ff   : > { %v5661_v58 = vpop.f32.mrb[11].mxu1 }
 0x200   : > { %v5662_v31 = vadd.f32 %v5661_v58, %v5660_v23  ;;  %v4641_v23 = vsub.f32 %v9175_v13, %v10395_v19 }
 0x202   : > { %v2258_v32 = vadd.f32 %v5662_v31, %v2150_v38  ;;  %v683_v38 = vsel %vm9165_vm8, 1.0, %v10548_v27  ;;  %v645_v31 = vsel %vm8931_vm11, 1.0, %v10548_v27  ;;  %vm579_vm11 = vcmp.lt.s32.totalorder %v10599_v15, %v9013_v6 }
 0x203   : > { %v9177_v37 = vsub.f32 %v683_v38, %v683_v38  ;;  %v4642_v49 = vand.u32 4294901760, %v4641_v23  ;;  %v9236_v41 = vsub.f32 %v645_v31, %v645_v31  ;;  %vm9238_vm7 = vmand %vm531_vm12, %vm579_vm11  ;;  %v9246_v38 = vsub.f32 %v650_v12, %v650_v12 }
 0x204   : > { %v2426_v33 = vadd.f32 %v5697_v36, %v2258_v32  ;;  %v644_v23 = vsel %vm8959_vm3, 1.0, %v10548_v27  ;;  %vm9258_vm12 = vmpackc.low %vm9238_vm7, %vm9228_vm6  ;;  %v10666_v31 = vmov 0  ;;  %vm584_vm11 = vcmp.lt.s32.totalorder %v10599_v15, %v9035_v61 }
 0x205   : > { %v10394_v36 = vand.u32 4294901760, %v9177_v37  ;;  %v10667_v31 = vsel %vm9258_vm12, 4294967295, %v10666_v31  ;;  %6748 = vmatpush1.bf16.msk.msra.mxu1 %vm9258_vm12, %v10396_v60  ;;  %vm9267_vm3 = vmand %vm537_vm14, %vm585_vm15  ;;  %v659_v12 = vsel %vm9238_vm7, 1.0, %v10548_v27  ;;  %vm10671_vm14 = vcmp.ge.s32.totalorder %v8910_v8, %v9016_v10 }
 0x206   : > { %10668 = vst [vmem:[#allocation16_spill] sm:$0xff] %v10667_v31  ;;  %vm630_vm15 = vmand %vm10671_vm14, %vm590_vm9  ;;  %v9296_v32 = vsub.f32 %v644_v23, %v644_v23  ;;  %v665_v47 = vsel %vm9267_vm3, 1.0, %v10548_v27  ;;  %vm552_vm9 = vcmp.ge.s32.totalorder %v8910_v8, %v9143_v16  ;;  %vm551_vm14 = vcmp.ge.s32.totalorder %v10599_v15, %v9143_v16 }
 0x207   : > { %v4648_v58 = vsub.f32 %v9177_v37, %v10394_v36  ;;  %v670_v23 = vsel %vm630_vm15, 1.0, %v10548_v27  ;;  %vm624_vm1 = vmand %vm536_vm10, %vm584_vm11  ;;  %vm595_vm10 = vcmp.lt.s32.totalorder %v8910_v8, %v9146_v0  ;;  %vm546_vm11 = vcmp.ge.s32.totalorder %v10599_v15, %v9140_v25 }
 0x208   : > { %v664_v28 = vsel %vm624_vm1, 1.0, %v10548_v27  ;;  %v10682_v22 = vand.u32 4294901760, %v9246_v38  ;;  %v10688_v61 = vmov 1.0|1.0   ;;  %v10692_v54 = vand.u32 4294901760, %v9177_v37 }
 0x209   : > { %v4649_v56 = vand.u32 4294901760, %v4648_v58  ;;  %v649_v58 = vsel %vm8964_vm4, 1.0, %v10548_v27  ;;  %vm541_vm4 = vcmp.ge.s32.totalorder %v10599_v15, %v9016_v10  ;;  %v9354_v40 = vsub.f32 %v664_v28, %v664_v28 }
 0x20a   : > { %v3325_v36 = vsub.f32 %v9246_v38, %v10682_v22  ;;  %v10685_v22 = vmov 0 }
 0x20c   : > { %v3326_v10 = vand.u32 4294901760, %v3325_v36 }
 0x21e   : > { %v5730_v21 = vpop.f32.mrb[12].mxu1 }
 0x21f   : > { %v5731_v39 = vpop.f32.mrb[13].mxu1 }
 0x220   : > { %v5732_v5 = vadd.f32 %v5731_v39, %v5730_v21  ;;  %v10659_v21 = vmov 0  ;;  %v10672_v39 = vmov 0 }
 0x221   : > { %v10660_v21 = vsel %vm9221_vm5, 4294967295, %v10659_v21  ;;  %vm589_vm5 = vcmp.lt.s32.totalorder %v10599_v15, %v9043_v2 }
 0x222   : > { %v9163_v62 = vadd.f32 %v5732_v5, %v2426_v33  ;;  %10661 = vst [vmem:[#allocation15_spill] sm:$0xff] %v10660_v21  ;;  %v6955_v5 = vpack.c.bf16 %v4649_v56, %v4642_v49  ;;  %v660_v49 = vsel %vm9206_vm13, 1.0, %v10548_v27  ;;  %v654_v56 = vsel %vm9228_vm6, 1.0, %v10548_v27  ;;  %vm9306_vm13 = vmpackc.low %vm630_vm15, %vm9267_vm3 }
 0x223   : > { %v9300_v33 = vsub.f32 %v655_v30, %v655_v30  ;;  %v9302_v26 = vsub.f32 %v660_v49, %v660_v49  ;;  %v10673_v39 = vsel %vm9306_vm13, 4294967295, %v10672_v39  ;;  %v9310_v63 = vsub.f32 %v654_v56, %v654_v56  ;;  %6750 = vmatprep.subr.msk.bf16.mxu1 %vm9306_vm13, %v10396_v60  ;;  %vm629_vm7 = vmand %vm541_vm4, %vm589_vm5 }
 0x224   : > { %6956 = vmatpush3.bf16.msra.mxu0 %v6955_v5  ;;  %v9298_v5 = vsub.f32 %v649_v58, %v649_v58  ;;  %10674 = vst [vmem:[#allocation17_spill] sm:$0xff] %v10673_v39  ;;  %vm547_vm6 = vcmp.ge.s32.totalorder %v8910_v8, %v9140_v25  ;;  %v9327_v58 = vsub.f32 %v659_v12, %v659_v12  ;;  %v669_v56 = vsel %vm629_vm7, 1.0, %v10548_v27  ;;  %vm9345_vm3 = vmpackc.low %vm629_vm7, %vm624_vm1 }
 0x225   : > { %6957 = vmatprep.subr.bf16.mxu0 %v10581_v29  ;;  %v9340_v30 = vsub.f32 %v665_v47, %v665_v47  ;;  %v9342_v49 = vsub.f32 %v670_v23, %v670_v23  ;;  %v10675_v12 = vmov 0  ;;  %vm600_vm5 = vcmp.lt.s32.totalorder %v8910_v8, %v9149_v43  ;;  %6752 = vmatpush1.bf16.msk.msra.mxu1 %vm9345_vm3, %v10396_v60  ;;  %vm635_vm4 = vmand %vm547_vm6, %vm595_vm10 }
 0x226   : > { %v10676_v12 = vsel %vm9345_vm3, 4294967295, %v10675_v12  ;;  %vm594_vm15 = vcmp.lt.s32.totalorder %v10599_v15, %v9146_v0  ;;  %vm640_vm1 = vmand %vm552_vm9, %vm600_vm5  ;;  %v675_v47 = vsel %vm635_vm4, 1.0, %v10548_v27  ;;  %vm599_vm7 = vcmp.lt.s32.totalorder %v10599_v15, %v9149_v43 }
 0x227   : > { %10677 = vst [vmem:[#allocation18_spill] sm:$0xff] %v10676_v12  ;;  %v9367_v28 = vsub.f32 %v669_v56, %v669_v56  ;;  %v680_v55 = vsel %vm640_vm1, 1.0, %v10548_v27  ;;  %vm9370_vm6 = vmpackc.low %vm640_vm1, %vm635_vm4  ;;  %v9379_v19 = vsub.f32 %v675_v47, %v675_v47  ;;  %v10681_v56 = vand.u32 4294901760, %v9236_v41 }
 0x228   : > { %v10679_v3 = vsel %vm9370_vm6, 4294967295, %v10678_v3  ;;  %6754 = vmatprep.subr.msk.bf16.mxu1 %vm9370_vm6, %v10396_v60  ;;  %v9381_v8 = vsub.f32 %v680_v55, %v680_v55  ;;  %vm634_vm9 = vmand %vm546_vm11, %vm594_vm15  ;;  %v10683_v55 = vand.u32 4294901760, %v9296_v32  ;;  %v10684_v43 = vand.u32 4294901760, %v9298_v5 }
 0x229   : > { %10680 = vst [vmem:[#allocation19_spill] sm:$0xff] %v10679_v3  ;;  %v3313_v23 = vsub.f32 %v9236_v41, %v10681_v56  ;;  %vm639_vm10 = vmand %vm551_vm14, %vm599_vm7  ;;  %v674_v47 = vsel %vm634_vm9, 1.0, %v10548_v27  ;;  %v10422_v56 = vand.u32 4294901760, %v9300_v33  ;;  %v3348_v7 = vand.u32 4294901760, %v9302_v26 }
 0x22a   : > { %v3319_v60 = vsub.f32 %v9296_v32, %v10683_v55  ;;  %v3331_v0 = vsub.f32 %v9298_v5, %v10684_v43  ;;  %v679_v25 = vsel %vm639_vm10, 1.0, %v10548_v27  ;;  %vm9404_vm5 = vmpackc.low %vm639_vm10, %vm634_vm9  ;;  %v9408_v16 = vsub.f32 %v674_v47, %v674_v47 }
 0x22b   : > { %v10686_v22 = vsel %vm9404_vm5, 4294967295, %v10685_v22  ;;  %v3314_v2 = vand.u32 4294901760, %v3313_v23  ;;  %6756 = vmatpush1.bf16.msk.msra.mxu1 %vm9404_vm5, %v10688_v61  ;;  %v9413_v55 = vsub.f32 %v679_v25, %v679_v25  ;;  %v3337_v6 = vsub.f32 %v9300_v33, %v10422_v56  ;;  %vm9456_vm4 = vmpackc.low %vm9165_vm8, %vm9159_vm2 }
 0x22c   : > { %10687 = vst [vmem:[#allocation20_spill] sm:$0xff] %v10686_v22  ;;  %v3320_v48 = vand.u32 4294901760, %v3319_v60  ;;  %v3332_v43 = vand.u32 4294901760, %v3331_v0  ;;  %v3342_v47 = vand.u32 4294901760, %v9310_v63  ;;  %v3354_v23 = vand.u32 4294901760, %v9327_v58 }
 0x22d   : > { %v6757_v11 = vpack.c.bf16 %v3326_v10, %v3314_v2  ;;  %v3338_v24 = vand.u32 4294901760, %v3337_v6  ;;  %v3360_v60 = vand.u32 4294901760, %v9340_v30  ;;  %v3349_v0 = vsub.f32 %v9302_v26, %v3348_v7 }
 0x22e   : > { %v9421_v36 = vpack.c.bf16 %v3332_v43, %v3320_v48  ;;  %v3343_v56 = vsub.f32 %v9310_v63, %v3342_v47  ;;  %v3355_v10 = vsub.f32 %v9327_v58, %v3354_v23  ;;  %v3372_v2 = vand.u32 4294901760, %v9342_v49 }
 0x22f   : > { %6758 = vmatprep.subr.bf16.mxu1 %v6757_v11  ;;  %v3361_v34 = vsub.f32 %v9340_v30, %v3360_v60  ;;  %v3366_v48 = vand.u32 4294901760, %v9354_v40  ;;  %v3378_v6 = vand.u32 4294901760, %v9367_v28  ;;  %v3384_v43 = vand.u32 4294901760, %v9379_v19 }
 0x230   : > { %v3350_v25 = vand.u32 4294901760, %v3349_v0  ;;  %v3344_v52 = vand.u32 4294901760, %v3343_v56  ;;  %v3356_v45 = vand.u32 4294901760, %v3355_v10  ;;  %v3373_v11 = vsub.f32 %v9342_v49, %v3372_v2 }
 0x231   : > { %v3362_v59 = vand.u32 4294901760, %v3361_v34  ;;  %v3367_v15 = vsub.f32 %v9354_v40, %v3366_v48  ;;  %v3379_v22 = vsub.f32 %v9367_v28, %v3378_v6  ;;  %v3385_v3 = vsub.f32 %v9379_v19, %v3384_v43 }
 0x232   : > { %v6761_v12 = vpack.c.bf16 %v3350_v25, %v3338_v24  ;;  %v6763_v39 = vpack.c.bf16 %v3356_v45, %v3344_v52  ;;  %v3374_v31 = vand.u32 4294901760, %v3373_v11  ;;  %v3396_v21 = vand.u32 4294901760, %v9381_v8 }
 0x233   : > { %v3368_v14 = vand.u32 4294901760, %v3367_v15  ;;  %v3380_v57 = vand.u32 4294901760, %v3379_v22  ;;  %v3390_v0 = vand.u32 4294901760, %v9408_v16  ;;  %v3386_v10 = vand.u32 4294901760, %v3385_v3 }
 0x234   : > { %v6765_v56 = vpack.c.bf16 %v3374_v31, %v3362_v59  ;;  %v3397_v50 = vsub.f32 %v9381_v8, %v3396_v21  ;;  %v3402_v34 = vand.u32 4294901760, %v9413_v55  ;;  %v6773_v52 = vpack.c.bf16 %v9246_v38, %v9236_v41 }
 0x235   : > { %v6767_v1 = vpack.c.bf16 %v3380_v57, %v3368_v14  ;;  %v3391_v17 = vsub.f32 %v9408_v16, %v3390_v0  ;;  %v6775_v15 = vpack.c.bf16 %v9298_v5, %v9296_v32  ;;  %v6777_v3 = vpack.c.bf16 %v9302_v26, %v9300_v33 }
 0x236   : > { %v3398_v9 = vand.u32 4294901760, %v3397_v50  ;;  %v3403_v24 = vsub.f32 %v9413_v55, %v3402_v34  ;;  %v6779_v57 = vpack.c.bf16 %v9327_v58, %v9310_v63  ;;  %v10689_v14 = vmov 0 }
 0x237   : > { %v3392_v45 = vand.u32 4294901760, %v3391_v17  ;;  %v10690_v14 = vsel %vm9456_vm4, 4294967295, %v10689_v14  ;;  %v6781_v17 = vpack.c.bf16 %v9342_v49, %v9340_v30  ;;  %v9472_v63 = vpack.c.bf16 %v10692_v54, %v10691_v46  ;;  %v10724_v49 = vld [vmem:[#allocation26_spill] sm:$0xff] }
 0x238   : > { %v6769_v22 = vpack.c.bf16 %v3398_v9, %v3386_v10  ;;  %v3404_v59 = vand.u32 4294901760, %v3403_v24  ;;  %v6783_v9 = vpack.c.bf16 %v9367_v28, %v9354_v40  ;;  %v10693_v58 = vand.u32 4294901760, %v9236_v41  ;;  %v10733_v28 = vld [vmem:[#allocation19_spill] sm:$0xff] }
 0x239   : > { %v10694_v25 = vand.u32 4294901760, %v9246_v38  ;;  %v10695_v10 = vand.u32 4294901760, %v9296_v32  ;;  %v10696_v24 = vand.u32 4294901760, %v9298_v5  ;;  %v9490_v50 = vpack.c.bf16 %v3354_v23, %v3342_v47 }
 0x23a   : > { %v6771_v31 = vpack.c.bf16 %v3404_v59, %v3392_v45  ;;  %v10697_v59 = vand.u32 4294901760, %v9300_v33  ;;  %v9492_v46 = vpack.c.bf16 %v3372_v2, %v3360_v60  ;;  %v9494_v54 = vpack.c.bf16 %v3378_v6, %v3366_v48 }
 0x23b   : > { %v9478_v11 = vpack.c.bf16 %v10694_v25, %v10693_v58  ;;  %v9484_v45 = vpack.c.bf16 %v10696_v24, %v10695_v10  ;;  %v9496_v41 = vpack.c.bf16 %v3396_v21, %v3384_v43  ;;  %v9498_v38 = vpack.c.bf16 %v3402_v34, %v3390_v0  ;;  %v10735_v34 = vld [vmem:[#allocation14_spill] sm:$0xff]  ;;  %v10746_v10 = vld [vmem:[#allocation21_spill] sm:$0xff] }
 0x23c   : > { %v9488_v26 = vpack.c.bf16 %v3348_v7, %v10697_v59  ;;  %vm10698_vm2 = vcmask 523264   ;;  %v6958_v7 = vpack.c.bf16 %v9065_v44, %v9055_v42  ;;  %v6961_v21 = vpack.c.bf16 %v9092_v51, %v9089_v35  ;;  %v10747_v24 = vld [vmem:[#allocation34_spill] sm:$0xff] }
 0x23d   : > { %v6964_v60 = vpack.c.bf16 %v9112_v4, %v9110_v53  ;;  %v10699_v48 = vpack.c.bf16 %v9177_v37, %v9175_v13  ;;  %vm10700_vm8 = vnez %v10627_v20  ;;  %vm10701_vm11 = vnez %v10629_v18  ;;  %v10704_v13 = vld [vmem:[#allocation38_spill] sm:$0xff]  ;;  %v10706_v37 = vld [vmem:[#allocation23_spill] sm:$0xff]  ;;  %v10710_v18 = vld [vmem:[#allocation24_spill] sm:$0xff] }
 0x23e   : > { %vm9537_vm14 = vmpackc.low %vm10701_vm11, %vm10700_vm8  ;;  %vm10705_vm15 = vnez %v10704_v13  ;;  %vm10707_vm1 = vnez %v10706_v37  ;;  %v10708_v20 = vmov 0  ;;  %vm10711_vm9 = vnez %v10710_v18  ;;  %v10759_v13 = vld [vmem:[#allocation36_spill] sm:$0xff] }
 0x23f   : > { %vm9550_vm7 = vmpackc.low %vm10707_vm1, %vm10705_vm15  ;;  %v10717_v6 = vand.u32 4294901760, %v9065_v44  ;;  %v10718_v0 = vand.u32 4294901760, %v9089_v35  ;;  %v10720_v44 = vpack.c.bf16 %v9381_v8, %v9379_v19  ;;  %v10721_v30 = vpack.c.bf16 %v9413_v55, %v9408_v16  ;;  %v10726_v19 = vld [vmem:[#allocation28_spill] sm:$0xff]  ;;  %v10728_v16 = vld [vmem:[#allocation15_spill] sm:$0xff] }
 0x240   : > { %v10709_v20 = vsel %vm9550_vm7, 4294967295, %v10708_v20  ;;  %v10722_v40 = vand.u32 4294901760, %v9110_v53  ;;  %v10723_v35 = vand.u32 4294901760, %v9112_v4  ;;  %vm10725_vm8 = vnez %v10724_v49  ;;  %v10734_v55 = vld [vmem:[#allocation20_spill] sm:$0xff]  ;;  %v10778_v8 = vld [vmem:[#allocation42_spill] sm:$0xff] }
 0x241   : > { %vm10727_vm11 = vnez %v10726_v19  ;;  %vm10729_vm15 = vnez %v10728_v16  ;;  %v10773_v49 = vld [vmem:[#allocation40_spill] sm:$0xff]  ;;  %v10774_v19 = vld [vmem:[#allocation41_spill] sm:$0xff] }
 0x2ab   : > { %v3170_v58 = vpop.f32.mrb[10].mxu0 }
 0x2ac   : > { %v7005_v32 = vadd.f32 %v3170_v58, %v9163_v62  ;;  %v6098_v5 = vpop.f32.mrb[11].mxu0 }
 0x2ae   : > { %v3216_v25 = vsel %vm10698_vm2, %v7005_v32, 0 }
 0x2af   : > { %v9504_v33 = vand.u32 4294901760, %v3216_v25 }
 0x2b1   : > { %v9507_v47 = vsub.f32 %v3216_v25, %v9504_v33  ;;  %6135 = vmatmul.mubr.f32.vlgmr.msra.gmra.mrb[12].mxu0 %v9504_v33 }
 0x2b2   : > { %6959 = vmatpush3.bf16.msra.mxu0 %v6958_v7  ;;  %6153 = vmatprep.mubr.msk.f32.mxu0 %vm10644_vm0, %v10548_v27 }
 0x2b3   : > { %6960 = vmatprep.subr.bf16.mxu0 %v10581_v29  ;;  %v9516_v62 = vand.u32 4294901760, %v9507_v47 }
 0x2b5   : > { %v3302_v23 = vsub.f32 %v9507_v47, %v9516_v62 }
 0x2b6   : > { %6962 = vmatpush3.bf16.msra.mxu0 %v6961_v21 }
 0x2b7   : > { %6963 = vmatprep.subr.bf16.mxu0 %v10581_v29  ;;  %v9523_v2 = vand.u32 4294901760, %v3302_v23 }
 0x2b9   : > { %3304 = vmatmul.mubr.f32.vlgmr.msra.gmra.mrb[14].mxu1 %v9523_v2 }
 0x2ba   : > { %6760 = vmatpush1.bf16.msra.mxu1 %v9421_v36  ;;  %6965 = vmatpush3.bf16.msra.mxu0 %v6964_v60  ;;  %v10702_v36 = vmov 0 }
 0x2bb   : > { %6762 = vmatprep.subr.bf16.mxu1 %v6761_v12  ;;  %6966 = vmatprep.subr.bf16.mxu0 %v10581_v29  ;;  %v10703_v36 = vsel %vm9537_vm14, 4294967295, %v10702_v36  ;;  %v10716_v12 = vand.u32 4294901760, %v9055_v42  ;;  %v10719_v42 = vand.u32 4294901760, %v9092_v51  ;;  %v6988_v51 = vpack.c.bf16 %v10723_v35, %v10722_v40 }
 0x2bc   : > { %3454 = vmatprep.mubr.f32.mxu1 %v10548_v27 }
 0x2bd   : > { %v6982_v43 = vpack.c.bf16 %v10717_v6, %v10716_v12  ;;  %v10763_v12 = vld [vmem:[#allocation35_spill] sm:$0xff]  ;;  %v10764_v6 = vld [vmem:[#allocation37_spill] sm:$0xff] }
 0x2be   : > { %6764 = vmatpush1.bf16.msra.mxu1 %v6763_v39  ;;  %6968 = vmatpush3.bf16.msra.mxu0 %v10699_v48  ;;  %v10714_v39 = vmov 0  ;;  %v10758_v48 = vld [vmem:[#allocation39_spill] sm:$0xff] }
 0x2bf   : > { %6766 = vmatprep.subr.bf16.mxu1 %v6765_v56  ;;  %6969 = vmatprep.subr.bf16.mxu0 %v10581_v29  ;;  %v6985_v56 = vpack.c.bf16 %v10719_v42, %v10718_v0 }
 0x2c1   : > { %6154 = vmatmul.mubr.f32.vlgmr.msra.gmra.mrb[12].mxu0 %v9507_v47 }
 0x2c2   : > { %6768 = vmatpush1.bf16.msra.mxu1 %v6767_v1  ;;  %6971 = vmatpush3.bf16.msk.msra.mxu0 %vm9537_vm14, %v10688_v61  ;;  %v10712_v1 = vld [vmem:[#allocation25_spill] sm:$0xff] }
 0x2c3   : > { %6770 = vmatprep.subr.bf16.mxu1 %v6769_v22  ;;  %6972 = vmatprep.subr.bf16.mxu0 %v10581_v29  ;;  %vm10713_vm10 = vnez %v10712_v1  ;;  %v10736_v22 = vld [vmem:[#allocation29_spill] sm:$0xff] }
 0x2c4   : > { %6172 = vmatprep.mubr.msk.f32.mxu0 %vm10644_vm0, %v10548_v27  ;;  %vm9564_vm2 = vmpackc.low %vm10713_vm10, %vm10711_vm9 }
 0x2c5   : > { %v10715_v39 = vsel %vm9564_vm2, 4294967295, %v10714_v39 }
 0x2c6   : > { %6772 = vmatpush1.bf16.msra.mxu1 %v6771_v31  ;;  %6974 = vmatpush3.bf16.msk.msra.mxu0 %vm9550_vm7, %v10688_v61  ;;  %v10738_v31 = vld [vmem:[#allocation30_spill] sm:$0xff] }
 0x2c7   : > { %6774 = vmatprep.subr.bf16.mxu1 %v6773_v52  ;;  %6975 = vmatprep.subr.bf16.mxu0 %v10581_v29  ;;  %v9665_v52 = vadd.s32 384, %v10735_v34 }
 0x2c9   : > { %3456 = vmatmul.mubr.f32.vlgmr.msra.gmra.mrb[14].mxu1 %v9504_v33  ;;  %vm519_vm1 = vcmp.ge.s32.totalorder %v9665_v52, %v10736_v22  ;;  %vm524_vm10 = vcmp.ge.s32.totalorder %v9665_v52, %v10738_v31 }
 0x2ca   : > { %6776 = vmatpush1.bf16.msra.mxu1 %v6775_v15  ;;  %6977 = vmatpush3.bf16.msk.msra.mxu0 %vm9564_vm2, %v10688_v61  ;;  %v9668_v15 = vadd.s32 256, %v10735_v34 }
 0x2cb   : > { %6778 = vmatprep.subr.bf16.mxu1 %v6777_v3  ;;  %6978 = vmatprep.subr.bf16.mxu0 %v10581_v29  ;;  %v10737_v3 = vld [vmem:[#allocation31_spill] sm:$0xff] }
 0x2cc   : > { %3558 = vmatprep.mubr.f32.mxu1 %v10548_v27  ;;  %vm567_vm9 = vcmp.lt.s32.totalorder %v9665_v52, %v10737_v3 }
 0x2ce   : > { %6780 = vmatpush1.bf16.msra.mxu1 %v6779_v57  ;;  %6980 = vmatpush3.bf16.msk.msra.mxu0 %vm9456_vm4, %v10688_v61  ;;  %v10739_v57 = vld [vmem:[#allocation32_spill] sm:$0xff] }
 0x2cf   : > { %6782 = vmatprep.subr.bf16.mxu1 %v6781_v17  ;;  %6981 = vmatprep.subr.bf16.mxu0 %v10581_v29 }
 0x2d1   : > { %6173 = vmatmul.mubr.f32.vlgmr.msra.gmra.mrb[12].mxu0 %v9516_v62 }
 0x2d2   : > { %6784 = vmatpush1.bf16.msra.mxu1 %v6783_v9  ;;  %6983 = vmatpush3.bf16.msra.mxu0 %v6982_v43  ;;  %v10742_v9 = vld [vmem:[#allocation13_spill] sm:$0xff]  ;;  %v7117_v43 = vld [vmem:[%s7395_s9 + $0x8] sm:$0xff] }
 0x2d3   : > { %6786 = vmatprep.subr.bf16.mxu1 %v10720_v44  ;;  %6984 = vmatprep.subr.bf16.mxu0 %v10581_v29 }
 0x2d4   : > { %6191 = vmatprep.mubr.msk.f32.mxu0 %vm10644_vm0, %v10548_v27 }
 0x2d6   : > { %6788 = vmatpush1.bf16.msra.mxu1 %v10721_v30  ;;  %6986 = vmatpush3.bf16.msra.mxu0 %v6985_v56 }
 0x2d7   : > { %6790 = vmatprep.subr.msk.bf16.mxu1 %vm10725_vm8, %v10688_v61  ;;  %6987 = vmatprep.subr.bf16.mxu0 %v10581_v29 }
 0x2d9   : > { %3561 = vmatmul.mubr.f32.vlgmr.msra.gmra.mrb[14].mxu1 %v9507_v47 }
 0x2da   : > { %6792 = vmatpush1.bf16.msk.msra.mxu1 %vm10727_vm11, %v10688_v61  ;;  %6989 = vmatpush3.bf16.msra.mxu0 %v6988_v51  ;;  %v10772_v51 = vld [vmem:[#allocation27_spill] sm:$0xff] }
 0x2db   : > { %6794 = vmatprep.subr.msk.bf16.mxu1 %vm10729_vm15, %v10688_v61  ;;  %6990 = vmatprep.subr.bf16.mxu0 %v10581_v29 }
 0x2dc   : > { %3647 = vmatprep.mubr.f32.mxu1 %v10548_v27 }
 0x2de   : > { %6796 = vmatpush1.bf16.msk.msra.mxu1 %vm9258_vm12, %v10688_v61  ;;  %6992 = vmatpush3.bf16.msra.mxu0 %v9472_v63 }
 0x2df   : > { %6798 = vmatprep.subr.msk.bf16.mxu1 %vm9306_vm13, %v10688_v61  ;;  %6993 = vmatprep.subr.bf16.mxu0 %v10581_v29 }
 0x2e1   : > { %6192 = vmatmul.mubr.f32.vlgmr.msra.gmra.mrb[12].mxu0 %v9504_v33 }
 0x2e2   : > { %6800 = vmatpush1.bf16.msk.msra.mxu1 %vm9345_vm3, %v10688_v61  ;;  %6995 = vmatpush3.bf16.msk.msra.mxu0 %vm9537_vm14, %v10688_v61  ;;  %vm571_vm14 = vcmp.lt.s32.totalorder %v9668_v15, %v10739_v57 }
 0x2e3   : > { %6802 = vmatprep.subr.msk.bf16.mxu1 %vm9370_vm6, %v10688_v61  ;;  %6996 = vmatprep.subr.bf16.mxu0 %v10581_v29 }
 0x2e4   : > { %6210 = vmatprep.mubr.msk.f32.mxu0 %vm10644_vm0, %v10548_v27  ;;  %vm523_vm0 = vcmp.ge.s32.totalorder %v9668_v15, %v10738_v31 }
 0x2e6   : > { %6804 = vmatpush1.bf16.msk.msra.mxu1 %vm9404_vm5, %v10688_v61  ;;  %6998 = vmatpush3.bf16.msk.msra.mxu0 %vm9550_vm7, %v10688_v61  ;;  %vm607_vm7 = vmand %vm519_vm1, %vm567_vm9 }
 0x2e7   : > { %6806 = vmatprep.subr.bf16.mxu1 %v9478_v11  ;;  %6999 = vmatprep.subr.bf16.mxu0 %v10581_v29  ;;  %vm9708_vm9 = vmand %vm523_vm0, %vm571_vm14  ;;  %vm528_vm0 = vcmp.ge.s32.totalorder %v9668_v15, %v10742_v9 }
 0x2e9   : > { %3651 = vmatmul.mubr.f32.vlgmr.msra.gmra.mrb[14].mxu1 %v9516_v62 }
 0x2ea   : > { %6808 = vmatpush1.bf16.msra.mxu1 %v9484_v45  ;;  %7001 = vmatpush3.bf16.msk.msra.mxu0 %vm9564_vm2, %v10688_v61  ;;  %vm518_vm2 = vcmp.ge.s32.totalorder %v9668_v15, %v10736_v22 }
 0x2eb   : > { %6810 = vmatprep.subr.bf16.mxu1 %v9488_v26  ;;  %7002 = vmatprep.subr.bf16.mxu0 %v10581_v29  ;;  %v647_v26 = vsel %vm607_vm7, 1.0, %v10548_v27 }
 0x2ec   : > { %3769 = vmatprep.mubr.f32.mxu1 %v10548_v27 }
 0x2ee   : > { %6812 = vmatpush1.bf16.msra.mxu1 %v9490_v50  ;;  %7004 = vmatpush3.bf16.msk.msra.mxu0 %vm9456_vm4, %v10688_v61  ;;  %vm572_vm4 = vcmp.lt.s32.totalorder %v9665_v52, %v10739_v57  ;;  %v10743_v50 = vld [vmem:[#allocation33_spill] sm:$0xff] }
 0x2ef   : > { %6814 = vmatprep.subr.bf16.mxu1 %v9492_v46  ;;  %vm612_vm5 = vmand %vm524_vm10, %vm572_vm4  ;;  %vm577_vm1 = vcmp.lt.s32.totalorder %v9665_v52, %v10743_v50  ;;  %vm534_vm4 = vcmp.ge.s32.totalorder %v9665_v52, %v10746_v10  ;;  %v651_v46 = vsel %vm9708_vm9, 1.0, %v10548_v27  ;;  %vm576_vm14 = vcmp.lt.s32.totalorder %v9668_v15, %v10743_v50 }
 0x2f0   : > { %v652_v63 = vsel %vm612_vm5, 1.0, %v10548_v27  ;;  %v9757_v25 = vsub.f32 %v651_v46, %v651_v46 }
 0x2f1   : > { %6211 = vmatmul.mubr.f32.vlgmr.msra.gmra.mrb[12].mxu0 %v9504_v33 }
 0x2f2   : > { %6816 = vmatpush1.bf16.msra.mxu1 %v9494_v54 }
 0x2f3   : > { %6818 = vmatprep.subr.bf16.mxu1 %v9496_v41  ;;  %v9744_v41 = vsub.f32 %v647_v26, %v647_v26 }
 0x2f5   : > { %v3959_v0 = vand.u32 4294901760, %v9744_v41 }
 0x2f6   : > { %6820 = vmatpush1.bf16.msra.mxu1 %v9498_v38  ;;  %v9746_v38 = vsub.f32 %v652_v63, %v652_v63 }
 0x2f7   : > { %6822 = vmatprep.subr.msk.bf16.mxu1 %vm10725_vm8, %v10688_v61  ;;  %vm566_vm8 = vcmp.lt.s32.totalorder %v9668_v15, %v10737_v3  ;;  %v3977_v3 = vand.u32 4294901760, %v9757_v25 }
 0x2f8   : > { %vm9698_vm6 = vmand %vm518_vm2, %vm566_vm8  ;;  %vm582_vm2 = vcmp.lt.s32.totalorder %v9665_v52, %v10747_v24  ;;  %v3971_v42 = vand.u32 4294901760, %v9746_v38 }
 0x2f9   : > { %3771 = vmatmul.mubr.f32.vlgmr.msra.gmra.mrb[14].mxu1 %v9504_v33  ;;  %v646_v59 = vsel %vm9698_vm6, 1.0, %v10548_v27  ;;  %vm9748_vm10 = vmand %vm534_vm4, %vm582_vm2  ;;  %vm544_vm2 = vcmp.ge.s32.totalorder %v9665_v52, %v10763_v12 }
 0x2fa   : > { %6824 = vmatpush1.bf16.msk.msra.mxu1 %vm10727_vm11, %v10688_v61  ;;  %3857 = vmatprep.mubr.f32.mxu1 %v10548_v27  ;;  %vm529_vm11 = vcmp.ge.s32.totalorder %v9665_v52, %v10742_v9  ;;  %v9755_v5 = vsub.f32 %v646_v59, %v646_v59  ;;  %v662_v21 = vsel %vm9748_vm10, 1.0, %v10548_v27  ;;  %vm9787_vm4 = vmpackc.low %vm9708_vm9, %vm9698_vm6  ;;  %vm597_vm9 = vcmp.lt.s32.totalorder %v9665_v52, %v10774_v19 }
 0x2fb   : > { %6826 = vmatprep.subr.msk.bf16.mxu1 %vm10729_vm15, %v10688_v61  ;;  %vm9719_vm15 = vmpackc.low %vm612_vm5, %vm607_vm7  ;;  %vm533_vm5 = vcmp.ge.s32.totalorder %v9668_v15, %v10746_v10  ;;  %vm581_vm7 = vcmp.lt.s32.totalorder %v9668_v15, %v10747_v24  ;;  %v9814_v56 = vsub.f32 %v662_v21, %v662_v21  ;;  %v3972_v34 = vsub.f32 %v9746_v38, %v3971_v42 }
 0x2fc   : > { %vm9769_vm8 = vmand %vm533_vm5, %vm581_vm7  ;;  %vm543_vm5 = vcmp.ge.s32.totalorder %v9668_v15, %v10763_v12  ;;  %vm591_vm7 = vcmp.lt.s32.totalorder %v9668_v15, %v10764_v6  ;;  %v3965_v22 = vand.u32 4294901760, %v9755_v5 }
 0x2fd   : > { %v661_v1 = vsel %vm9769_vm8, 1.0, %v10548_v27  ;;  %v3995_v17 = vand.u32 4294901760, %v9814_v56  ;;  %v3973_v54 = vand.u32 4294901760, %v3972_v34 }
 0x2fe   : > { %6828 = vmatpush1.bf16.msk.msra.mxu1 %vm9258_vm12, %v10688_v61  ;;  %vm9736_vm12 = vmand %vm529_vm11, %vm577_vm1  ;;  %vm539_vm11 = vcmp.ge.s32.totalorder %v9665_v52, %v10758_v48  ;;  %vm587_vm1 = vcmp.lt.s32.totalorder %v9665_v52, %v10759_v13  ;;  %v9832_v40 = vsub.f32 %v661_v1, %v661_v1  ;;  %v3966_v58 = vsub.f32 %v9755_v5, %v3965_v22 }
 0x2ff   : > { %6830 = vmatprep.subr.msk.bf16.mxu1 %vm9306_vm13, %v10688_v61  ;;  %v657_v32 = vsel %vm9736_vm12, 1.0, %v10548_v27  ;;  %vm9759_vm13 = vmand %vm528_vm0, %vm576_vm14  ;;  %vm592_vm0 = vcmp.lt.s32.totalorder %v9665_v52, %v10764_v6  ;;  %vm586_vm14 = vcmp.lt.s32.totalorder %v9668_v15, %v10759_v13  ;;  %v3996_v23 = vsub.f32 %v9814_v56, %v3995_v17 }
 0x300   : > { %v656_v60 = vsel %vm9759_vm13, 1.0, %v10548_v27  ;;  %v9791_v18 = vsub.f32 %v657_v32, %v657_v32  ;;  %vm9804_vm6 = vmpackc.low %vm9748_vm10, %vm9736_vm12  ;;  %vm10769_vm10 = vnez %v10734_v55  ;;  %v3960_v55 = vsub.f32 %v9744_v41, %v3959_v0 }
 0x301   : > { %v9816_v44 = vsub.f32 %v656_v60, %v656_v60  ;;  %vm9821_vm12 = vmand %vm539_vm11, %vm587_vm1  ;;  %v3978_v32 = vsub.f32 %v9757_v25, %v3977_v3  ;;  %v3967_v4 = vand.u32 4294901760, %v3966_v58 }
 0x302   : > { %6832 = vmatpush1.bf16.msk.msra.mxu1 %vm9345_vm3, %v10688_v61  ;;  %vm10760_vm3 = vnez %v10733_v28  ;;  %v667_v16 = vsel %vm9821_vm12, 1.0, %v10548_v27  ;;  %vm9867_vm11 = vmand %vm543_vm5, %vm591_vm7  ;;  %v3983_v57 = vand.u32 4294901760, %v9791_v18  ;;  %vm601_vm7 = vcmp.lt.s32.totalorder %v9668_v15, %v10778_v8 }
 0x303   : > { %6834 = vmatprep.subr.msk.bf16.mxu1 %vm10760_vm3, %v10688_v61  ;;  %vm9834_vm3 = vmand %vm544_vm2, %vm592_vm0  ;;  %vm10775_vm2 = vcmp.ge.s32.totalorder %v9668_v15, %v10758_v48  ;;  %v9896_v9 = vsub.f32 %v667_v16, %v667_v16  ;;  %v671_v11 = vsel %vm9867_vm11, 1.0, %v10548_v27  ;;  %v3961_v46 = vand.u32 4294901760, %v3960_v55 }
 0x304   : > { %v672_v53 = vsel %vm9834_vm3, 1.0, %v10548_v27  ;;  %vm9859_vm0 = vmand %vm10775_vm2, %vm586_vm14  ;;  %vm10781_vm14 = vcmp.ge.s32.totalorder %v9665_v52, %v10772_v51  ;;  %vm596_vm2 = vcmp.lt.s32.totalorder %v9668_v15, %v10774_v19  ;;  %v3984_v21 = vsub.f32 %v9791_v18, %v3983_v57 }
 0x305   : > { %vm9883_vm5 = vmand %vm10781_vm14, %vm597_vm9  ;;  %v9898_v50 = vsub.f32 %v672_v53, %v672_v53  ;;  %vm10784_vm9 = vcmp.ge.s32.totalorder %v9665_v52, %v10773_v49  ;;  %v3989_v60 = vand.u32 4294901760, %v9816_v44  ;;  %v4001_v48 = vand.u32 4294901760, %v9832_v40 }
 0x306   : > { %6836 = vmatpush1.bf16.msk.msra.mxu1 %vm10769_vm10, %v10688_v61  ;;  %vm602_vm10 = vcmp.lt.s32.totalorder %v9665_v52, %v10778_v8  ;;  %vm9920_vm1 = vmpackc.low %vm9769_vm8, %vm9759_vm13  ;;  %v666_v52 = vsel %vm9859_vm0, 1.0, %v10548_v27  ;;  %v677_v10 = vsel %vm9883_vm5, 1.0, %v10548_v27  ;;  %vm10791_vm8 = vcmp.ge.s32.totalorder %v9668_v15, %v10772_v51 }
 0x307   : > { %6838 = vmatprep.subr.msk.bf16.mxu1 %vm9719_vm15, %v10688_v61  ;;  %vm9906_vm14 = vmand %vm10784_vm9, %vm602_vm10  ;;  %v9971_v13 = vsub.f32 %v666_v52, %v666_v52  ;;  %v9973_v1 = vsub.f32 %v671_v11, %v671_v11  ;;  %v9975_v12 = vsub.f32 %v677_v10, %v677_v10  ;;  %v10459_v19 = vand.u32 4294901760, %v9898_v50 }
 0x308   : > { %v682_v24 = vsel %vm9906_vm14, 1.0, %v10548_v27  ;;  %vm9940_vm13 = vmpackc.low %vm9834_vm3, %vm9821_vm12  ;;  %vm10794_vm3 = vcmp.ge.s32.totalorder %v9668_v15, %v10773_v49  ;;  %v10460_v49 = vand.u32 4294901760, %v9896_v9  ;;  %v6853_v53 = vpack.c.bf16 %v3973_v54, %v3961_v46 }
 0x309   : > { %3859 = vmatmul.mubr.f32.vlgmr.msra.gmra.mrb[14].mxu1 %v9504_v33  ;;  %vm9956_vm12 = vmand %vm10791_vm8, %vm596_vm2  ;;  %v9977_v6 = vsub.f32 %v682_v24, %v682_v24  ;;  %v3979_v8 = vand.u32 4294901760, %v3978_v32  ;;  %v3985_v28 = vand.u32 4294901760, %v3984_v21  ;;  %v3997_v55 = vand.u32 4294901760, %v3996_v23 }
 0x30a   : > { %6840 = vmatpush1.bf16.msk.msra.mxu1 %vm9787_vm4, %v10688_v61  ;;  %3945 = vmatprep.mubr.f32.mxu1 %v10548_v27  ;;  %vm9985_vm10 = vmand %vm10794_vm3, %vm601_vm7  ;;  %v676_v15 = vsel %vm9956_vm12, 1.0, %v10548_v27  ;;  %v3990_v34 = vsub.f32 %v9816_v44, %v3989_v60  ;;  %v4002_v52 = vsub.f32 %v9832_v40, %v4001_v48  ;;  %v10464_v11 = vand.u32 4294901760, %v9971_v13 }
 0x30b   : > { %6842 = vmatprep.subr.msk.bf16.mxu1 %vm9804_vm6, %v10688_v61  ;;  %vm9996_vm2 = vmpackc.low %vm9867_vm11, %vm9859_vm0  ;;  %v681_v51 = vsel %vm9985_vm10, 1.0, %v10548_v27  ;;  %v10025_v31 = vsub.f32 %v676_v15, %v676_v15  ;;  %v10461_v10 = vand.u32 4294901760, %v9973_v1  ;;  %v4008_v46 = vsub.f32 %v9896_v9, %v10460_v49 }
 0x30c   : > { %vm10012_vm11 = vmpackc.low %vm9906_vm14, %vm9883_vm5  ;;  %v10027_v26 = vsub.f32 %v681_v51, %v681_v51  ;;  %v4020_v54 = vsub.f32 %v9898_v50, %v10459_v19  ;;  %v10462_v58 = vand.u32 4294901760, %v9975_v12  ;;  %v10463_v32 = vand.u32 4294901760, %v9977_v6 }
 0x30d   : > { %vm10038_vm0 = vmpackc.low %vm9985_vm10, %vm9956_vm12  ;;  %v6855_v21 = vpack.c.bf16 %v3979_v8, %v3967_v4  ;;  %v6857_v7 = vpack.c.bf16 %v3997_v55, %v3985_v28  ;;  %v3991_v23 = vand.u32 4294901760, %v3990_v34  ;;  %v4003_v30 = vand.u32 4294901760, %v4002_v52 }
 0x30e   : > { %6844 = vmatpush1.bf16.msk.msra.mxu1 %vm9920_vm1, %v10688_v61  ;;  %v4014_v15 = vsub.f32 %v9971_v13, %v10464_v11  ;;  %v4026_v51 = vsub.f32 %v9973_v1, %v10461_v10  ;;  %v4037_v19 = vand.u32 4294901760, %v10025_v31  ;;  %v10465_v49 = vand.u32 4294901760, %v10027_v26 }
 0x30f   : > { %6846 = vmatprep.subr.msk.bf16.mxu1 %vm9940_vm13, %v10688_v61  ;;  %v4009_v4 = vand.u32 4294901760, %v4008_v46  ;;  %v4021_v8 = vand.u32 4294901760, %v4020_v54  ;;  %v4032_v28 = vsub.f32 %v9975_v12, %v10462_v58  ;;  %v4044_v55 = vsub.f32 %v9977_v6, %v10463_v32 }
 0x310   : > { %v6859_v34 = vpack.c.bf16 %v4003_v30, %v3991_v23  ;;  %v4015_v52 = vand.u32 4294901760, %v4014_v15  ;;  %v4027_v10 = vand.u32 4294901760, %v4026_v51  ;;  %v4050_v46 = vsub.f32 %v10027_v26, %v10465_v49 }
 0x311   : > { %v6861_v54 = vpack.c.bf16 %v4021_v8, %v4009_v4  ;;  %v4033_v58 = vand.u32 4294901760, %v4032_v28  ;;  %v4045_v32 = vand.u32 4294901760, %v4044_v55  ;;  %v6869_v51 = vpack.c.bf16 %v9746_v38, %v9744_v41 }
 0x312   : > { %6848 = vmatpush1.bf16.msk.msra.mxu1 %vm9996_vm2, %v10688_v61  ;;  %v6863_v11 = vpack.c.bf16 %v4027_v10, %v4015_v52  ;;  %v6871_v49 = vpack.c.bf16 %v9757_v25, %v9755_v5  ;;  %v6875_v10 = vpack.c.bf16 %v9832_v40, %v9816_v44  ;;  %v6903_v4 = vpack.c.bf16 %v3977_v3, %v3965_v22 }
 0x313   : > { %6850 = vmatprep.subr.msk.bf16.mxu1 %vm10012_vm11, %v10688_v61  ;;  %v6865_v30 = vpack.c.bf16 %v4045_v32, %v4033_v58  ;;  %v6879_v58 = vpack.c.bf16 %v9973_v1, %v9971_v13  ;;  %v6881_v32 = vpack.c.bf16 %v9977_v6, %v9975_v12  ;;  %v6905_v8 = vpack.c.bf16 %v3995_v17, %v3983_v57  ;;  %v7119_v17 = vld [vmem:[%s7395_s9 + $0x18] sm:$0xff] }
 0x314   : > { %v6907_v41 = vpack.c.bf16 %v4001_v48, %v3989_v60  ;;  %v10803_v38 = vand.u32 4294901760, %v9896_v9  ;;  %v10804_v5 = vand.u32 4294901760, %v9898_v50  ;;  %v10809_v40 = vand.u32 4294901760, %v10027_v26 }
 0x315   : > { %vm10814_vm5 = vnez %v10690_v14 }
 0x316   : > { %6852 = vmatpush1.bf16.msk.msra.mxu1 %vm10038_vm0, %v10688_v61  ;;  %v6909_v25 = vpack.c.bf16 %v10804_v5, %v10803_v38  ;;  %v6915_v22 = vpack.c.bf16 %v10809_v40, %v4037_v19 }
 0x317   : > { %6854 = vmatprep.subr.bf16.mxu1 %v6853_v53  ;;  %v4038_v53 = vsub.f32 %v10025_v31, %v4037_v19 }
 0x319   : > { %3951 = vmatmul.mubr.f32.vlgmr.msra.gmra.mrb[16].mxu1 %v9523_v2  ;;  %v4039_v23 = vand.u32 4294901760, %v4038_v53 }
 0x31a   : > { %6856 = vmatpush1.bf16.msra.mxu1 %v6855_v21  ;;  %4101 = vmatprep.mubr.f32.mxu1 %v10548_v27  ;;  %v4051_v21 = vand.u32 4294901760, %v4050_v46 }
 0x31b   : > { %6858 = vmatprep.subr.bf16.mxu1 %v6857_v7  ;;  %v6873_v7 = vpack.c.bf16 %v9814_v56, %v9791_v18  ;;  %v10805_v18 = vand.u32 4294901760, %v9971_v13  ;;  %v10808_v56 = vand.u32 4294901760, %v9977_v6  ;;  %v7120_v13 = vld [vmem:[%s7395_s9 + $0x20] sm:$0xff] }
 0x31c   : > { %v6867_v15 = vpack.c.bf16 %v4051_v21, %v4039_v23 }
 0x31e   : > { %6860 = vmatpush1.bf16.msra.mxu1 %v6859_v34 }
 0x31f   : > { %6862 = vmatprep.subr.bf16.mxu1 %v6861_v54 }
 0x322   : > { %6864 = vmatpush1.bf16.msra.mxu1 %v6863_v11  ;;  %v6877_v11 = vpack.c.bf16 %v9898_v50, %v9896_v9 }
 0x323   : > { %6866 = vmatprep.subr.bf16.mxu1 %v6865_v30 }
 0x326   : > { %6868 = vmatpush1.bf16.msra.mxu1 %v6867_v15 }
 0x327   : > { %6870 = vmatprep.subr.bf16.mxu1 %v6869_v51 }
 0x329   : > { %4103 = vmatmul.mubr.f32.vlgmr.msra.gmra.mrb[16].mxu1 %v9504_v33 }
 0x32a   : > { %6872 = vmatpush1.bf16.msra.mxu1 %v6871_v49  ;;  %4205 = vmatprep.mubr.f32.mxu1 %v10548_v27  ;;  %v6883_v49 = vpack.c.bf16 %v10027_v26, %v10025_v31 }
 0x32b   : > { %6874 = vmatprep.subr.bf16.mxu1 %v6873_v7 }
 0x32e   : > { %6876 = vmatpush1.bf16.msra.mxu1 %v6875_v10 }
 0x32f   : > { %6878 = vmatprep.subr.bf16.mxu1 %v6877_v11 }
 0x332   : > { %6880 = vmatpush1.bf16.msra.mxu1 %v6879_v58 }
 0x333   : > { %6882 = vmatprep.subr.bf16.mxu1 %v6881_v32 }
 0x336   : > { %6884 = vmatpush1.bf16.msra.mxu1 %v6883_v49 }
 0x337   : > { %6886 = vmatprep.subr.msk.bf16.mxu1 %vm9719_vm15, %v10688_v61 }
 0x339   : > { %4208 = vmatmul.mubr.f32.vlgmr.msra.gmra.mrb[16].mxu1 %v9507_v47  ;;  %v6901_v47 = vpack.c.bf16 %v3971_v42, %v3959_v0  ;;  %v10806_v0 = vand.u32 4294901760, %v9973_v1  ;;  %v10807_v42 = vand.u32 4294901760, %v9975_v12 }
 0x33a   : > { %6888 = vmatpush1.bf16.msk.msra.mxu1 %vm9787_vm4, %v10688_v61  ;;  %4294 = vmatprep.mubr.f32.mxu1 %v10548_v27 }
 0x33b   : > { %6890 = vmatprep.subr.msk.bf16.mxu1 %vm9804_vm6, %v10688_v61  ;;  %v6913_v44 = vpack.c.bf16 %v10808_v56, %v10807_v42 }
 0x33e   : > { %6892 = vmatpush1.bf16.msk.msra.mxu1 %vm9920_vm1, %v10688_v61 }
 0x33f   : > { %6894 = vmatprep.subr.msk.bf16.mxu1 %vm9940_vm13, %v10688_v61 }
 0x342   : > { %6896 = vmatpush1.bf16.msk.msra.mxu1 %vm9996_vm2, %v10688_v61 }
 0x343   : > { %6898 = vmatprep.subr.msk.bf16.mxu1 %vm10012_vm11, %v10688_v61 }
 0x346   : > { %6900 = vmatpush1.bf16.msk.msra.mxu1 %vm10038_vm0, %v10688_v61 }
 0x347   : > { %6902 = vmatprep.subr.bf16.mxu1 %v6901_v47 }
 0x349   : > { %4298 = vmatmul.mubr.f32.vlgmr.msra.gmra.mrb[16].mxu1 %v9516_v62  ;;  %v6911_v62 = vpack.c.bf16 %v10806_v0, %v10805_v18 }
 0x34a   : > { %6904 = vmatpush1.bf16.msra.mxu1 %v6903_v4  ;;  %4416 = vmatprep.mubr.f32.mxu1 %v10548_v27 }
 0x34b   : > { %6906 = vmatprep.subr.bf16.mxu1 %v6905_v8 }
 0x34e   : > { %6908 = vmatpush1.bf16.msra.mxu1 %v6907_v41 }
 0x34f   : > { %6910 = vmatprep.subr.bf16.mxu1 %v6909_v25 }
 0x352   : > { %6912 = vmatpush1.bf16.msra.mxu1 %v6911_v62 }
 0x353   : > { %6914 = vmatprep.subr.bf16.mxu1 %v6913_v44 }
 0x356   : > { %6916 = vmatpush1.bf16.msra.mxu1 %v6915_v22 }
 0x357   : > { %6918 = vmatprep.subr.msk.bf16.mxu1 %vm9719_vm15, %v10688_v61  ;;  %vm10810_vm15 = vnez %v10703_v36 }
 0x359   : > { %4418 = vmatmul.mubr.f32.vlgmr.msra.gmra.mrb[16].mxu1 %v9504_v33 }
 0x35a   : > { %6920 = vmatpush1.bf16.msk.msra.mxu1 %vm9787_vm4, %v10688_v61  ;;  %4504 = vmatprep.mubr.f32.mxu1 %v10548_v27  ;;  %vm10811_vm4 = vmmov 0  }
 0x35b   : > { %6922 = vmatprep.subr.msk.bf16.mxu1 %vm9804_vm6, %v10688_v61  ;;  %vm10812_vm6 = vnez %v10709_v20  ;;  %v7116_v20 = vld [vmem:[%s7395_s9] sm:$0xff] }
 0x35e   : > { %6924 = vmatpush1.bf16.msk.msra.mxu1 %vm9920_vm1, %v10688_v61  ;;  %vm10813_vm1 = vnez %v10715_v39 }
 0x35f   : > { %6926 = vmatprep.subr.msk.bf16.mxu1 %vm9940_vm13, %v10688_v61 }
 0x362   : > { %6928 = vmatpush1.bf16.msk.msra.mxu1 %vm9996_vm2, %v10688_v61 }
 0x363   : > { %6930 = vmatprep.subr.msk.bf16.mxu1 %vm10012_vm11, %v10688_v61 }
 0x366   : > { %6932 = vmatpush1.bf16.msk.msra.mxu1 %vm10038_vm0, %v10688_v61 }
 0x367   : > { %6933 = vmatprep.subr.bf16.mxu1 %v10581_v29 }
 0x369   : > { %4506 = vmatmul.mubr.f32.vlgmr.msra.gmra.mrb[16].mxu1 %v9504_v33 }
 0x36a   : > { %6935 = vmatpush3.bf16.msk.msra.mxu1 %vm10810_vm15, %v10688_v61  ;;  %6115 = vmatprep.mubr.msk.f32.mxu1 %vm10811_vm4, %v10548_v27 }
 0x36b   : > { %6936 = vmatprep.subr.bf16.mxu1 %v10581_v29 }
 0x36e   : > { %6938 = vmatpush3.bf16.msk.msra.mxu1 %vm10812_vm6, %v10688_v61 }
 0x36f   : > { %6939 = vmatprep.subr.bf16.mxu1 %v10581_v29 }
 0x372   : > { %6941 = vmatpush3.bf16.msk.msra.mxu1 %vm10813_vm1, %v10688_v61 }
 0x373   : > { %6942 = vmatprep.subr.bf16.mxu1 %v10581_v29 }
 0x376   : > { %6944 = vmatpush3.bf16.msk.msra.mxu1 %vm10814_vm5, %v10688_v61  ;;  %v7118_v61 = vld [vmem:[%s7395_s9 + $0x10] sm:$0xff] }
 0x379   : > { %6116 = vmatmul.mubr.f32.vlgmr.msra.gmra.mrb[18].mxu1 %v9523_v2 }
 0x3c4   : > { %v5045_v27 = vpop.f32.mrb[12].mxu0 }
 0x3c5   : > { %v6212_v33 = vpop.f32.mrb[13].mxu0 }
 0x3dc   : > { %v3860_v36 = vpop.f32.mrb[14].mxu1 }
 0x3dd   : > { %v5049_v45 = vsub.f32 %v7116_v20, %v3860_v36  ;;  %v3862_v37 = vpop.f32.mrb[15].mxu1 }
 0x3de   : > { %v5050_v3 = vsub.f32 %v7117_v43, %v3862_v37 }
 0x3df   : > { %v5054_v39 = vand.u32 2147483647, %v5049_v45 }
 0x3e0   : > { %v5055_v57 = vand.u32 2147483647, %v5050_v3 }
 0x3e1   : > { %5074 = vst [vmem:[%s165_s30] sm:$0xff] %v5054_v39 }
 0x3e2   : > { %5075 = vst [vmem:[%s165_s30 + $0x8] sm:$0xff] %v5055_v57 }
 0x43c   : > { %v4507_v29 = vpop.f32.mrb[16].mxu1 }
 0x43d   : > { %v5051_v14 = vsub.f32 %v7118_v61, %v4507_v29  ;;  %v4509_v2 = vpop.f32.mrb[17].mxu1 }
 0x43e   : > { %v5052_v9 = vsub.f32 %v7119_v17, %v4509_v2 }
 0x43f   : > { %v5056_v50 = vand.u32 2147483647, %v5051_v14 }
 0x440   : > { %v5057_v63 = vand.u32 2147483647, %v5052_v9 }
 0x441   : > { %5076 = vst [vmem:[%s165_s30 + $0x10] sm:$0xff] %v5056_v50 }
 0x442   : > { %5077 = vst [vmem:[%s165_s30 + $0x18] sm:$0xff] %v5057_v63 }
 0x44c   : > { %v4591_v59 = vpop.f32.mrb[18].mxu1 }
 0x44d   : > { %v7006_v60 = vadd.f32 %v5045_v27, %v4591_v59  ;;  %v6117_v48 = vpop.f32.mrb[19].mxu1 }
 0x44f   : > { %v5053_v1 = vsub.f32 %v7120_v13, %v7006_v60 }
 0x451   : > { %v5058_v12 = vand.u32 2147483647, %v5053_v1 }
 0x453   : > { %5078 = vst [vmem:[%s165_s30 + $0x20] sm:$0xff] %v5058_v12 }
 0x454   : > { %7174 = shalt.err (!%p7171_p6)
}
 0x455   : > { %s7175_s28 = scalar_lea.hbm %s10210_s17, 640  ;;  %s7179_s7 = scalar_lea.hbm %s10260_s2, 2560 }
 0x456   : > { %p7176_p8 = scmp.ne.s32.totalorder %s10210_s17, %s7175_s28  ;;  %p7180_p3 = scmp.lt.u32.totalorder %s10210_s17, %s10260_s2 }
 0x457   : > { %p7181_p7 = scmp.lt.u32.totalorder %s7179_s7, %s7175_s28  ;;  %p7183_p11 = scmp.lt.u32.totalorder %s7175_s28, %s10210_s17 }
 0x458   : > { %p7177_p9 = pnand %p7176_p8, %p10815_p12 }
 0x459   : > { %p7182_p5 = por %p7181_p7, %p7180_p3 }
 0x45a   : > { %p7178_p10 = pneg %p7177_p9 }
 0x45b   : > { %p7184_p0 = por %p7183_p11, %p7182_p5 }
 0x45d   : > { %p7185_p2 = pnand %p7184_p0, %p7178_p10 }
 0x45f   : > { %7188 = shalt.err (!%p7185_p2)
}
 0x460   : > { %7051 = dma.vmem_to_hbm [thread:$0]  (%p10815_p12), %s10212_s14, 640, %s10210_s17, %s5080_s18  }
 0x461 PF: > { %p7062_p13 = scmp.ge.s32.totalorder %s7245_s24, 2  ;;  %s5108_s11 = sand.u32 1, %s7225_s19  }
 0x462   : > { %p10816_p1 = scmp.ne.s32.totalorder %s10469_s5, 0  ;;  %s5109_s9 = scalar_lea.sflag [#allocation8], %s5108_s11 }
 0x464   : > { %p7058_p4 = pnand %p7062_p13, %p10816_p1 }
 0x466   : > { %7220 = dma.done.wait (!%p7058_p4), %s5109_s9, 640  }
 0x467   : > { %7222 = vsyncadd (!%p7058_p4), %s5109_s9, 4294966656  ;;  %s22_s24 = sadd.s32 1, %s7245_s24   ;;  %s10817_s19 = smov %s7229_s20 }
 0x468   : > { %p19_p6 = scmp.ge.s32.totalorder %s22_s24, 6   ;;  %s10818_s20 = smov %s7233_s21 }
 0x469   : > { %s10819_s21 = smov %s7337_s4  ;;  %s10820_s22 = smov %s7241_s23 }
 0x46a   : > { %s10821_s23 = smov %s10823_s26  ;;  %21 = sbr.rel (!%p19_p6) target bundleno = 18 (0x12), region = 73 }
 0x471   :  { %5114 = vsyncpa [#allocation7], 1 }
 0x472   :  { %5116 = vsyncpa [#allocation7 + $0x1], 1 }
 0x473   :  { %5117 = vsyncpa [#allocation8], 1 }
 0x474   :  { %5119 = vsyncpa [#allocation8 + $0x1], 1 }

</bundles_post_ra>
